<compile_context>
chip_gen: v6e
topology: v6e:2x2x1
jax: 0.10.0
libtpu: 0.0.40
codegen_flags: <defaults>
</compile_context>

<pallas_src>
import jax
import jax.numpy as jnp
from jax.experimental import pallas as pl
from jax.experimental.pallas import tpu as pltpu


FEAT_DIM = 1000   # "1000-class" backbone output (logical)
K_PAD = 1024      # padded contraction dim (multiple of 256)
HIDDEN = 512
OUT_DIM = 3       # logical number of actions
OUT_PAD = 128     # lane-dense padded logits width
NEG_BIG = -1e30   # padded-logit bias -> exp() == 0 under log-softmax


def _round_up(x, m):
    return (x + m - 1) // m * m


def _pick_tile_m(batch):
    # tm multiple of 16 (bf16 packs 16 sublanes); 128 fills v5e's MXU M and
    # gives v7x >= 2 grid steps for B > 128; 256 only for large batches.
    if batch > 512:
        return 256
    return min(128, _round_up(batch, 16))


# ----------------------------------------------------------------------------
# Fused Pallas kernel: backbone projection + whole fc head, one batch tile.
# ----------------------------------------------------------------------------
def qnet_fused_kernel(x_ref, wp_ref, w1_ref, b1_ref, w2_ref, b2_ref, o_ref):
    # Backbone stand-in: (TM, in_pad) @ (in_pad, 1024) -> padded 1000-dim feats.
    x = x_ref[...].astype(jnp.bfloat16)
    feats = jnp.dot(x, wp_ref[...], preferred_element_type=jnp.float32)

    # fc[0..1]: Linear(1000, 512) + ReLU.  W1 rows >= 1000 are zero, so padded
    # feature columns contribute nothing.  b1 already contains folded bp @ W1.
    h = jnp.dot(feats.astype(jnp.bfloat16), w1_ref[...],
                preferred_element_type=jnp.float32)          # (TM, 512)
    h = jnp.maximum(h + b1_ref[...], 0.0)

    # fc[2]: Dropout(p=0.2) -> identity in inference mode.
    # TODO(synk): training-mode dropout (pltpu.prng_seed/prng_random_bits mask
    # + 1/(1-p) scale) intentionally omitted.

    # fc[3]: Linear(512, 3) padded to 128 lanes; pad columns of W2 are zero and
    # pad entries of b2 are -1e30, so they vanish in the softmax normalization.
    logits = jnp.dot(h, w2_ref[...], preferred_element_type=jnp.float32)
    logits = logits + b2_ref[...]                             # (TM, 128)

    # fc[4]: LogSoftmax(dim=1), numerically stable (pad cols exp to exactly 0).
    m = jnp.max(logits, axis=1, keepdims=True)
    z = logits - m
    lse = jnp.log(jnp.sum(jnp.exp(z), axis=1, keepdims=True))
    o_ref[...] = z - lse


def qnetwork_fused(flat, wp, w1, b1, w2, b2):
    """flat: (B, in_pad) f32 -> (B, 3) f32 log-probabilities."""
    B, in_pad = flat.shape
    k_pad = wp.shape[1]
    hidden = w1.shape[1]
    out_pad = w2.shape[1]

    tm = _pick_tile_m(B)
    b_pad = _round_up(B, tm)
    if b_pad != B:
        flat = jnp.pad(flat, ((0, b_pad - B), (0, 0)))
    grid = (b_pad // tm,)

    flops = 2 * b_pad * (in_pad * k_pad + k_pad * hidden + hidden * out_pad)
    bytes_accessed = (wp.size * wp.dtype.itemsize
                      + w1.size * w1.dtype.itemsize
                      + w2.size * w2.dtype.itemsize
                      + b1.size * 4 + b2.size * 4
                      + flat.size * 4 + b_pad * out_pad * 4)

    resident = pl.Buffered(buffer_count=1)   # weights never change block index

    out = pl.pallas_call(
        qnet_fused_kernel,
        out_shape=jax.ShapeDtypeStruct((b_pad, out_pad), jnp.float32),
        grid=grid,
        in_specs=[
            pl.BlockSpec((tm, in_pad), lambda i: (i, 0)),       # flat (streamed)
            pl.BlockSpec((in_pad, k_pad), lambda i: (0, 0),     # wp (resident)
                         pipeline_mode=resident),
            pl.BlockSpec((k_pad, hidden), lambda i: (0, 0),     # W1 (resident)
                         pipeline_mode=resident),
            pl.BlockSpec((1, hidden), lambda i: (0, 0),         # b1 (+ folded bp)
                         pipeline_mode=resident),
            pl.BlockSpec((hidden, out_pad), lambda i: (0, 0),   # W2 (padded cols)
                         pipeline_mode=resident),
            pl.BlockSpec((1, out_pad), lambda i: (0, 0),        # b2 (-1e30 pads)
                         pipeline_mode=resident),
        ],
        out_specs=pl.BlockSpec((tm, out_pad), lambda i: (i, 0)),
        compiler_params=pltpu.CompilerParams(
            dimension_semantics=("parallel",),            # batch rows independent
            vmem_limit_bytes=32 * 1024 * 1024),
        cost_estimate=pl.CostEstimate(
            flops=flops,
            transcendentals=b_pad * out_pad,
            bytes_accessed=bytes_accessed),
    )(flat, wp, w1, b1, w2, b2)
    return out[:B, :OUT_DIM]


# ----------------------------------------------------------------------------
# QNetwork wrapper + pure-JAX reference.
# ----------------------------------------------------------------------------
def _flatten_pad(x_nchw, in_pad):
    B = x_nchw.shape[0]
    flat = x_nchw.reshape(B, -1).astype(jnp.float32)
    d_in = flat.shape[1]
    if in_pad != d_in:
        flat = jnp.pad(flat, ((0, 0), (0, in_pad - d_in)))
    return flat


def qnetwork_forward(x_nchw, params):
    # TODO(synk): the real `my_pretrained_model` is an external torchvision-style
    # classifier emitting 1000 logits; here it is a deterministic flatten +
    # linear projection to 1000 (padded to 1024) features, fused into the kernel.
    in_pad = params["wp"].shape[0]
    flat = _flatten_pad(x_nchw, in_pad)
    return qnetwork_fused(flat, params["wp"], params["w1"], params["b1"],
                          params["w2"], params["b2"])


def qnetwork_reference(x_nchw, params):
    """Pure-JAX reference using the same bf16 weights / f32 accumulation."""
    in_pad = params["wp"].shape[0]
    flat = _flatten_pad(x_nchw, in_pad)
    feats = jnp.dot(flat.astype(jnp.bfloat16), params["wp"],
                    preferred_element_type=jnp.float32)
    h = jnp.maximum(
        jnp.dot(feats.astype(jnp.bfloat16), params["w1"],
                preferred_element_type=jnp.float32) + params["b1"], 0.0)
    logits = jnp.dot(h, params["w2"][:, :OUT_DIM],
                     preferred_element_type=jnp.float32) + params["b2"][:, :OUT_DIM]
    return jax.nn.log_softmax(logits, axis=1)


def init_params(key, in_dim, feat_dim=FEAT_DIM, hidden=HIDDEN,
                out_dim=OUT_DIM, k_pad=K_PAD, out_pad=OUT_PAD):
    k0, k1, k2, k3, k4, k5 = jax.random.split(key, 6)
    sp = 1.0 / jnp.sqrt(in_dim)
    s1 = 1.0 / jnp.sqrt(feat_dim)
    s2 = 1.0 / jnp.sqrt(hidden)

    wp = jax.random.uniform(k0, (in_dim, feat_dim), jnp.float32, -sp, sp)
    bp = jax.random.uniform(k3, (1, feat_dim), jnp.float32, -sp, sp)
    w1 = jax.random.uniform(k1, (feat_dim, hidden), jnp.float32, -s1, s1)
    b1 = jax.random.uniform(k4, (1, hidden), jnp.float32, -s1, s1)
    w2 = jax.random.uniform(k2, (hidden, out_dim), jnp.float32, -s2, s2)
    b2 = jax.random.uniform(k5, (1, out_dim), jnp.float32, -s2, s2)

    # Fold the backbone bias into b1: relu(((x@wp)+bp)@W1 + b1) == relu((x@wp)@W1 + b1_eff).
    b1_eff = b1 + jnp.dot(bp, w1)

    in_pad = _round_up(in_dim, 256)          # align K of the first matmul
    k_col_pad = k_pad - feat_dim             # 1000 -> 1024 contraction padding
    o_col_pad = out_pad - out_dim            # 3 -> 128 lane-dense logits

    return {
        # Large weights in bf16, contraction dims zero-padded.
        "wp": jnp.pad(wp, ((0, in_pad - in_dim), (0, k_col_pad))).astype(jnp.bfloat16),
        "w1": jnp.pad(w1, ((0, k_col_pad), (0, 0))).astype(jnp.bfloat16),
        "b1": b1_eff,                                                       # f32
        "w2": jnp.pad(w2, ((0, 0), (0, o_col_pad))),                        # f32, zero cols
        "b2": jnp.pad(b2, ((0, 0), (0, o_col_pad)), constant_values=NEG_BIG),
    }


if __name__ == "__main__":
    key = jax.random.PRNGKey(0)
    kx, kp = jax.random.split(key)

    # Small NCHW input consistent with an image-classifier backbone.
    B, C, H, W = 2, 4, 16, 16
    x = jax.random.normal(kx, (B, C, H, W), dtype=jnp.float32)

    params = init_params(kp, in_dim=C * H * W)

    out = qnetwork_forward(x, params)
    out = jax.block_until_ready(out)

    ref = qnetwork_reference(x, params)
    assert out.shape == (B, OUT_DIM)
    assert jnp.allclose(out, ref, atol=2e-2, rtol=2e-2), "mismatch vs reference"
    # log-softmax rows must exponentiate-sum to 1 (pad logits contribute 0)
    assert jnp.allclose(jnp.sum(jnp.exp(out), axis=1), 1.0, atol=1e-3)

    print("KERNEL_OK")
</pallas_src>

<mosaic_0001>
module attributes {stable_mosaic.version = 11 : i64} {
  func.func @qnet_fused_kernel(%arg0: i32, %arg1: memref<16x1024xf32, #tpu.memory_space<vmem>>, %arg2: memref<1024x1024xbf16, #tpu.memory_space<vmem>>, %arg3: memref<1024x512xbf16, #tpu.memory_space<vmem>>, %arg4: memref<1x512xf32, #tpu.memory_space<vmem>>, %arg5: memref<512x128xf32, #tpu.memory_space<vmem>>, %arg6: memref<1x128xf32, #tpu.memory_space<vmem>>, %arg7: memref<16x128xf32, #tpu.memory_space<vmem>>) attributes {dimension_semantics = [#tpu.dimension_semantics<parallel>], iteration_bounds = array<i64: 1>, scalar_prefetch = 0 : i64, scratch_operands = 0 : i64, tpu.core_type = #tpu.core_type<tc>, window_params = [{transform_indices = @transform_0, window_bounds = array<i64: 16, 1024>}, {pipeline_mode = #tpu.pipeline_mode<synchronous>, transform_indices = @transform_1, window_bounds = array<i64: 1024, 1024>}, {pipeline_mode = #tpu.pipeline_mode<synchronous>, transform_indices = @transform_2, window_bounds = array<i64: 1024, 512>}, {pipeline_mode = #tpu.pipeline_mode<synchronous>, transform_indices = @transform_3, window_bounds = array<i64: 1, 512>}, {pipeline_mode = #tpu.pipeline_mode<synchronous>, transform_indices = @transform_4, window_bounds = array<i64: 512, 128>}, {pipeline_mode = #tpu.pipeline_mode<synchronous>, transform_indices = @transform_5, window_bounds = array<i64: 1, 128>}, {transform_indices = @transform_6, window_bounds = array<i64: 16, 128>}]} {
    %c0 = arith.constant 0 : index
    %c0_0 = arith.constant 0 : index
    %0 = vector.load %arg1[%c0, %c0_0] : memref<16x1024xf32, #tpu.memory_space<vmem>>, vector<16x1024xf32>
    %1 = arith.truncf %0 : vector<16x1024xf32> to vector<16x1024xbf16>
    %c0_1 = arith.constant 0 : index
    %c0_2 = arith.constant 0 : index
    %2 = vector.load %arg2[%c0_1, %c0_2] : memref<1024x1024xbf16, #tpu.memory_space<vmem>>, vector<1024x1024xbf16>
    %cst = arith.constant dense<0.000000e+00> : vector<16x1024xf32>
    %3 = tpu.matmul %1, %2, %cst {dimension_numbers = #tpu.dot_dimension_numbers<[1], [0], [0], [1], [0, 0, 1, 1], [], []>} : vector<16x1024xbf16>, vector<1024x1024xbf16>, vector<16x1024xf32> -> vector<16x1024xf32>
    %4 = arith.truncf %3 : vector<16x1024xf32> to vector<16x1024xbf16>
    %c0_3 = arith.constant 0 : index
    %c0_4 = arith.constant 0 : index
    %5 = vector.load %arg3[%c0_3, %c0_4] : memref<1024x512xbf16, #tpu.memory_space<vmem>>, vector<1024x512xbf16>
    %cst_5 = arith.constant dense<0.000000e+00> : vector<16x512xf32>
    %6 = tpu.matmul %4, %5, %cst_5 {dimension_numbers = #tpu.dot_dimension_numbers<[1], [0], [0], [1], [0, 0, 1, 1], [], []>} : vector<16x1024xbf16>, vector<1024x512xbf16>, vector<16x512xf32> -> vector<16x512xf32>
    %c0_6 = arith.constant 0 : index
    %c0_7 = arith.constant 0 : index
    %7 = vector.load %arg4[%c0_6, %c0_7] : memref<1x512xf32, #tpu.memory_space<vmem>>, vector<1x512xf32>
    %8 = vector.broadcast %7 : vector<1x512xf32> to vector<16x512xf32>
    %9 = arith.addf %6, %8 : vector<16x512xf32>
    %cst_8 = arith.constant 0.000000e+00 : f32
    %10 = vector.broadcast %cst_8 : f32 to vector<16x512xf32>
    %11 = arith.maximumf %9, %10 : vector<16x512xf32>
    %c0_9 = arith.constant 0 : index
    %c0_10 = arith.constant 0 : index
    %12 = vector.load %arg5[%c0_9, %c0_10] : memref<512x128xf32, #tpu.memory_space<vmem>>, vector<512x128xf32>
    %cst_11 = arith.constant dense<0.000000e+00> : vector<16x128xf32>
    %13 = tpu.matmul %11, %12, %cst_11 {dimension_numbers = #tpu.dot_dimension_numbers<[1], [0], [0], [1], [0, 0, 1, 1], [], []>} : vector<16x512xf32>, vector<512x128xf32>, vector<16x128xf32> -> vector<16x128xf32>
    %c0_12 = arith.constant 0 : index
    %c0_13 = arith.constant 0 : index
    %14 = vector.load %arg6[%c0_12, %c0_13] : memref<1x128xf32, #tpu.memory_space<vmem>>, vector<1x128xf32>
    %15 = vector.broadcast %14 : vector<1x128xf32> to vector<16x128xf32>
    %16 = arith.addf %13, %15 : vector<16x128xf32>
    %cst_14 = arith.constant dense<0xFF800000> : vector<16xf32>
    %17 = vector.multi_reduction <maximumf>, %16, %cst_14 [1] : vector<16x128xf32> to vector<16xf32>
    %18 = vector.shape_cast %17 : vector<16xf32> to vector<16x1xf32>
    %19 = vector.broadcast %18 : vector<16x1xf32> to vector<16x128xf32>
    %20 = arith.subf %16, %19 : vector<16x128xf32>
    %21 = math.exp %20 : vector<16x128xf32>
    %cst_15 = arith.constant dense<0.000000e+00> : vector<16xf32>
    %22 = vector.multi_reduction <add>, %21, %cst_15 [1] : vector<16x128xf32> to vector<16xf32>
    %23 = vector.shape_cast %22 : vector<16xf32> to vector<16x1xf32>
    %24 = math.log %23 : vector<16x1xf32>
    %25 = vector.broadcast %24 : vector<16x1xf32> to vector<16x128xf32>
    %26 = arith.subf %20, %25 : vector<16x128xf32>
    %c0_16 = arith.constant 0 : index
    %c0_17 = arith.constant 0 : index
    %27 = vector.load %arg7[%c0_16, %c0_17] : memref<16x128xf32, #tpu.memory_space<vmem>>, vector<16x128xf32>
    tpu.vector_store %arg7[%c0_16, %c0_17], %26 {strides = array<i32>} : memref<16x128xf32, #tpu.memory_space<vmem>>, vector<16x128xf32>,
    return
  }
  func.func @transform_0(%arg0: i32) -> (i32, i32) {
    %c0_i32 = arith.constant 0 : i32
    %c0_i32_0 = arith.constant 0 : i32
    return %arg0, %c0_i32 : i32, i32
  }
  func.func @transform_1(%arg0: i32) -> (i32, i32) {
    %c0_i32 = arith.constant 0 : i32
    %c0_i32_0 = arith.constant 0 : i32
    %c0_i32_1 = arith.constant 0 : i32
    return %c0_i32, %c0_i32_0 : i32, i32
  }
  func.func @transform_2(%arg0: i32) -> (i32, i32) {
    %c0_i32 = arith.constant 0 : i32
    %c0_i32_0 = arith.constant 0 : i32
    %c0_i32_1 = arith.constant 0 : i32
    return %c0_i32, %c0_i32_0 : i32, i32
  }
  func.func @transform_3(%arg0: i32) -> (i32, i32) {
    %c0_i32 = arith.constant 0 : i32
    %c0_i32_0 = arith.constant 0 : i32
    %c0_i32_1 = arith.constant 0 : i32
    return %c0_i32, %c0_i32_0 : i32, i32
  }
  func.func @transform_4(%arg0: i32) -> (i32, i32) {
    %c0_i32 = arith.constant 0 : i32
    %c0_i32_0 = arith.constant 0 : i32
    %c0_i32_1 = arith.constant 0 : i32
    return %c0_i32, %c0_i32_0 : i32, i32
  }
  func.func @transform_5(%arg0: i32) -> (i32, i32) {
    %c0_i32 = arith.constant 0 : i32
    %c0_i32_0 = arith.constant 0 : i32
    %c0_i32_1 = arith.constant 0 : i32
    return %c0_i32, %c0_i32_0 : i32, i32
  }
  func.func @transform_6(%arg0: i32) -> (i32, i32) {
    %c0_i32 = arith.constant 0 : i32
    %c0_i32_0 = arith.constant 0 : i32
    return %arg0, %c0_i32 : i32, i32
  }
}

</mosaic_0001>

<bundles_post_ra>
// kernel: tpu_custom_call.1
= control target key start
LH: loop header
LB: loop body
LE: loop exit
PB: predicated region body
PF: predicated region fallthrough
CT: control target
= control target key end

     0   :  { %11 = vsyncpa [#allocation3], 0  ;;  %s7716_s0 = inlined_call_operand.hbm [shape: f32[16,1024], index: 0, kind: input, shape index: {}]   ;;  %s7717_s1 = inlined_call_operand.hbm [shape: bf16[1024,1024], index: 1, kind: input, shape index: {}]   ;;  %s7718_s2 = inlined_call_operand.hbm [shape: bf16[1024,512], index: 2, kind: input, shape index: {}]   ;;  %s7719_s3 = inlined_call_operand.hbm [shape: f32[1,512], index: 3, kind: input, shape index: {}]   ;;  %s7720_s4 = inlined_call_operand.hbm [shape: f32[512,128], index: 4, kind: input, shape index: {}]   ;;  %s7721_s5 = inlined_call_operand.hbm [shape: f32[1,128], index: 5, kind: input, shape index: {}]   ;;  %s7722_s6 = inlined_call_operand.hbm [shape: f32[16,128], index: 6, kind: output, shape index: {}]  }
   0x1   :  { %12 = vsyncpa [#allocation6], 0 }
   0x2   :  { %13 = vsyncpa [#allocation9], 0 }
   0x3   :  { %14 = vsyncpa [#allocation12], 0 }
   0x4   :  { %15 = vsyncpa [#allocation4], 0  ;;  %s7469_s21 = smov [#allocation5]  }
   0x5   :  { %s33_s22 = sshll.u32 %s7469_s21, 4  ;;  %s34_s22 = int_to_ptr.vmem [resolvable:$true] %s33_s22 }
   0x6   :  { %s7327_s23 = scalar_lea.vmem %s34_s22, 65536  ;;  %p7332_p1 = scmp.lt.s32.totalorder %s34_s22, %s34_s22 }
   0x7   :  { %p7328_p0 = scmp.ne.s32.totalorder %s34_s22, %s7327_s23  ;;  %p7333_p2 = scmp.lt.s32.totalorder %s7327_s23, %s7327_s23 }
   0x9   :  { %p7334_p3 = por %p7333_p2, %p7332_p1 }
   0xb   :  { %p7335_p4 = pnand %p7334_p3, %p7328_p0 }
   0xd   :  { %7338 = shalt.err (!%p7335_p4)
}
   0xe   :  { %s7470_s24 = smov 512   ;;  %s7471_s25 = smov 32  }
   0xf   :  { %39 = dma.hbm_to_vmem [thread:$0]  %s7717_s1, 65536, %s34_s22, [#allocation6], %s7470_s24, %s7470_s24, %s7471_s25  }
  0x10   :  { %s7472_s28 = smov [#allocation8]   ;;  %s7473_s30 = smov [#allocation2]  }
  0x11   :  { %s58_s29 = sshll.u32 %s7472_s28, 4  ;;  %s21_s7 = sshll.u32 %s7473_s30, 4  ;;  %s59_s29 = int_to_ptr.vmem [resolvable:$true] %s58_s29  ;;  %s22_s7 = int_to_ptr.vmem [resolvable:$true] %s21_s7 }
  0x12   :  { %s7347_s8 = scalar_lea.vmem %s59_s29, 64  ;;  %p7352_p6 = scmp.lt.s32.totalorder %s59_s29, %s59_s29 }
  0x13   :  { %p7348_p5 = scmp.ne.s32.totalorder %s59_s29, %s7347_s8  ;;  %p7353_p7 = scmp.lt.s32.totalorder %s7347_s8, %s7347_s8 }
  0x15   :  { %p7354_p8 = por %p7353_p7, %p7352_p6 }
  0x17   :  { %p7355_p9 = pnand %p7354_p8, %p7348_p5 }
  0x19   :  { %7358 = shalt.err (!%p7355_p9)
}
  0x1a   :  { %61 = dma.hbm_to_vmem [thread:$0]  %s7719_s3, 64, %s59_s29, [#allocation9]  }
  0x1b   :  { %s7367_s11 = scalar_lea.vmem %s22_s7, 2048  ;;  %p7372_p11 = scmp.lt.s32.totalorder %s22_s7, %s22_s7 }
  0x1c   :  { %p7368_p10 = scmp.ne.s32.totalorder %s22_s7, %s7367_s11  ;;  %p7373_p12 = scmp.lt.s32.totalorder %s7367_s11, %s7367_s11 }
  0x1e   :  { %p7374_p13 = por %p7373_p12, %p7372_p11 }
  0x20   :  { %p7375_p0 = pnand %p7374_p13, %p7368_p10 }
  0x22   :  { %7378 = shalt.err (!%p7375_p0)
}
  0x23   :  { %s7474_s1 = smov 1024   ;;  %s7475_s12 = smov 64  }
  0x24   :  { %27 = dma.hbm_to_vmem [thread:$0]  %s7716_s0, 2048, %s22_s7, [#allocation3], %s7474_s1, %s7474_s1, %s7475_s12  }
  0x25   :  { %s7476_s15 = smov [#allocation7]  }
  0x26   :  { %s45_s16 = sshll.u32 %s7476_s15, 4  ;;  %s46_s16 = int_to_ptr.vmem [resolvable:$true] %s45_s16 }
  0x27   :  { %s7387_s17 = scalar_lea.vmem %s46_s16, 32768  ;;  %p7392_p2 = scmp.lt.s32.totalorder %s46_s16, %s46_s16 }
  0x28   :  { %p7388_p1 = scmp.ne.s32.totalorder %s46_s16, %s7387_s17  ;;  %p7393_p3 = scmp.lt.s32.totalorder %s7387_s17, %s7387_s17 }
  0x2a   :  { %p7394_p4 = por %p7393_p3, %p7392_p2 }
  0x2c   :  { %p7395_p5 = pnand %p7394_p4, %p7388_p1 }
  0x2e   :  { %7398 = shalt.err (!%p7395_p5)
}
  0x2f   :  { %s7477_s3 = smov 256   ;;  %s7478_s18 = smov 16  }
  0x30   :  { %51 = dma.hbm_to_vmem [thread:$0]  %s7718_s2, 32768, %s46_s16, [#allocation6], %s7477_s3, %s7477_s3, %s7478_s18  }
  0x31   :  { %s7479_s21 = smov [#allocation10]  }
  0x32   :  { %s67_s22 = sshll.u32 %s7479_s21, 4  ;;  %s68_s22 = int_to_ptr.vmem [resolvable:$true] %s67_s22 }
  0x33   :  { %s7407_s0 = scalar_lea.vmem %s68_s22, 8192  ;;  %p7412_p7 = scmp.lt.s32.totalorder %s68_s22, %s68_s22 }
  0x34   :  { %p7408_p6 = scmp.ne.s32.totalorder %s68_s22, %s7407_s0  ;;  %p7413_p8 = scmp.lt.s32.totalorder %s7407_s0, %s7407_s0 }
  0x36   :  { %p7414_p9 = por %p7413_p8, %p7412_p7 }
  0x38   :  { %p7415_p10 = pnand %p7414_p9, %p7408_p6 }
  0x3a   :  { %7418 = shalt.err (!%p7415_p10)
}
  0x3b   :  { %s7480_s23 = smov 128   ;;  %s7481_s24 = smov 8  }
  0x3c   :  { %73 = dma.hbm_to_vmem [thread:$0]  %s7720_s4, 8192, %s68_s22, [#allocation9], %s7480_s23, %s7480_s23, %s7481_s24  }
  0x3d   :  { %s7482_s2 = smov [#allocation11]  }
  0x3e   :  { %s80_s27 = sshll.u32 %s7482_s2, 4  ;;  %s81_s27 = int_to_ptr.vmem [resolvable:$true] %s80_s27 }
  0x3f   :  { %s7427_s28 = scalar_lea.vmem %s81_s27, 16  ;;  %s7431_s29 = scalar_lea.vmem %s81_s27, 32 }
  0x40   :  { %p7428_p11 = scmp.ne.s32.totalorder %s81_s27, %s7427_s28  ;;  %p7432_p12 = scmp.lt.s32.totalorder %s81_s27, %s81_s27 }
  0x41   :  { %p7433_p13 = scmp.lt.s32.totalorder %s7431_s29, %s7427_s28 }
  0x43   :  { %p7434_p0 = por %p7433_p13, %p7432_p12 }
  0x45   :  { %p7435_p1 = pnand %p7434_p0, %p7428_p11 }
  0x47   :  { %7438 = shalt.err (!%p7435_p1)
}
  0x48   :  { %83 = dma.hbm_to_vmem [thread:$0]  %s7721_s5, 16, %s81_s27, [#allocation12]  }
  0x49   :  { %7459 = dma.done.wait [#allocation3], 2048  }
  0x4a   :  { %7460 = vsyncadd [#allocation3], 4294965248 }
  0x4b   :  { %7461 = dma.done.wait [#allocation6], 98304  }
  0x4c   :  { %7462 = vsyncadd [#allocation6], 4294868992 }
  0x4d   :  { %7463 = dma.done.wait [#allocation9], 8256  }
  0x4e   :  { %7464 = vsyncadd [#allocation9], 4294959040 }
  0x4f   :  { %7465 = dma.done.wait [#allocation12], 16  }
  0x50   :  { %7466 = vsyncadd [#allocation12], 4294967280  ;;  %v182_v0 = vld [vmem:[#allocation5 + $0x1c0] sm:$0xff]  ;;  %v103_v54 = vld [vmem:[#allocation2 + $0x8] sm:$0xff]  ;;  %s7483_s4 = smov [#allocation13]  }
  0x51   :  { %v186_v1 = vld [vmem:[#allocation5 + $0x1e0] sm:$0xff]  ;;  %v111_v55 = vld [vmem:[#allocation2 + $0x48] sm:$0xff]  ;;  %v105_v59 = vld [vmem:[#allocation2 + $0x18] sm:$0xff]  ;;  %s6052_s5 = sshll.u32 %s7483_s4, 4  ;;  %s6053_s5 = int_to_ptr.vmem [resolvable:$true] %s6052_s5 }
  0x52   :  { %v310_v2 = vld [vmem:[#allocation5 + $0x5c0] sm:$0xff]  ;;  %v6124_v3 = vcombine.high %v182_v0, %v186_v1  ;;  %v6123_v5 = vcombine.low %v182_v0, %v186_v1  ;;  %v7540_v58 = vpack.c.bf16 %v111_v55, %v103_v54  ;;  %v113_v60 = vld [vmem:[#allocation2 + $0x58] sm:$0xff]  ;;  %s7439_s8 = scalar_lea.vmem %s6053_s5, 256  ;;  %p7444_p3 = scmp.lt.s32.totalorder %s6053_s5, %s6053_s5 }
  0x53   :  { %v314_v4 = vld [vmem:[#allocation5 + $0x5e0] sm:$0xff]  ;;  %v7542_v63 = vpack.c.bf16 %v113_v60, %v105_v59  ;;  %p7440_p2 = scmp.ne.s32.totalorder %s6053_s5, %s7439_s8  ;;  %p7445_p4 = scmp.lt.s32.totalorder %s7439_s8, %s7439_s8 }
  0x54   :  { %v174_v6 = vld [vmem:[#allocation5 + $0x180] sm:$0xff]  ;;  %v6252_v8 = vcombine.high %v310_v2, %v314_v4  ;;  %v6251_v9 = vcombine.low %v310_v2, %v314_v4  ;;  %3198 = vmatprep.subr.bf16.mxu0 %v6124_v3  ;;  %3230 = vmatprep.mubr.bf16.mxu0 %v7540_v58 }
  0x55   :  { %v178_v7 = vld [vmem:[#allocation5 + $0x1a0] sm:$0xff]  ;;  %3199 = vmatpush1.bf16.msra.mxu0 %v6123_v5  ;;  %3273 = vmatprep.mubr.bf16.mxu1 %v7542_v63  ;;  %p7446_p5 = por %p7445_p4, %p7444_p3 }
  0x56   :  { %v6116_v10 = vcombine.high %v174_v6, %v178_v7  ;;  %v302_v11 = vld [vmem:[#allocation5 + $0x580] sm:$0xff]  ;;  %3241 = vmatprep.subr.bf16.mxu1 %v6252_v8  ;;  %v6115_v18 = vcombine.low %v174_v6, %v178_v7 }
  0x57   :  { %v306_v12 = vld [vmem:[#allocation5 + $0x5a0] sm:$0xff]  ;;  %3242 = vmatpush1.bf16.msra.mxu1 %v6251_v9  ;;  %p7447_p6 = pnand %p7446_p5, %p7440_p2 }
  0x58   :  { %v166_v13 = vld [vmem:[#allocation5 + $0x140] sm:$0xff]  ;;  %v6244_v14 = vcombine.high %v302_v11, %v306_v12  ;;  %3200 = vmatprep.subr.bf16.mxu0 %v6116_v10  ;;  %v6243_v19 = vcombine.low %v302_v11, %v306_v12 }
  0x59   :  { %v170_v15 = vld [vmem:[#allocation5 + $0x160] sm:$0xff]  ;;  %3201 = vmatpush1.bf16.msra.mxu0 %v6115_v18 }
  0x5a   :  { %v294_v16 = vld [vmem:[#allocation5 + $0x540] sm:$0xff]  ;;  %v6108_v20 = vcombine.high %v166_v13, %v170_v15  ;;  %3243 = vmatprep.subr.bf16.mxu1 %v6244_v14  ;;  %v6107_v26 = vcombine.low %v166_v13, %v170_v15 }
  0x5b   :  { %v298_v17 = vld [vmem:[#allocation5 + $0x560] sm:$0xff]  ;;  %3244 = vmatpush1.bf16.msra.mxu1 %v6243_v19 }
  0x5c   :  { %v6236_v21 = vcombine.high %v294_v16, %v298_v17  ;;  %v158_v22 = vld [vmem:[#allocation5 + $0x100] sm:$0xff]  ;;  %3202 = vmatprep.subr.bf16.mxu0 %v6108_v20  ;;  %v6235_v27 = vcombine.low %v294_v16, %v298_v17 }
  0x5d   :  { %v162_v23 = vld [vmem:[#allocation5 + $0x120] sm:$0xff]  ;;  %3203 = vmatpush1.bf16.msra.mxu0 %v6107_v26 }
  0x5e   :  { %v286_v24 = vld [vmem:[#allocation5 + $0x500] sm:$0xff]  ;;  %v6100_v28 = vcombine.high %v158_v22, %v162_v23  ;;  %3245 = vmatprep.subr.bf16.mxu1 %v6236_v21  ;;  %v6099_v34 = vcombine.low %v158_v22, %v162_v23 }
  0x5f   :  { %v290_v25 = vld [vmem:[#allocation5 + $0x520] sm:$0xff]  ;;  %3246 = vmatpush1.bf16.msra.mxu1 %v6235_v27 }
  0x60   :  { %v6228_v29 = vcombine.high %v286_v24, %v290_v25  ;;  %v150_v30 = vld [vmem:[#allocation5 + $0xc0] sm:$0xff]  ;;  %3204 = vmatprep.subr.bf16.mxu0 %v6100_v28  ;;  %v6227_v35 = vcombine.low %v286_v24, %v290_v25 }
  0x61   :  { %v154_v31 = vld [vmem:[#allocation5 + $0xe0] sm:$0xff]  ;;  %3205 = vmatpush1.bf16.msra.mxu0 %v6099_v34 }
  0x62   :  { %v278_v32 = vld [vmem:[#allocation5 + $0x4c0] sm:$0xff]  ;;  %v6092_v36 = vcombine.high %v150_v30, %v154_v31  ;;  %3247 = vmatprep.subr.bf16.mxu1 %v6228_v29  ;;  %v6091_v42 = vcombine.low %v150_v30, %v154_v31 }
  0x63   :  { %v282_v33 = vld [vmem:[#allocation5 + $0x4e0] sm:$0xff]  ;;  %3248 = vmatpush1.bf16.msra.mxu1 %v6227_v35 }
  0x64   :  { %v6220_v37 = vcombine.high %v278_v32, %v282_v33  ;;  %v142_v38 = vld [vmem:[#allocation5 + $0x80] sm:$0xff]  ;;  %3206 = vmatprep.subr.bf16.mxu0 %v6092_v36  ;;  %v6219_v43 = vcombine.low %v278_v32, %v282_v33 }
  0x65   :  { %v146_v39 = vld [vmem:[#allocation5 + $0xa0] sm:$0xff]  ;;  %3207 = vmatpush1.bf16.msra.mxu0 %v6091_v42 }
  0x66   :  { %v270_v40 = vld [vmem:[#allocation5 + $0x480] sm:$0xff]  ;;  %v6084_v44 = vcombine.high %v142_v38, %v146_v39  ;;  %3249 = vmatprep.subr.bf16.mxu1 %v6220_v37  ;;  %v6083_v50 = vcombine.low %v142_v38, %v146_v39 }
  0x67   :  { %v274_v41 = vld [vmem:[#allocation5 + $0x4a0] sm:$0xff]  ;;  %3250 = vmatpush1.bf16.msra.mxu1 %v6219_v43 }
  0x68   :  { %v6212_v45 = vcombine.high %v270_v40, %v274_v41  ;;  %v134_v46 = vld [vmem:[#allocation5 + $0x40] sm:$0xff]  ;;  %3208 = vmatprep.subr.bf16.mxu0 %v6084_v44  ;;  %v6211_v51 = vcombine.low %v270_v40, %v274_v41 }
  0x69   :  { %v138_v47 = vld [vmem:[#allocation5 + $0x60] sm:$0xff]  ;;  %3209 = vmatpush1.bf16.msra.mxu0 %v6083_v50 }
  0x6a   :  { %v262_v48 = vld [vmem:[#allocation5 + $0x440] sm:$0xff]  ;;  %v6076_v52 = vcombine.high %v134_v46, %v138_v47  ;;  %3251 = vmatprep.subr.bf16.mxu1 %v6212_v45  ;;  %v6075_v0 = vcombine.low %v134_v46, %v138_v47 }
  0x6b   :  { %v266_v49 = vld [vmem:[#allocation5 + $0x460] sm:$0xff]  ;;  %3252 = vmatpush1.bf16.msra.mxu1 %v6211_v51 }
  0x6c   :  { %v126_v53 = vld [vmem:[#allocation5] sm:$0xff]  ;;  %v6204_v56 = vcombine.high %v262_v48, %v266_v49  ;;  %3210 = vmatprep.subr.bf16.mxu0 %v6076_v52  ;;  %v6203_v1 = vcombine.low %v262_v48, %v266_v49 }
  0x6d   :  { %v130_v57 = vld [vmem:[#allocation5 + $0x20] sm:$0xff]  ;;  %3211 = vmatpush1.bf16.msra.mxu0 %v6075_v0 }
  0x6e   :  { %v254_v61 = vld [vmem:[#allocation5 + $0x400] sm:$0xff]  ;;  %v6068_v2 = vcombine.high %v126_v53, %v130_v57  ;;  %3253 = vmatprep.subr.bf16.mxu1 %v6204_v56  ;;  %v6067_v8 = vcombine.low %v126_v53, %v130_v57 }
  0x6f   :  { %v258_v62 = vld [vmem:[#allocation5 + $0x420] sm:$0xff]  ;;  %3254 = vmatpush1.bf16.msra.mxu1 %v6203_v1 }
  0x70   :  { %v6196_v3 = vcombine.high %v254_v61, %v258_v62  ;;  %v246_v4 = vld [vmem:[#allocation5 + $0x3c0] sm:$0xff]  ;;  %3212 = vmatprep.subr.bf16.mxu0 %v6068_v2  ;;  %v6195_v9 = vcombine.low %v254_v61, %v258_v62 }
  0x71   :  { %v250_v5 = vld [vmem:[#allocation5 + $0x3e0] sm:$0xff]  ;;  %3213 = vmatpush1.bf16.msra.mxu0 %v6067_v8 }
  0x72   :  { %v374_v6 = vld [vmem:[#allocation5 + $0x7c0] sm:$0xff]  ;;  %v6188_v10 = vcombine.high %v246_v4, %v250_v5  ;;  %3255 = vmatprep.subr.bf16.mxu1 %v6196_v3  ;;  %v6187_v16 = vcombine.low %v246_v4, %v250_v5 }
  0x73   :  { %v378_v7 = vld [vmem:[#allocation5 + $0x7e0] sm:$0xff]  ;;  %3256 = vmatpush1.bf16.msra.mxu1 %v6195_v9 }
  0x74   :  { %v6316_v11 = vcombine.high %v374_v6, %v378_v7  ;;  %v238_v12 = vld [vmem:[#allocation5 + $0x380] sm:$0xff]  ;;  %3214 = vmatprep.subr.bf16.mxu0 %v6188_v10  ;;  %v6315_v17 = vcombine.low %v374_v6, %v378_v7 }
  0x75   :  { %v242_v13 = vld [vmem:[#allocation5 + $0x3a0] sm:$0xff]  ;;  %3215 = vmatpush2.bf16.msra.mxu0 %v6187_v16 }
  0x76   :  { %v366_v14 = vld [vmem:[#allocation5 + $0x780] sm:$0xff]  ;;  %v6180_v18 = vcombine.high %v238_v12, %v242_v13  ;;  %3257 = vmatprep.subr.bf16.mxu1 %v6316_v11  ;;  %v6179_v24 = vcombine.low %v238_v12, %v242_v13 }
  0x77   :  { %v370_v15 = vld [vmem:[#allocation5 + $0x7a0] sm:$0xff]  ;;  %3258 = vmatpush2.bf16.msra.mxu1 %v6315_v17 }
  0x78   :  { %v6308_v19 = vcombine.high %v366_v14, %v370_v15  ;;  %v230_v20 = vld [vmem:[#allocation5 + $0x340] sm:$0xff]  ;;  %3216 = vmatprep.subr.bf16.mxu0 %v6180_v18  ;;  %v6307_v25 = vcombine.low %v366_v14, %v370_v15  ;;  %v104_v14 = vld [vmem:[#allocation2 + $0x10] sm:$0xff] }
  0x79   :  { %v234_v21 = vld [vmem:[#allocation5 + $0x360] sm:$0xff]  ;;  %3217 = vmatpush2.bf16.msra.mxu0 %v6179_v24  ;;  %v112_v15 = vld [vmem:[#allocation2 + $0x50] sm:$0xff]  ;;  %v115_v24 = vld [vmem:[#allocation2 + $0x68] sm:$0xff] }
  0x7a   :  { %v358_v22 = vld [vmem:[#allocation5 + $0x740] sm:$0xff]  ;;  %v6172_v26 = vcombine.high %v230_v20, %v234_v21  ;;  %3259 = vmatprep.subr.bf16.mxu1 %v6308_v19  ;;  %v6171_v32 = vcombine.low %v230_v20, %v234_v21 }
  0x7b   :  { %v362_v23 = vld [vmem:[#allocation5 + $0x760] sm:$0xff]  ;;  %3260 = vmatpush2.bf16.msra.mxu1 %v6307_v25  ;;  %v7548_v25 = vpack.c.bf16 %v112_v15, %v104_v14 }
  0x7c   :  { %v6300_v27 = vcombine.high %v358_v22, %v362_v23  ;;  %v222_v28 = vld [vmem:[#allocation5 + $0x300] sm:$0xff]  ;;  %3218 = vmatprep.subr.bf16.mxu0 %v6172_v26  ;;  %v6299_v33 = vcombine.low %v358_v22, %v362_v23  ;;  %v107_v23 = vld [vmem:[#allocation2 + $0x28] sm:$0xff] }
  0x7d   :  { %v226_v29 = vld [vmem:[#allocation5 + $0x320] sm:$0xff]  ;;  %3219 = vmatpush2.bf16.msra.mxu0 %v6171_v32 }
  0x7e   :  { %v350_v30 = vld [vmem:[#allocation5 + $0x700] sm:$0xff]  ;;  %v6164_v34 = vcombine.high %v222_v28, %v226_v29  ;;  %3261 = vmatprep.subr.bf16.mxu1 %v6300_v27  ;;  %v6163_v40 = vcombine.low %v222_v28, %v226_v29  ;;  %v109_v27 = vld [vmem:[#allocation2 + $0x38] sm:$0xff] }
  0x7f   :  { %v354_v31 = vld [vmem:[#allocation5 + $0x720] sm:$0xff]  ;;  %3262 = vmatpush2.bf16.msra.mxu1 %v6299_v33  ;;  %v117_v28 = vld [vmem:[#allocation2 + $0x78] sm:$0xff] }
  0x80   :  { %v6292_v35 = vcombine.high %v350_v30, %v354_v31  ;;  %v214_v36 = vld [vmem:[#allocation5 + $0x2c0] sm:$0xff]  ;;  %3220 = vmatprep.subr.bf16.mxu0 %v6164_v34  ;;  %v6291_v41 = vcombine.low %v350_v30, %v354_v31  ;;  %v7550_v34 = vpack.c.bf16 %v115_v24, %v107_v23 }
  0x81   :  { %v218_v37 = vld [vmem:[#allocation5 + $0x2e0] sm:$0xff]  ;;  %3221 = vmatpush2.bf16.msra.mxu0 %v6163_v40 }
  0x82   :  { %v342_v38 = vld [vmem:[#allocation5 + $0x6c0] sm:$0xff]  ;;  %v6156_v42 = vcombine.high %v214_v36, %v218_v37  ;;  %3263 = vmatprep.subr.bf16.mxu1 %v6292_v35  ;;  %v6155_v48 = vcombine.low %v214_v36, %v218_v37  ;;  %v7553_v37 = vpack.c.bf16 %v117_v28, %v109_v27 }
  0x83   :  { %v346_v39 = vld [vmem:[#allocation5 + $0x6e0] sm:$0xff]  ;;  %3264 = vmatpush2.bf16.msra.mxu1 %v6291_v41 }
  0x84   :  { %v6284_v43 = vcombine.high %v342_v38, %v346_v39  ;;  %v206_v44 = vld [vmem:[#allocation5 + $0x280] sm:$0xff]  ;;  %3222 = vmatprep.subr.bf16.mxu0 %v6156_v42  ;;  %v6283_v49 = vcombine.low %v342_v38, %v346_v39 }
  0x85   :  { %v210_v45 = vld [vmem:[#allocation5 + $0x2a0] sm:$0xff]  ;;  %3223 = vmatpush2.bf16.msra.mxu0 %v6155_v48 }
  0x86   :  { %v334_v46 = vld [vmem:[#allocation5 + $0x680] sm:$0xff]  ;;  %v6148_v50 = vcombine.high %v206_v44, %v210_v45  ;;  %3265 = vmatprep.subr.bf16.mxu1 %v6284_v43  ;;  %v6147_v56 = vcombine.low %v206_v44, %v210_v45 }
  0x87   :  { %v338_v47 = vld [vmem:[#allocation5 + $0x6a0] sm:$0xff]  ;;  %3266 = vmatpush2.bf16.msra.mxu1 %v6283_v49 }
  0x88   :  { %v6276_v51 = vcombine.high %v334_v46, %v338_v47  ;;  %v198_v52 = vld [vmem:[#allocation5 + $0x240] sm:$0xff]  ;;  %3224 = vmatprep.subr.bf16.mxu0 %v6148_v50  ;;  %v6275_v57 = vcombine.low %v334_v46, %v338_v47 }
  0x89   :  { %v202_v53 = vld [vmem:[#allocation5 + $0x260] sm:$0xff]  ;;  %3225 = vmatpush2.bf16.msra.mxu0 %v6147_v56 }
  0x8a   :  { %v326_v54 = vld [vmem:[#allocation5 + $0x640] sm:$0xff]  ;;  %v6140_v59 = vcombine.high %v198_v52, %v202_v53  ;;  %3267 = vmatprep.subr.bf16.mxu1 %v6276_v51  ;;  %v6139_v2 = vcombine.low %v198_v52, %v202_v53 }
  0x8b   :  { %v330_v55 = vld [vmem:[#allocation5 + $0x660] sm:$0xff]  ;;  %3268 = vmatpush2.bf16.msra.mxu1 %v6275_v57 }
  0x8c   :  { %v6268_v60 = vcombine.high %v326_v54, %v330_v55  ;;  %v190_v61 = vld [vmem:[#allocation5 + $0x200] sm:$0xff]  ;;  %3226 = vmatprep.subr.bf16.mxu0 %v6140_v59  ;;  %v6267_v3 = vcombine.low %v326_v54, %v330_v55 }
  0x8d   :  { %v194_v62 = vld [vmem:[#allocation5 + $0x220] sm:$0xff]  ;;  %3227 = vmatpush2.bf16.msra.mxu0 %v6139_v2 }
  0x8e   :  { %v318_v0 = vld [vmem:[#allocation5 + $0x600] sm:$0xff]  ;;  %v6132_v4 = vcombine.high %v190_v61, %v194_v62  ;;  %3269 = vmatprep.subr.bf16.mxu1 %v6268_v60  ;;  %v6131_v10 = vcombine.low %v190_v61, %v194_v62 }
  0x8f   :  { %v322_v1 = vld [vmem:[#allocation5 + $0x620] sm:$0xff]  ;;  %3270 = vmatpush2.bf16.msra.mxu1 %v6267_v3 }
  0x90   :  { %v6260_v5 = vcombine.high %v318_v0, %v322_v1  ;;  %v438_v6 = vld [vmem:[#allocation5 + $0x9c0] sm:$0xff]  ;;  %3228 = vmatprep.subr.bf16.mxu0 %v6132_v4  ;;  %v6259_v13 = vcombine.low %v318_v0, %v322_v1 }
  0x91   :  { %v442_v7 = vld [vmem:[#allocation5 + $0x9e0] sm:$0xff]  ;;  %3229 = vmatpush2.bf16.msra.mxu0 %v6131_v10 }
  0x92   :  { %v566_v8 = vld [vmem:[#allocation5 + $0xdc0] sm:$0xff]  ;;  %v6380_v16 = vcombine.high %v438_v6, %v442_v7  ;;  %3271 = vmatprep.subr.bf16.mxu1 %v6260_v5  ;;  %v6379_v26 = vcombine.low %v438_v6, %v442_v7 }
  0x93   :  { %v570_v9 = vld [vmem:[#allocation5 + $0xde0] sm:$0xff]  ;;  %3272 = vmatpush2.bf16.msra.mxu1 %v6259_v13 }
  0x94   :  { %v102_v11 = vld [vmem:[#allocation2] sm:$0xff]  ;;  %v6508_v17 = vcombine.high %v566_v8, %v570_v9  ;;  %3284 = vmatprep.subr.bf16.mxu0 %v6380_v16  ;;  %v6507_v29 = vcombine.low %v566_v8, %v570_v9 }
  0x95   :  { %v110_v12 = vld [vmem:[#allocation2 + $0x40] sm:$0xff] }
  0x96   :  { %v430_v18 = vld [vmem:[#allocation5 + $0x980] sm:$0xff]  ;;  %v7546_v21 = vpack.c.bf16 %v110_v12, %v102_v11  ;;  %3327 = vmatprep.subr.bf16.mxu1 %v6508_v17  ;;  %3274 = vmatmul.mubr.bf16.vlgmr.msra.gmra.mxu1 %v7548_v25 }
  0x97   :  { %v434_v19 = vld [vmem:[#allocation5 + $0x9a0] sm:$0xff]  ;;  %3328 = vmatpush1.bf16.msra.mxu1 %v6507_v29  ;;  %3359 = vmatprep.mubr.bf16.mxu1 %v7553_v37 }
  0x98   :  { %v558_v20 = vld [vmem:[#allocation5 + $0xd80] sm:$0xff]  ;;  %v6372_v30 = vcombine.high %v430_v18, %v434_v19  ;;  %3231 = vmatmul.mubr.bf16.vlgmr.msra.gmra.mxu0 %v7546_v21  ;;  %v6371_v38 = vcombine.low %v430_v18, %v434_v19 }
  0x99   :  { %v562_v22 = vld [vmem:[#allocation5 + $0xda0] sm:$0xff]  ;;  %3285 = vmatpush1.bf16.msra.mxu0 %v6379_v26  ;;  %3316 = vmatprep.mubr.bf16.mxu0 %v7550_v34 }
  0x9a   :  { %v6500_v31 = vcombine.high %v558_v20, %v562_v22  ;;  %v422_v32 = vld [vmem:[#allocation5 + $0x940] sm:$0xff]  ;;  %3286 = vmatprep.subr.bf16.mxu0 %v6372_v30  ;;  %v6499_v39 = vcombine.low %v558_v20, %v562_v22 }
  0x9b   :  { %v426_v33 = vld [vmem:[#allocation5 + $0x960] sm:$0xff] }
  0x9c   :  { %v550_v35 = vld [vmem:[#allocation5 + $0xd40] sm:$0xff]  ;;  %v6364_v40 = vcombine.high %v422_v32, %v426_v33  ;;  %3329 = vmatprep.subr.bf16.mxu1 %v6500_v31  ;;  %v6363_v46 = vcombine.low %v422_v32, %v426_v33 }
  0x9d   :  { %v554_v36 = vld [vmem:[#allocation5 + $0xd60] sm:$0xff]  ;;  %3287 = vmatpush1.bf16.msra.mxu0 %v6371_v38  ;;  %3330 = vmatpush1.bf16.msra.mxu1 %v6499_v39 }
  0x9e   :  { %v6492_v41 = vcombine.high %v550_v35, %v554_v36  ;;  %v414_v42 = vld [vmem:[#allocation5 + $0x900] sm:$0xff]  ;;  %3288 = vmatprep.subr.bf16.mxu0 %v6364_v40  ;;  %v6491_v47 = vcombine.low %v550_v35, %v554_v36 }
  0x9f   :  { %v418_v43 = vld [vmem:[#allocation5 + $0x920] sm:$0xff] }
  0xa0   :  { %v542_v44 = vld [vmem:[#allocation5 + $0xd00] sm:$0xff]  ;;  %v6356_v48 = vcombine.high %v414_v42, %v418_v43  ;;  %3331 = vmatprep.subr.bf16.mxu1 %v6492_v41  ;;  %v6355_v54 = vcombine.low %v414_v42, %v418_v43 }
  0xa1   :  { %v546_v45 = vld [vmem:[#allocation5 + $0xd20] sm:$0xff]  ;;  %3289 = vmatpush1.bf16.msra.mxu0 %v6363_v46  ;;  %3332 = vmatpush1.bf16.msra.mxu1 %v6491_v47 }
  0xa2   :  { %v406_v49 = vld [vmem:[#allocation5 + $0x8c0] sm:$0xff]  ;;  %v6484_v52 = vcombine.high %v542_v44, %v546_v45  ;;  %3290 = vmatprep.subr.bf16.mxu0 %v6356_v48  ;;  %v6483_v55 = vcombine.low %v542_v44, %v546_v45 }
  0xa3   :  { %v410_v50 = vld [vmem:[#allocation5 + $0x8e0] sm:$0xff] }
  0xa4   :  { %v534_v51 = vld [vmem:[#allocation5 + $0xcc0] sm:$0xff]  ;;  %v6348_v56 = vcombine.high %v406_v49, %v410_v50  ;;  %3333 = vmatprep.subr.bf16.mxu1 %v6484_v52  ;;  %v6347_v0 = vcombine.low %v406_v49, %v410_v50 }
  0xa5   :  { %v538_v53 = vld [vmem:[#allocation5 + $0xce0] sm:$0xff]  ;;  %3291 = vmatpush1.bf16.msra.mxu0 %v6355_v54  ;;  %3334 = vmatpush1.bf16.msra.mxu1 %v6483_v55 }
  0xa6   :  { %v398_v57 = vld [vmem:[#allocation5 + $0x880] sm:$0xff]  ;;  %v6476_v61 = vcombine.high %v534_v51, %v538_v53  ;;  %3292 = vmatprep.subr.bf16.mxu0 %v6348_v56  ;;  %v6475_v1 = vcombine.low %v534_v51, %v538_v53 }
  0xa7   :  { %v402_v59 = vld [vmem:[#allocation5 + $0x8a0] sm:$0xff] }
  0xa8   :  { %v526_v60 = vld [vmem:[#allocation5 + $0xc80] sm:$0xff]  ;;  %v6340_v2 = vcombine.high %v398_v57, %v402_v59  ;;  %3335 = vmatprep.subr.bf16.mxu1 %v6476_v61  ;;  %v6339_v8 = vcombine.low %v398_v57, %v402_v59 }
  0xa9   :  { %v530_v62 = vld [vmem:[#allocation5 + $0xca0] sm:$0xff]  ;;  %3293 = vmatpush1.bf16.msra.mxu0 %v6347_v0  ;;  %3336 = vmatpush1.bf16.msra.mxu1 %v6475_v1 }
  0xaa   :  { %v390_v3 = vld [vmem:[#allocation5 + $0x840] sm:$0xff]  ;;  %v6468_v6 = vcombine.high %v526_v60, %v530_v62  ;;  %3294 = vmatprep.subr.bf16.mxu0 %v6340_v2  ;;  %v6467_v9 = vcombine.low %v526_v60, %v530_v62 }
  0xab   :  { %v394_v4 = vld [vmem:[#allocation5 + $0x860] sm:$0xff] }
  0xac   :  { %v518_v5 = vld [vmem:[#allocation5 + $0xc40] sm:$0xff]  ;;  %v6332_v10 = vcombine.high %v390_v3, %v394_v4  ;;  %3337 = vmatprep.subr.bf16.mxu1 %v6468_v6  ;;  %v6331_v16 = vcombine.low %v390_v3, %v394_v4 }
  0xad   :  { %v522_v7 = vld [vmem:[#allocation5 + $0xc60] sm:$0xff]  ;;  %3295 = vmatpush1.bf16.msra.mxu0 %v6339_v8  ;;  %3338 = vmatpush1.bf16.msra.mxu1 %v6467_v9 }
  0xae   :  { %v382_v11 = vld [vmem:[#allocation5 + $0x800] sm:$0xff]  ;;  %v6460_v14 = vcombine.high %v518_v5, %v522_v7  ;;  %3296 = vmatprep.subr.bf16.mxu0 %v6332_v10  ;;  %v6459_v17 = vcombine.low %v518_v5, %v522_v7 }
  0xaf   :  { %v386_v12 = vld [vmem:[#allocation5 + $0x820] sm:$0xff] }
  0xb0   :  { %v510_v13 = vld [vmem:[#allocation5 + $0xc00] sm:$0xff]  ;;  %v6324_v18 = vcombine.high %v382_v11, %v386_v12  ;;  %3339 = vmatprep.subr.bf16.mxu1 %v6460_v14  ;;  %v6323_v26 = vcombine.low %v382_v11, %v386_v12 }
  0xb1   :  { %v514_v15 = vld [vmem:[#allocation5 + $0xc20] sm:$0xff]  ;;  %3297 = vmatpush1.bf16.msra.mxu0 %v6331_v16  ;;  %3340 = vmatpush1.bf16.msra.mxu1 %v6459_v17 }
  0xb2   :  { %v502_v19 = vld [vmem:[#allocation5 + $0xbc0] sm:$0xff]  ;;  %v6452_v23 = vcombine.high %v510_v13, %v514_v15  ;;  %3298 = vmatprep.subr.bf16.mxu0 %v6324_v18  ;;  %v6451_v27 = vcombine.low %v510_v13, %v514_v15 }
  0xb3   :  { %v506_v20 = vld [vmem:[#allocation5 + $0xbe0] sm:$0xff] }
  0xb4   :  { %v630_v22 = vld [vmem:[#allocation5 + $0xfc0] sm:$0xff]  ;;  %v6444_v28 = vcombine.high %v502_v19, %v506_v20  ;;  %3341 = vmatprep.subr.bf16.mxu1 %v6452_v23  ;;  %v6443_v35 = vcombine.low %v502_v19, %v506_v20 }
  0xb5   :  { %v634_v24 = vld [vmem:[#allocation5 + $0xfe0] sm:$0xff]  ;;  %3299 = vmatpush1.bf16.msra.mxu0 %v6323_v26  ;;  %3342 = vmatpush1.bf16.msra.mxu1 %v6451_v27  ;;  %v183_v27 = vld [vmem:[#allocation5 + $0x1c8] sm:$0xff] }
  0xb6   :  { %v494_v29 = vld [vmem:[#allocation5 + $0xb80] sm:$0xff]  ;;  %v6572_v32 = vcombine.high %v630_v22, %v634_v24  ;;  %3300 = vmatprep.subr.bf16.mxu0 %v6444_v28  ;;  %v6571_v36 = vcombine.low %v630_v22, %v634_v24  ;;  %v187_v28 = vld [vmem:[#allocation5 + $0x1e8] sm:$0xff] }
  0xb7   :  { %v498_v30 = vld [vmem:[#allocation5 + $0xba0] sm:$0xff] }
  0xb8   :  { %v622_v31 = vld [vmem:[#allocation5 + $0xf80] sm:$0xff]  ;;  %v6436_v38 = vcombine.high %v494_v29, %v498_v30  ;;  %3343 = vmatprep.subr.bf16.mxu1 %v6572_v32  ;;  %v6435_v44 = vcombine.low %v494_v29, %v498_v30  ;;  %v311_v29 = vld [vmem:[#allocation5 + $0x5c8] sm:$0xff] }
  0xb9   :  { %v626_v33 = vld [vmem:[#allocation5 + $0xfa0] sm:$0xff]  ;;  %3301 = vmatpush2.bf16.msra.mxu0 %v6443_v35  ;;  %3344 = vmatpush2.bf16.msra.mxu1 %v6571_v36  ;;  %v108_v35 = vld [vmem:[#allocation2 + $0x30] sm:$0xff] }
  0xba   :  { %v486_v39 = vld [vmem:[#allocation5 + $0xb40] sm:$0xff]  ;;  %v6564_v42 = vcombine.high %v622_v31, %v626_v33  ;;  %3302 = vmatprep.subr.bf16.mxu0 %v6436_v38  ;;  %v6563_v45 = vcombine.low %v622_v31, %v626_v33  ;;  %v315_v33 = vld [vmem:[#allocation5 + $0x5e8] sm:$0xff]  ;;  %v116_v36 = vld [vmem:[#allocation2 + $0x70] sm:$0xff] }
  0xbb   :  { %v490_v40 = vld [vmem:[#allocation5 + $0xb60] sm:$0xff] }
  0xbc   :  { %v614_v41 = vld [vmem:[#allocation5 + $0xf40] sm:$0xff]  ;;  %v6428_v46 = vcombine.high %v486_v39, %v490_v40  ;;  %3345 = vmatprep.subr.bf16.mxu1 %v6564_v42  ;;  %v6427_v52 = vcombine.low %v486_v39, %v490_v40  ;;  %v6126_v40 = vcombine.high %v183_v27, %v187_v28  ;;  %v179_v42 = vld [vmem:[#allocation5 + $0x1a8] sm:$0xff] }
  0xbd   :  { %v618_v43 = vld [vmem:[#allocation5 + $0xf60] sm:$0xff]  ;;  %3303 = vmatpush2.bf16.msra.mxu0 %v6435_v44  ;;  %3346 = vmatpush2.bf16.msra.mxu1 %v6563_v45  ;;  %v6254_v44 = vcombine.high %v311_v29, %v315_v33  ;;  %v307_v45 = vld [vmem:[#allocation5 + $0x5a8] sm:$0xff] }
  0xbe   :  { %v478_v47 = vld [vmem:[#allocation5 + $0xb00] sm:$0xff]  ;;  %v6556_v50 = vcombine.high %v614_v41, %v618_v43  ;;  %3304 = vmatprep.subr.bf16.mxu0 %v6428_v46  ;;  %v6555_v53 = vcombine.low %v614_v41, %v618_v43  ;;  %v175_v41 = vld [vmem:[#allocation5 + $0x188] sm:$0xff] }
  0xbf   :  { %v482_v48 = vld [vmem:[#allocation5 + $0xb20] sm:$0xff]  ;;  %v303_v43 = vld [vmem:[#allocation5 + $0x588] sm:$0xff] }
  0xc0   :  { %v606_v49 = vld [vmem:[#allocation5 + $0xf00] sm:$0xff]  ;;  %v6420_v54 = vcombine.high %v478_v47, %v482_v48  ;;  %3347 = vmatprep.subr.bf16.mxu1 %v6556_v50  ;;  %v6419_v61 = vcombine.low %v478_v47, %v482_v48  ;;  %v7560_v47 = vpack.c.bf16 %v116_v36, %v108_v35  ;;  %v6125_v48 = vcombine.low %v183_v27, %v187_v28  ;;  %v267_v27 = vld [vmem:[#allocation5 + $0x468] sm:$0xff] }
  0xc1   :  { %v610_v51 = vld [vmem:[#allocation5 + $0xf20] sm:$0xff]  ;;  %3305 = vmatpush2.bf16.msra.mxu0 %v6427_v52  ;;  %3348 = vmatpush2.bf16.msra.mxu1 %v6555_v53  ;;  %v6118_v50 = vcombine.high %v175_v41, %v179_v42  ;;  %v171_v52 = vld [vmem:[#allocation5 + $0x168] sm:$0xff] }
  0xc2   :  { %v470_v55 = vld [vmem:[#allocation5 + $0xac0] sm:$0xff]  ;;  %v6548_v59 = vcombine.high %v606_v49, %v610_v51  ;;  %3306 = vmatprep.subr.bf16.mxu0 %v6420_v54  ;;  %v6547_v62 = vcombine.low %v606_v49, %v610_v51  ;;  %v6253_v49 = vcombine.low %v311_v29, %v315_v33  ;;  %v167_v51 = vld [vmem:[#allocation5 + $0x148] sm:$0xff]  ;;  %v6246_v54 = vcombine.high %v303_v43, %v307_v45 }
  0xc3   :  { %v474_v56 = vld [vmem:[#allocation5 + $0xae0] sm:$0xff]  ;;  %v295_v53 = vld [vmem:[#allocation5 + $0x548] sm:$0xff] }
  0xc4   :  { %v598_v57 = vld [vmem:[#allocation5 + $0xec0] sm:$0xff]  ;;  %v6412_v0 = vcombine.high %v470_v55, %v474_v56  ;;  %3349 = vmatprep.subr.bf16.mxu1 %v6548_v59  ;;  %v6411_v6 = vcombine.low %v470_v55, %v474_v56  ;;  %v299_v55 = vld [vmem:[#allocation5 + $0x568] sm:$0xff]  ;;  %v6117_v56 = vcombine.low %v175_v41, %v179_v42  ;;  %v6110_v59 = vcombine.high %v167_v51, %v171_v52 }
  0xc5   :  { %v602_v60 = vld [vmem:[#allocation5 + $0xee0] sm:$0xff]  ;;  %3307 = vmatpush2.bf16.msra.mxu0 %v6419_v61  ;;  %3350 = vmatpush2.bf16.msra.mxu1 %v6547_v62  ;;  %v163_v61 = vld [vmem:[#allocation5 + $0x128] sm:$0xff] }
  0xc6   :  { %v462_v1 = vld [vmem:[#allocation5 + $0xa80] sm:$0xff]  ;;  %v6540_v4 = vcombine.high %v598_v57, %v602_v60  ;;  %3308 = vmatprep.subr.bf16.mxu0 %v6412_v0  ;;  %v6539_v7 = vcombine.low %v598_v57, %v602_v60  ;;  %v6245_v57 = vcombine.low %v303_v43, %v307_v45  ;;  %v159_v60 = vld [vmem:[#allocation5 + $0x108] sm:$0xff]  ;;  %v6238_v0 = vcombine.high %v295_v53, %v299_v55 }
  0xc7   :  { %v466_v2 = vld [vmem:[#allocation5 + $0xaa0] sm:$0xff]  ;;  %v287_v62 = vld [vmem:[#allocation5 + $0x508] sm:$0xff] }
  0xc8   :  { %v590_v3 = vld [vmem:[#allocation5 + $0xe80] sm:$0xff]  ;;  %v6404_v8 = vcombine.high %v462_v1, %v466_v2  ;;  %3351 = vmatprep.subr.bf16.mxu1 %v6540_v4  ;;  %v6403_v14 = vcombine.low %v462_v1, %v466_v2  ;;  %v291_v1 = vld [vmem:[#allocation5 + $0x528] sm:$0xff]  ;;  %v6109_v2 = vcombine.low %v167_v51, %v171_v52  ;;  %v6102_v4 = vcombine.high %v159_v60, %v163_v61 }
  0xc9   :  { %v594_v5 = vld [vmem:[#allocation5 + $0xea0] sm:$0xff]  ;;  %3309 = vmatpush2.bf16.msra.mxu0 %v6411_v6  ;;  %3352 = vmatpush2.bf16.msra.mxu1 %v6539_v7  ;;  %v155_v6 = vld [vmem:[#allocation5 + $0xe8] sm:$0xff] }
  0xca   :  { %v454_v9 = vld [vmem:[#allocation5 + $0xa40] sm:$0xff]  ;;  %v6532_v12 = vcombine.high %v590_v3, %v594_v5  ;;  %3310 = vmatprep.subr.bf16.mxu0 %v6404_v8  ;;  %v6531_v15 = vcombine.low %v590_v3, %v594_v5  ;;  %v6237_v3 = vcombine.low %v295_v53, %v299_v55  ;;  %v151_v5 = vld [vmem:[#allocation5 + $0xc8] sm:$0xff]  ;;  %v6230_v8 = vcombine.high %v287_v62, %v291_v1 }
  0xcb   :  { %v458_v10 = vld [vmem:[#allocation5 + $0xa60] sm:$0xff]  ;;  %v279_v7 = vld [vmem:[#allocation5 + $0x4c8] sm:$0xff] }
  0xcc   :  { %v582_v11 = vld [vmem:[#allocation5 + $0xe40] sm:$0xff]  ;;  %v6396_v16 = vcombine.high %v454_v9, %v458_v10  ;;  %3353 = vmatprep.subr.bf16.mxu1 %v6532_v12  ;;  %v6395_v23 = vcombine.low %v454_v9, %v458_v10  ;;  %v283_v9 = vld [vmem:[#allocation5 + $0x4e8] sm:$0xff]  ;;  %v6101_v10 = vcombine.low %v159_v60, %v163_v61  ;;  %v6094_v12 = vcombine.high %v151_v5, %v155_v6 }
  0xcd   :  { %v586_v13 = vld [vmem:[#allocation5 + $0xe60] sm:$0xff]  ;;  %3311 = vmatpush2.bf16.msra.mxu0 %v6403_v14  ;;  %3354 = vmatpush2.bf16.msra.mxu1 %v6531_v15  ;;  %v147_v14 = vld [vmem:[#allocation5 + $0xa8] sm:$0xff] }
  0xce   :  { %v446_v17 = vld [vmem:[#allocation5 + $0xa00] sm:$0xff]  ;;  %v6524_v20 = vcombine.high %v582_v11, %v586_v13  ;;  %3312 = vmatprep.subr.bf16.mxu0 %v6396_v16  ;;  %v6523_v24 = vcombine.low %v582_v11, %v586_v13  ;;  %v6229_v11 = vcombine.low %v287_v62, %v291_v1  ;;  %v143_v13 = vld [vmem:[#allocation5 + $0x88] sm:$0xff]  ;;  %v6222_v16 = vcombine.high %v279_v7, %v283_v9 }
  0xcf   :  { %v450_v18 = vld [vmem:[#allocation5 + $0xa20] sm:$0xff]  ;;  %v271_v15 = vld [vmem:[#allocation5 + $0x488] sm:$0xff]  ;;  %v6085_v28 = vcombine.low %v143_v13, %v147_v14 }
  0xd0   :  { %v574_v19 = vld [vmem:[#allocation5 + $0xe00] sm:$0xff]  ;;  %v6388_v26 = vcombine.high %v446_v17, %v450_v18  ;;  %3355 = vmatprep.subr.bf16.mxu1 %v6524_v20  ;;  %v6387_v38 = vcombine.low %v446_v17, %v450_v18  ;;  %v275_v17 = vld [vmem:[#allocation5 + $0x4a8] sm:$0xff]  ;;  %v6093_v18 = vcombine.low %v151_v5, %v155_v6  ;;  %v6086_v20 = vcombine.high %v143_v13, %v147_v14 }
  0xd1   :  { %v578_v22 = vld [vmem:[#allocation5 + $0xe20] sm:$0xff]  ;;  %3313 = vmatpush2.bf16.msra.mxu0 %v6395_v23  ;;  %3356 = vmatpush2.bf16.msra.mxu1 %v6523_v24  ;;  %v139_v23 = vld [vmem:[#allocation5 + $0x68] sm:$0xff]  ;;  %v6213_v29 = vcombine.low %v271_v15, %v275_v17 }
  0xd2   :  { %v6516_v30 = vcombine.high %v574_v19, %v578_v22  ;;  %v106_v31 = vld [vmem:[#allocation2 + $0x20] sm:$0xff]  ;;  %3314 = vmatprep.subr.bf16.mxu0 %v6388_v26  ;;  %v6515_v39 = vcombine.low %v574_v19, %v578_v22  ;;  %v6221_v19 = vcombine.low %v279_v7, %v283_v9  ;;  %v135_v22 = vld [vmem:[#allocation5 + $0x48] sm:$0xff]  ;;  %v6214_v26 = vcombine.high %v271_v15, %v275_v17 }
  0xd3   :  { %v114_v32 = vld [vmem:[#allocation2 + $0x60] sm:$0xff]  ;;  %v263_v24 = vld [vmem:[#allocation5 + $0x448] sm:$0xff] }
  0xd4   :  { %3357 = vmatprep.subr.bf16.mxu1 %v6516_v30  ;;  %v7558_v46 = vpack.c.bf16 %v114_v32, %v106_v31  ;;  %v6078_v30 = vcombine.high %v135_v22, %v139_v23  ;;  %v127_v31 = vld [vmem:[#allocation5 + $0x8] sm:$0xff]  ;;  %v6206_v35 = vcombine.high %v263_v24, %v267_v27 }
  0xd5   :  { %3315 = vmatpush2.bf16.msra.mxu0 %v6387_v38  ;;  %3358 = vmatpush2.bf16.msra.mxu1 %v6515_v39  ;;  %v131_v32 = vld [vmem:[#allocation5 + $0x28] sm:$0xff]  ;;  %v6077_v38 = vcombine.low %v135_v22, %v139_v23  ;;  %v6205_v39 = vcombine.low %v263_v24, %v267_v27 }
  0xd6   :  { %3370 = vmatprep.subr.bf16.mxu0 %v6126_v40  ;;  %3413 = vmatprep.subr.bf16.mxu1 %v6254_v44  ;;  %v255_v33 = vld [vmem:[#allocation5 + $0x408] sm:$0xff]  ;;  %v6070_v40 = vcombine.high %v127_v31, %v131_v32 }
  0xd7   :  { %v259_v36 = vld [vmem:[#allocation5 + $0x428] sm:$0xff] }
  0xd8   :  { %3317 = vmatmul.mubr.bf16.vlgmr.msra.gmra.mxu0 %v7558_v46  ;;  %3360 = vmatmul.mubr.bf16.vlgmr.msra.gmra.mxu1 %v7560_v47  ;;  %v247_v41 = vld [vmem:[#allocation5 + $0x3c8] sm:$0xff]  ;;  %v6198_v44 = vcombine.high %v255_v33, %v259_v36 }
  0xd9   :  { %3371 = vmatpush1.bf16.msra.mxu0 %v6125_v48  ;;  %3414 = vmatpush1.bf16.msra.mxu1 %v6253_v49  ;;  %v251_v42 = vld [vmem:[#allocation5 + $0x3e8] sm:$0xff]  ;;  %v6069_v48 = vcombine.low %v127_v31, %v131_v32  ;;  %v6197_v49 = vcombine.low %v255_v33, %v259_v36 }
  0xda   :  { %3372 = vmatprep.subr.bf16.mxu0 %v6118_v50  ;;  %3415 = vmatprep.subr.bf16.mxu1 %v6246_v54  ;;  %v375_v43 = vld [vmem:[#allocation5 + $0x7c8] sm:$0xff]  ;;  %v6190_v50 = vcombine.high %v247_v41, %v251_v42 }
  0xdb   :  { %3402 = vmatprep.mubr.bf16.mxu0 %v7540_v58  ;;  %3445 = vmatprep.mubr.bf16.mxu1 %v7542_v63  ;;  %v379_v45 = vld [vmem:[#allocation5 + $0x7e8] sm:$0xff] }
  0xdc   :  { %v239_v51 = vld [vmem:[#allocation5 + $0x388] sm:$0xff]  ;;  %v6318_v54 = vcombine.high %v375_v43, %v379_v45 }
  0xdd   :  { %3373 = vmatpush1.bf16.msra.mxu0 %v6117_v56  ;;  %3416 = vmatpush1.bf16.msra.mxu1 %v6245_v57  ;;  %v243_v52 = vld [vmem:[#allocation5 + $0x3a8] sm:$0xff]  ;;  %v6189_v56 = vcombine.low %v247_v41, %v251_v42  ;;  %v6317_v57 = vcombine.low %v375_v43, %v379_v45 }
  0xde   :  { %3374 = vmatprep.subr.bf16.mxu0 %v6110_v59  ;;  %3417 = vmatprep.subr.bf16.mxu1 %v6238_v0  ;;  %v367_v53 = vld [vmem:[#allocation5 + $0x788] sm:$0xff]  ;;  %v6182_v59 = vcombine.high %v239_v51, %v243_v52 }
  0xdf   :  { %v371_v55 = vld [vmem:[#allocation5 + $0x7a8] sm:$0xff] }
  0xe0   :  { %v231_v60 = vld [vmem:[#allocation5 + $0x348] sm:$0xff]  ;;  %v6310_v0 = vcombine.high %v367_v53, %v371_v55 }
  0xe1   :  { %3375 = vmatpush1.bf16.msra.mxu0 %v6109_v2  ;;  %3418 = vmatpush1.bf16.msra.mxu1 %v6237_v3  ;;  %v235_v61 = vld [vmem:[#allocation5 + $0x368] sm:$0xff]  ;;  %v6181_v2 = vcombine.low %v239_v51, %v243_v52  ;;  %v6309_v3 = vcombine.low %v367_v53, %v371_v55 }
  0xe2   :  { %3376 = vmatprep.subr.bf16.mxu0 %v6102_v4  ;;  %3419 = vmatprep.subr.bf16.mxu1 %v6230_v8  ;;  %v359_v62 = vld [vmem:[#allocation5 + $0x748] sm:$0xff]  ;;  %v6174_v4 = vcombine.high %v231_v60, %v235_v61 }
  0xe3   :  { %v363_v1 = vld [vmem:[#allocation5 + $0x768] sm:$0xff] }
  0xe4   :  { %v223_v5 = vld [vmem:[#allocation5 + $0x308] sm:$0xff]  ;;  %v6302_v8 = vcombine.high %v359_v62, %v363_v1 }
  0xe5   :  { %3377 = vmatpush1.bf16.msra.mxu0 %v6101_v10  ;;  %3420 = vmatpush1.bf16.msra.mxu1 %v6229_v11  ;;  %v227_v6 = vld [vmem:[#allocation5 + $0x328] sm:$0xff]  ;;  %v6173_v10 = vcombine.low %v231_v60, %v235_v61  ;;  %v6301_v11 = vcombine.low %v359_v62, %v363_v1 }
  0xe6   :  { %3378 = vmatprep.subr.bf16.mxu0 %v6094_v12  ;;  %3421 = vmatprep.subr.bf16.mxu1 %v6222_v16  ;;  %v351_v7 = vld [vmem:[#allocation5 + $0x708] sm:$0xff]  ;;  %v6166_v12 = vcombine.high %v223_v5, %v227_v6 }
  0xe7   :  { %v355_v9 = vld [vmem:[#allocation5 + $0x728] sm:$0xff] }
  0xe8   :  { %v215_v13 = vld [vmem:[#allocation5 + $0x2c8] sm:$0xff]  ;;  %v6294_v16 = vcombine.high %v351_v7, %v355_v9 }
  0xe9   :  { %3379 = vmatpush1.bf16.msra.mxu0 %v6093_v18  ;;  %3422 = vmatpush1.bf16.msra.mxu1 %v6221_v19  ;;  %v219_v14 = vld [vmem:[#allocation5 + $0x2e8] sm:$0xff]  ;;  %v6165_v18 = vcombine.low %v223_v5, %v227_v6  ;;  %v6293_v19 = vcombine.low %v351_v7, %v355_v9 }
  0xea   :  { %3380 = vmatprep.subr.bf16.mxu0 %v6086_v20  ;;  %3423 = vmatprep.subr.bf16.mxu1 %v6214_v26  ;;  %v343_v15 = vld [vmem:[#allocation5 + $0x6c8] sm:$0xff]  ;;  %v6158_v20 = vcombine.high %v215_v13, %v219_v14 }
  0xeb   :  { %v347_v17 = vld [vmem:[#allocation5 + $0x6e8] sm:$0xff] }
  0xec   :  { %v207_v22 = vld [vmem:[#allocation5 + $0x288] sm:$0xff]  ;;  %v6286_v26 = vcombine.high %v343_v15, %v347_v17 }
  0xed   :  { %3381 = vmatpush1.bf16.msra.mxu0 %v6085_v28  ;;  %3424 = vmatpush1.bf16.msra.mxu1 %v6213_v29  ;;  %v211_v23 = vld [vmem:[#allocation5 + $0x2a8] sm:$0xff]  ;;  %v6157_v28 = vcombine.low %v215_v13, %v219_v14  ;;  %v6285_v29 = vcombine.low %v343_v15, %v347_v17 }
  0xee   :  { %3382 = vmatprep.subr.bf16.mxu0 %v6078_v30  ;;  %3425 = vmatprep.subr.bf16.mxu1 %v6206_v35  ;;  %v335_v24 = vld [vmem:[#allocation5 + $0x688] sm:$0xff]  ;;  %v6150_v30 = vcombine.high %v207_v22, %v211_v23 }
  0xef   :  { %v339_v27 = vld [vmem:[#allocation5 + $0x6a8] sm:$0xff] }
  0xf0   :  { %v199_v31 = vld [vmem:[#allocation5 + $0x248] sm:$0xff]  ;;  %v6278_v35 = vcombine.high %v335_v24, %v339_v27 }
  0xf1   :  { %3383 = vmatpush1.bf16.msra.mxu0 %v6077_v38  ;;  %3426 = vmatpush1.bf16.msra.mxu1 %v6205_v39  ;;  %v203_v32 = vld [vmem:[#allocation5 + $0x268] sm:$0xff]  ;;  %v6149_v38 = vcombine.low %v207_v22, %v211_v23  ;;  %v6277_v39 = vcombine.low %v335_v24, %v339_v27 }
  0xf2   :  { %3384 = vmatprep.subr.bf16.mxu0 %v6070_v40  ;;  %3427 = vmatprep.subr.bf16.mxu1 %v6198_v44  ;;  %v327_v33 = vld [vmem:[#allocation5 + $0x648] sm:$0xff]  ;;  %v6142_v40 = vcombine.high %v199_v31, %v203_v32 }
  0xf3   :  { %v331_v36 = vld [vmem:[#allocation5 + $0x668] sm:$0xff] }
  0xf4   :  { %v191_v41 = vld [vmem:[#allocation5 + $0x208] sm:$0xff]  ;;  %v6270_v44 = vcombine.high %v327_v33, %v331_v36 }
  0xf5   :  { %3385 = vmatpush1.bf16.msra.mxu0 %v6069_v48  ;;  %3428 = vmatpush1.bf16.msra.mxu1 %v6197_v49  ;;  %v195_v42 = vld [vmem:[#allocation5 + $0x228] sm:$0xff]  ;;  %v6141_v48 = vcombine.low %v199_v31, %v203_v32  ;;  %v6269_v49 = vcombine.low %v327_v33, %v331_v36 }
  0xf6   :  { %3386 = vmatprep.subr.bf16.mxu0 %v6190_v50  ;;  %3429 = vmatprep.subr.bf16.mxu1 %v6318_v54  ;;  %v319_v43 = vld [vmem:[#allocation5 + $0x608] sm:$0xff]  ;;  %v6134_v50 = vcombine.high %v191_v41, %v195_v42 }
  0xf7   :  { %v323_v45 = vld [vmem:[#allocation5 + $0x628] sm:$0xff] }
  0xf8   :  { %v439_v51 = vld [vmem:[#allocation5 + $0x9c8] sm:$0xff]  ;;  %v6262_v54 = vcombine.high %v319_v43, %v323_v45 }
  0xf9   :  { %3387 = vmatpush2.bf16.msra.mxu0 %v6189_v56  ;;  %3430 = vmatpush2.bf16.msra.mxu1 %v6317_v57  ;;  %v443_v52 = vld [vmem:[#allocation5 + $0x9e8] sm:$0xff]  ;;  %v6133_v56 = vcombine.low %v191_v41, %v195_v42  ;;  %v6261_v57 = vcombine.low %v319_v43, %v323_v45 }
  0xfa   :  { %3388 = vmatprep.subr.bf16.mxu0 %v6182_v59  ;;  %3431 = vmatprep.subr.bf16.mxu1 %v6310_v0  ;;  %v567_v53 = vld [vmem:[#allocation5 + $0xdc8] sm:$0xff]  ;;  %v6382_v59 = vcombine.high %v439_v51, %v443_v52 }
  0xfb   :  { %v571_v55 = vld [vmem:[#allocation5 + $0xde8] sm:$0xff] }
  0xfc   :  { %v431_v60 = vld [vmem:[#allocation5 + $0x988] sm:$0xff]  ;;  %v6510_v0 = vcombine.high %v567_v53, %v571_v55 }
  0xfd   :  { %3389 = vmatpush2.bf16.msra.mxu0 %v6181_v2  ;;  %3432 = vmatpush2.bf16.msra.mxu1 %v6309_v3  ;;  %v435_v61 = vld [vmem:[#allocation5 + $0x9a8] sm:$0xff]  ;;  %v6381_v2 = vcombine.low %v439_v51, %v443_v52  ;;  %v6509_v3 = vcombine.low %v567_v53, %v571_v55 }
  0xfe   :  { %3390 = vmatprep.subr.bf16.mxu0 %v6174_v4  ;;  %3433 = vmatprep.subr.bf16.mxu1 %v6302_v8  ;;  %v559_v62 = vld [vmem:[#allocation5 + $0xd88] sm:$0xff]  ;;  %v6374_v4 = vcombine.high %v431_v60, %v435_v61 }
  0xff   :  { %v563_v1 = vld [vmem:[#allocation5 + $0xda8] sm:$0xff] }
 0x100   :  { %v423_v5 = vld [vmem:[#allocation5 + $0x948] sm:$0xff]  ;;  %v6502_v8 = vcombine.high %v559_v62, %v563_v1 }
 0x101   :  { %3391 = vmatpush2.bf16.msra.mxu0 %v6173_v10  ;;  %3434 = vmatpush2.bf16.msra.mxu1 %v6301_v11  ;;  %v427_v6 = vld [vmem:[#allocation5 + $0x968] sm:$0xff]  ;;  %v6373_v10 = vcombine.low %v431_v60, %v435_v61  ;;  %v6501_v11 = vcombine.low %v559_v62, %v563_v1 }
 0x102   :  { %3392 = vmatprep.subr.bf16.mxu0 %v6166_v12  ;;  %3435 = vmatprep.subr.bf16.mxu1 %v6294_v16  ;;  %v551_v7 = vld [vmem:[#allocation5 + $0xd48] sm:$0xff]  ;;  %v6366_v12 = vcombine.high %v423_v5, %v427_v6 }
 0x103   :  { %v555_v9 = vld [vmem:[#allocation5 + $0xd68] sm:$0xff] }
 0x104   :  { %v415_v13 = vld [vmem:[#allocation5 + $0x908] sm:$0xff]  ;;  %v6494_v16 = vcombine.high %v551_v7, %v555_v9 }
 0x105   :  { %3393 = vmatpush2.bf16.msra.mxu0 %v6165_v18  ;;  %3436 = vmatpush2.bf16.msra.mxu1 %v6293_v19  ;;  %v419_v14 = vld [vmem:[#allocation5 + $0x928] sm:$0xff]  ;;  %v6365_v18 = vcombine.low %v423_v5, %v427_v6  ;;  %v6493_v19 = vcombine.low %v551_v7, %v555_v9 }
 0x106   :  { %3394 = vmatprep.subr.bf16.mxu0 %v6158_v20  ;;  %3437 = vmatprep.subr.bf16.mxu1 %v6286_v26  ;;  %v543_v15 = vld [vmem:[#allocation5 + $0xd08] sm:$0xff]  ;;  %v6358_v20 = vcombine.high %v415_v13, %v419_v14 }
 0x107   :  { %v547_v17 = vld [vmem:[#allocation5 + $0xd28] sm:$0xff] }
 0x108   :  { %v6486_v22 = vcombine.high %v543_v15, %v547_v17  ;;  %v407_v23 = vld [vmem:[#allocation5 + $0x8c8] sm:$0xff] }
 0x109   :  { %3395 = vmatpush2.bf16.msra.mxu0 %v6157_v28  ;;  %3438 = vmatpush2.bf16.msra.mxu1 %v6285_v29  ;;  %v411_v24 = vld [vmem:[#allocation5 + $0x8e8] sm:$0xff]  ;;  %v6357_v28 = vcombine.low %v415_v13, %v419_v14  ;;  %v6485_v29 = vcombine.low %v543_v15, %v547_v17 }
 0x10a   :  { %3396 = vmatprep.subr.bf16.mxu0 %v6150_v30  ;;  %3439 = vmatprep.subr.bf16.mxu1 %v6278_v35  ;;  %v535_v26 = vld [vmem:[#allocation5 + $0xcc8] sm:$0xff]  ;;  %v6350_v30 = vcombine.high %v407_v23, %v411_v24 }
 0x10b   :  { %v539_v27 = vld [vmem:[#allocation5 + $0xce8] sm:$0xff] }
 0x10c   :  { %v6478_v31 = vcombine.high %v535_v26, %v539_v27  ;;  %v399_v32 = vld [vmem:[#allocation5 + $0x888] sm:$0xff] }
 0x10d   :  { %3397 = vmatpush2.bf16.msra.mxu0 %v6149_v38  ;;  %3440 = vmatpush2.bf16.msra.mxu1 %v6277_v39  ;;  %v403_v33 = vld [vmem:[#allocation5 + $0x8a8] sm:$0xff]  ;;  %v6349_v38 = vcombine.low %v407_v23, %v411_v24  ;;  %v6477_v39 = vcombine.low %v535_v26, %v539_v27 }
 0x10e   :  { %3398 = vmatprep.subr.bf16.mxu0 %v6142_v40  ;;  %3441 = vmatprep.subr.bf16.mxu1 %v6270_v44  ;;  %v527_v35 = vld [vmem:[#allocation5 + $0xc88] sm:$0xff]  ;;  %v6342_v40 = vcombine.high %v399_v32, %v403_v33 }
 0x10f   :  { %v531_v36 = vld [vmem:[#allocation5 + $0xca8] sm:$0xff] }
 0x110   :  { %v6470_v41 = vcombine.high %v527_v35, %v531_v36  ;;  %v391_v42 = vld [vmem:[#allocation5 + $0x848] sm:$0xff] }
 0x111   :  { %3399 = vmatpush2.bf16.msra.mxu0 %v6141_v48  ;;  %3442 = vmatpush2.bf16.msra.mxu1 %v6269_v49  ;;  %v395_v43 = vld [vmem:[#allocation5 + $0x868] sm:$0xff]  ;;  %v6341_v48 = vcombine.low %v399_v32, %v403_v33  ;;  %v6469_v49 = vcombine.low %v527_v35, %v531_v36 }
 0x112   :  { %3400 = vmatprep.subr.bf16.mxu0 %v6134_v50  ;;  %3443 = vmatprep.subr.bf16.mxu1 %v6262_v54  ;;  %v519_v44 = vld [vmem:[#allocation5 + $0xc48] sm:$0xff]  ;;  %v6334_v50 = vcombine.high %v391_v42, %v395_v43 }
 0x113   :  { %v523_v45 = vld [vmem:[#allocation5 + $0xc68] sm:$0xff] }
 0x114   :  { %v6462_v51 = vcombine.high %v519_v44, %v523_v45  ;;  %v383_v52 = vld [vmem:[#allocation5 + $0x808] sm:$0xff] }
 0x115   :  { %3401 = vmatpush2.bf16.msra.mxu0 %v6133_v56  ;;  %3444 = vmatpush2.bf16.msra.mxu1 %v6261_v57  ;;  %v387_v53 = vld [vmem:[#allocation5 + $0x828] sm:$0xff]  ;;  %v6333_v56 = vcombine.low %v391_v42, %v395_v43  ;;  %v6461_v57 = vcombine.low %v519_v44, %v523_v45 }
 0x116   :  { %3456 = vmatprep.subr.bf16.mxu0 %v6382_v59  ;;  %3499 = vmatprep.subr.bf16.mxu1 %v6510_v0  ;;  %v511_v54 = vld [vmem:[#allocation5 + $0xc08] sm:$0xff]  ;;  %v6326_v59 = vcombine.high %v383_v52, %v387_v53 }
 0x117   :  { %v515_v55 = vld [vmem:[#allocation5 + $0xc28] sm:$0xff] }
 0x118   :  { %3403 = vmatmul.mubr.bf16.vlgmr.msra.gmra.mxu0 %v7546_v21  ;;  %3446 = vmatmul.mubr.bf16.vlgmr.msra.gmra.mxu1 %v7548_v25  ;;  %v6454_v60 = vcombine.high %v511_v54, %v515_v55  ;;  %v503_v61 = vld [vmem:[#allocation5 + $0xbc8] sm:$0xff] }
 0x119   :  { %3457 = vmatpush1.bf16.msra.mxu0 %v6381_v2  ;;  %3500 = vmatpush1.bf16.msra.mxu1 %v6509_v3  ;;  %v507_v62 = vld [vmem:[#allocation5 + $0xbe8] sm:$0xff]  ;;  %v6325_v2 = vcombine.low %v383_v52, %v387_v53  ;;  %v6453_v3 = vcombine.low %v511_v54, %v515_v55 }
 0x11a   :  { %3458 = vmatprep.subr.bf16.mxu0 %v6374_v4  ;;  %3501 = vmatprep.subr.bf16.mxu1 %v6502_v8  ;;  %v631_v0 = vld [vmem:[#allocation5 + $0xfc8] sm:$0xff]  ;;  %v6446_v4 = vcombine.high %v503_v61, %v507_v62 }
 0x11b   :  { %3488 = vmatprep.mubr.bf16.mxu0 %v7550_v34  ;;  %3531 = vmatprep.mubr.bf16.mxu1 %v7553_v37  ;;  %v635_v1 = vld [vmem:[#allocation5 + $0xfe8] sm:$0xff] }
 0x11c   :  { %v6574_v5 = vcombine.high %v631_v0, %v635_v1  ;;  %v495_v6 = vld [vmem:[#allocation5 + $0xb88] sm:$0xff] }
 0x11d   :  { %3459 = vmatpush1.bf16.msra.mxu0 %v6373_v10  ;;  %3502 = vmatpush1.bf16.msra.mxu1 %v6501_v11  ;;  %v499_v7 = vld [vmem:[#allocation5 + $0xba8] sm:$0xff]  ;;  %v6445_v10 = vcombine.low %v503_v61, %v507_v62  ;;  %v6573_v11 = vcombine.low %v631_v0, %v635_v1 }
 0x11e   :  { %3460 = vmatprep.subr.bf16.mxu0 %v6366_v12  ;;  %3503 = vmatprep.subr.bf16.mxu1 %v6494_v16  ;;  %v623_v8 = vld [vmem:[#allocation5 + $0xf88] sm:$0xff]  ;;  %v6438_v12 = vcombine.high %v495_v6, %v499_v7 }
 0x11f   :  { %v627_v9 = vld [vmem:[#allocation5 + $0xfa8] sm:$0xff] }
 0x120   :  { %v6566_v13 = vcombine.high %v623_v8, %v627_v9  ;;  %v487_v14 = vld [vmem:[#allocation5 + $0xb48] sm:$0xff] }
 0x121   :  { %3461 = vmatpush1.bf16.msra.mxu0 %v6365_v18  ;;  %3504 = vmatpush1.bf16.msra.mxu1 %v6493_v19  ;;  %v491_v15 = vld [vmem:[#allocation5 + $0xb68] sm:$0xff]  ;;  %v6437_v18 = vcombine.low %v495_v6, %v499_v7  ;;  %v6565_v19 = vcombine.low %v623_v8, %v627_v9  ;;  %v184_v6 = vld [vmem:[#allocation5 + $0x1d0] sm:$0xff] }
 0x122   :  { %3462 = vmatprep.subr.bf16.mxu0 %v6358_v20  ;;  %3505 = vmatprep.subr.bf16.mxu1 %v6486_v22  ;;  %v615_v16 = vld [vmem:[#allocation5 + $0xf48] sm:$0xff]  ;;  %v6430_v20 = vcombine.high %v487_v14, %v491_v15  ;;  %v188_v7 = vld [vmem:[#allocation5 + $0x1f0] sm:$0xff] }
 0x123   :  { %v619_v17 = vld [vmem:[#allocation5 + $0xf68] sm:$0xff]  ;;  %v312_v8 = vld [vmem:[#allocation5 + $0x5d0] sm:$0xff] }
 0x124   :  { %v6558_v22 = vcombine.high %v615_v16, %v619_v17  ;;  %v479_v23 = vld [vmem:[#allocation5 + $0xb08] sm:$0xff]  ;;  %v316_v9 = vld [vmem:[#allocation5 + $0x5f0] sm:$0xff] }
 0x125   :  { %3463 = vmatpush1.bf16.msra.mxu0 %v6357_v28  ;;  %3506 = vmatpush1.bf16.msra.mxu1 %v6485_v29  ;;  %v483_v24 = vld [vmem:[#allocation5 + $0xb28] sm:$0xff]  ;;  %v6429_v28 = vcombine.low %v487_v14, %v491_v15  ;;  %v6557_v29 = vcombine.low %v615_v16, %v619_v17  ;;  %v176_v14 = vld [vmem:[#allocation5 + $0x190] sm:$0xff] }
 0x126   :  { %3464 = vmatprep.subr.bf16.mxu0 %v6350_v30  ;;  %3507 = vmatprep.subr.bf16.mxu1 %v6478_v31  ;;  %v607_v26 = vld [vmem:[#allocation5 + $0xf08] sm:$0xff]  ;;  %v6422_v30 = vcombine.high %v479_v23, %v483_v24  ;;  %v180_v15 = vld [vmem:[#allocation5 + $0x1b0] sm:$0xff] }
 0x127   :  { %v611_v27 = vld [vmem:[#allocation5 + $0xf28] sm:$0xff]  ;;  %v304_v16 = vld [vmem:[#allocation5 + $0x590] sm:$0xff] }
 0x128   :  { %v6550_v31 = vcombine.high %v607_v26, %v611_v27  ;;  %v471_v32 = vld [vmem:[#allocation5 + $0xac8] sm:$0xff]  ;;  %v308_v17 = vld [vmem:[#allocation5 + $0x5b0] sm:$0xff] }
 0x129   :  { %3465 = vmatpush1.bf16.msra.mxu0 %v6349_v38  ;;  %3508 = vmatpush1.bf16.msra.mxu1 %v6477_v39  ;;  %v475_v33 = vld [vmem:[#allocation5 + $0xae8] sm:$0xff]  ;;  %v6421_v38 = vcombine.low %v479_v23, %v483_v24  ;;  %v6549_v39 = vcombine.low %v607_v26, %v611_v27  ;;  %v168_v23 = vld [vmem:[#allocation5 + $0x150] sm:$0xff] }
 0x12a   :  { %3466 = vmatprep.subr.bf16.mxu0 %v6342_v40  ;;  %3509 = vmatprep.subr.bf16.mxu1 %v6470_v41  ;;  %v599_v35 = vld [vmem:[#allocation5 + $0xec8] sm:$0xff]  ;;  %v6414_v40 = vcombine.high %v471_v32, %v475_v33  ;;  %v172_v24 = vld [vmem:[#allocation5 + $0x170] sm:$0xff] }
 0x12b   :  { %v603_v36 = vld [vmem:[#allocation5 + $0xee8] sm:$0xff]  ;;  %v296_v27 = vld [vmem:[#allocation5 + $0x550] sm:$0xff] }
 0x12c   :  { %v6542_v41 = vcombine.high %v599_v35, %v603_v36  ;;  %v463_v42 = vld [vmem:[#allocation5 + $0xa88] sm:$0xff] }
 0x12d   :  { %3467 = vmatpush1.bf16.msra.mxu0 %v6341_v48  ;;  %3510 = vmatpush1.bf16.msra.mxu1 %v6469_v49  ;;  %v467_v43 = vld [vmem:[#allocation5 + $0xaa8] sm:$0xff]  ;;  %v6413_v48 = vcombine.low %v471_v32, %v475_v33  ;;  %v6541_v49 = vcombine.low %v599_v35, %v603_v36  ;;  %v6247_v33 = vcombine.low %v304_v16, %v308_v17 }
 0x12e   :  { %3468 = vmatprep.subr.bf16.mxu0 %v6334_v50  ;;  %3511 = vmatprep.subr.bf16.mxu1 %v6462_v51  ;;  %v591_v44 = vld [vmem:[#allocation5 + $0xe88] sm:$0xff]  ;;  %v6406_v50 = vcombine.high %v463_v42, %v467_v43  ;;  %v6112_v35 = vcombine.high %v168_v23, %v172_v24 }
 0x12f   :  { %v595_v45 = vld [vmem:[#allocation5 + $0xea8] sm:$0xff] }
 0x130   :  { %v6534_v51 = vcombine.high %v591_v44, %v595_v45  ;;  %v455_v52 = vld [vmem:[#allocation5 + $0xa48] sm:$0xff] }
 0x131   :  { %3469 = vmatpush1.bf16.msra.mxu0 %v6333_v56  ;;  %3512 = vmatpush1.bf16.msra.mxu1 %v6461_v57  ;;  %v459_v53 = vld [vmem:[#allocation5 + $0xa68] sm:$0xff]  ;;  %v6405_v56 = vcombine.low %v463_v42, %v467_v43  ;;  %v6533_v57 = vcombine.low %v591_v44, %v595_v45  ;;  %v288_v42 = vld [vmem:[#allocation5 + $0x510] sm:$0xff]  ;;  %v6111_v45 = vcombine.low %v168_v23, %v172_v24 }
 0x132   :  { %3470 = vmatprep.subr.bf16.mxu0 %v6326_v59  ;;  %3513 = vmatprep.subr.bf16.mxu1 %v6454_v60  ;;  %v583_v54 = vld [vmem:[#allocation5 + $0xe48] sm:$0xff]  ;;  %v6398_v59 = vcombine.high %v455_v52, %v459_v53  ;;  %v292_v43 = vld [vmem:[#allocation5 + $0x530] sm:$0xff] }
 0x133   :  { %v587_v55 = vld [vmem:[#allocation5 + $0xe68] sm:$0xff]  ;;  %v248_v23 = vld [vmem:[#allocation5 + $0x3d0] sm:$0xff] }
 0x134   :  { %v6526_v60 = vcombine.high %v583_v54, %v587_v55  ;;  %v447_v61 = vld [vmem:[#allocation5 + $0xa08] sm:$0xff]  ;;  %v252_v24 = vld [vmem:[#allocation5 + $0x3f0] sm:$0xff] }
 0x135   :  { %3471 = vmatpush1.bf16.msra.mxu0 %v6325_v2  ;;  %3514 = vmatpush1.bf16.msra.mxu1 %v6453_v3  ;;  %v451_v62 = vld [vmem:[#allocation5 + $0xa28] sm:$0xff]  ;;  %v6397_v2 = vcombine.low %v455_v52, %v459_v53  ;;  %v6525_v3 = vcombine.low %v583_v54, %v587_v55  ;;  %v152_v52 = vld [vmem:[#allocation5 + $0xd0] sm:$0xff] }
 0x136   :  { %3472 = vmatprep.subr.bf16.mxu0 %v6446_v4  ;;  %3515 = vmatprep.subr.bf16.mxu1 %v6574_v5  ;;  %v575_v0 = vld [vmem:[#allocation5 + $0xe08] sm:$0xff]  ;;  %v6390_v4 = vcombine.high %v447_v61, %v451_v62  ;;  %v156_v53 = vld [vmem:[#allocation5 + $0xf0] sm:$0xff] }
 0x137   :  { %v579_v1 = vld [vmem:[#allocation5 + $0xe28] sm:$0xff]  ;;  %v280_v54 = vld [vmem:[#allocation5 + $0x4d0] sm:$0xff] }
 0x138   :  { %v6518_v5 = vcombine.high %v575_v0, %v579_v1  ;;  %v284_v55 = vld [vmem:[#allocation5 + $0x4f0] sm:$0xff] }
 0x139   :  { %3473 = vmatpush2.bf16.msra.mxu0 %v6445_v10  ;;  %3516 = vmatpush2.bf16.msra.mxu1 %v6573_v11  ;;  %v6389_v10 = vcombine.low %v447_v61, %v451_v62  ;;  %v6517_v11 = vcombine.low %v575_v0, %v579_v1  ;;  %v144_v61 = vld [vmem:[#allocation5 + $0x90] sm:$0xff] }
 0x13a   :  { %3474 = vmatprep.subr.bf16.mxu0 %v6438_v12  ;;  %3517 = vmatprep.subr.bf16.mxu1 %v6566_v13  ;;  %v6128_v12 = vcombine.high %v184_v6, %v188_v7  ;;  %v6256_v13 = vcombine.high %v312_v8, %v316_v9  ;;  %v148_v62 = vld [vmem:[#allocation5 + $0xb0] sm:$0xff] }
 0x13b   :  { %v272_v0 = vld [vmem:[#allocation5 + $0x490] sm:$0xff] }
 0x13c   :  { %v276_v1 = vld [vmem:[#allocation5 + $0x4b0] sm:$0xff] }
 0x13d   :  { %3475 = vmatpush2.bf16.msra.mxu0 %v6437_v18  ;;  %3518 = vmatpush2.bf16.msra.mxu1 %v6565_v19  ;;  %v6127_v18 = vcombine.low %v184_v6, %v188_v7  ;;  %v6255_v19 = vcombine.low %v312_v8, %v316_v9  ;;  %v136_v6 = vld [vmem:[#allocation5 + $0x50] sm:$0xff] }
 0x13e   :  { %3476 = vmatprep.subr.bf16.mxu0 %v6430_v20  ;;  %3519 = vmatprep.subr.bf16.mxu1 %v6558_v22  ;;  %v6120_v20 = vcombine.high %v176_v14, %v180_v15  ;;  %v6248_v22 = vcombine.high %v304_v16, %v308_v17  ;;  %v140_v7 = vld [vmem:[#allocation5 + $0x70] sm:$0xff] }
 0x13f   :  { %v264_v8 = vld [vmem:[#allocation5 + $0x450] sm:$0xff] }
 0x140   :  { %v268_v9 = vld [vmem:[#allocation5 + $0x470] sm:$0xff] }
 0x141   :  { %3477 = vmatpush2.bf16.msra.mxu0 %v6429_v28  ;;  %3520 = vmatpush2.bf16.msra.mxu1 %v6557_v29  ;;  %v300_v28 = vld [vmem:[#allocation5 + $0x570] sm:$0xff] }
 0x142   :  { %3478 = vmatprep.subr.bf16.mxu0 %v6422_v30  ;;  %3521 = vmatprep.subr.bf16.mxu1 %v6550_v31  ;;  %v6119_v30 = vcombine.low %v176_v14, %v180_v15  ;;  %v128_v14 = vld [vmem:[#allocation5 + $0x10] sm:$0xff] }
 0x143   :  { %v132_v15 = vld [vmem:[#allocation5 + $0x30] sm:$0xff] }
 0x144   :  { %v256_v16 = vld [vmem:[#allocation5 + $0x410] sm:$0xff] }
 0x145   :  { %3479 = vmatpush2.bf16.msra.mxu0 %v6421_v38  ;;  %3522 = vmatpush2.bf16.msra.mxu1 %v6549_v39  ;;  %v6240_v38 = vcombine.high %v296_v27, %v300_v28  ;;  %v160_v39 = vld [vmem:[#allocation5 + $0x110] sm:$0xff] }
 0x146   :  { %3480 = vmatprep.subr.bf16.mxu0 %v6414_v40  ;;  %3523 = vmatprep.subr.bf16.mxu1 %v6542_v41  ;;  %v164_v40 = vld [vmem:[#allocation5 + $0x130] sm:$0xff] }
 0x147   :  { %v260_v17 = vld [vmem:[#allocation5 + $0x430] sm:$0xff] }
 0x149   :  { %3481 = vmatpush2.bf16.msra.mxu0 %v6413_v48  ;;  %3524 = vmatpush2.bf16.msra.mxu1 %v6541_v49  ;;  %v6239_v49 = vcombine.low %v296_v27, %v300_v28  ;;  %v380_v27 = vld [vmem:[#allocation5 + $0x7f0] sm:$0xff]  ;;  %v6071_v28 = vcombine.low %v128_v14, %v132_v15 }
 0x14a   :  { %3482 = vmatprep.subr.bf16.mxu0 %v6406_v50  ;;  %3525 = vmatprep.subr.bf16.mxu1 %v6534_v51  ;;  %v6104_v50 = vcombine.high %v160_v39, %v164_v40  ;;  %v6232_v51 = vcombine.high %v288_v42, %v292_v43 }
 0x14d   :  { %3483 = vmatpush2.bf16.msra.mxu0 %v6405_v56  ;;  %3526 = vmatpush2.bf16.msra.mxu1 %v6533_v57  ;;  %v6103_v56 = vcombine.low %v160_v39, %v164_v40  ;;  %v6231_v57 = vcombine.low %v288_v42, %v292_v43  ;;  %v368_v39 = vld [vmem:[#allocation5 + $0x790] sm:$0xff] }
 0x14e   :  { %3484 = vmatprep.subr.bf16.mxu0 %v6398_v59  ;;  %3527 = vmatprep.subr.bf16.mxu1 %v6526_v60  ;;  %v6096_v59 = vcombine.high %v152_v52, %v156_v53  ;;  %v6224_v60 = vcombine.high %v280_v54, %v284_v55  ;;  %v372_v40 = vld [vmem:[#allocation5 + $0x7b0] sm:$0xff] }
 0x151   :  { %3485 = vmatpush2.bf16.msra.mxu0 %v6397_v2  ;;  %3528 = vmatpush2.bf16.msra.mxu1 %v6525_v3  ;;  %v6095_v2 = vcombine.low %v152_v52, %v156_v53  ;;  %v6223_v3 = vcombine.low %v280_v54, %v284_v55  ;;  %v6311_v53 = vcombine.low %v368_v39, %v372_v40 }
 0x152   :  { %3486 = vmatprep.subr.bf16.mxu0 %v6390_v4  ;;  %3529 = vmatprep.subr.bf16.mxu1 %v6518_v5  ;;  %v6088_v4 = vcombine.high %v144_v61, %v148_v62  ;;  %v6216_v5 = vcombine.high %v272_v0, %v276_v1 }
 0x155   :  { %3487 = vmatpush2.bf16.msra.mxu0 %v6389_v10  ;;  %3530 = vmatpush2.bf16.msra.mxu1 %v6517_v11  ;;  %v6087_v10 = vcombine.low %v144_v61, %v148_v62  ;;  %v6215_v11 = vcombine.low %v272_v0, %v276_v1 }
 0x156   :  { %3542 = vmatprep.subr.bf16.mxu0 %v6128_v12  ;;  %3585 = vmatprep.subr.bf16.mxu1 %v6256_v13  ;;  %v3275_v29 = vpop.f32.mrf.mxu1  ;;  %v6080_v12 = vcombine.high %v136_v6, %v140_v7  ;;  %v6208_v13 = vcombine.high %v264_v8, %v268_v9 }
 0x158   :  { %v3232_v26 = vpop.f32.mrf.mxu0  ;;  %3489 = vmatmul.mubr.bf16.vlgmr.msra.gmra.mxu0 %v7558_v46  ;;  %3532 = vmatmul.mubr.bf16.vlgmr.msra.gmra.mxu1 %v7560_v47  ;;  %v7576_v36 = vpop.f32.mrf.mxu1 }
 0x159   :  { %3543 = vmatpush1.bf16.msra.mxu0 %v6127_v18  ;;  %v7572_v31 = vadd.f32 %v3275_v29, %v3232_v26  ;;  %3586 = vmatpush1.bf16.msra.mxu1 %v6255_v19  ;;  %v6079_v18 = vcombine.low %v136_v6, %v140_v7  ;;  %v6207_v19 = vcombine.low %v264_v8, %v268_v9  ;;  %v376_v26 = vld [vmem:[#allocation5 + $0x7d0] sm:$0xff] }
 0x15a   :  { %v7574_v32 = vpop.f32.mrf.mxu0  ;;  %3544 = vmatprep.subr.bf16.mxu0 %v6120_v20  ;;  %3587 = vmatprep.subr.bf16.mxu1 %v6248_v22  ;;  %v3279_v44 = vpop.f32.mrf.mxu1  ;;  %v6072_v20 = vcombine.high %v128_v14, %v132_v15  ;;  %v6200_v22 = vcombine.high %v256_v16, %v260_v17  ;;  %v6199_v29 = vcombine.low %v256_v16, %v260_v17 }
 0x15b   :  { %3574 = vmatprep.mubr.bf16.mxu0 %v7540_v58  ;;  %3617 = vmatprep.mubr.bf16.mxu1 %v7542_v63  ;;  %v6319_v42 = vcombine.low %v376_v26, %v380_v27 }
 0x15c   :  { %v3236_v41 = vpop.f32.mrf.mxu0 }
 0x15d   :  { %3545 = vmatpush1.bf16.msra.mxu0 %v6119_v30  ;;  %v7580_v48 = vadd.f32 %v3279_v44, %v3236_v41  ;;  %3588 = vmatpush1.bf16.msra.mxu1 %v6247_v33  ;;  %v6192_v30 = vcombine.high %v248_v23, %v252_v24  ;;  %v6320_v33 = vcombine.high %v376_v26, %v380_v27 }
 0x15e   :  { %3546 = vmatprep.subr.bf16.mxu0 %v6112_v35  ;;  %3589 = vmatprep.subr.bf16.mxu1 %v6240_v38  ;;  %v240_v35 = vld [vmem:[#allocation5 + $0x390] sm:$0xff]  ;;  %v6191_v41 = vcombine.low %v248_v23, %v252_v24  ;;  %v6312_v44 = vcombine.high %v368_v39, %v372_v40 }
 0x15f   :  { %v244_v38 = vld [vmem:[#allocation5 + $0x3b0] sm:$0xff] }
 0x160   :  { %v6184_v43 = vcombine.high %v240_v35, %v244_v38  ;;  %v6183_v52 = vcombine.low %v240_v35, %v244_v38 }
 0x161   :  { %3547 = vmatpush1.bf16.msra.mxu0 %v6111_v45  ;;  %3590 = vmatpush1.bf16.msra.mxu1 %v6239_v49  ;;  %v232_v45 = vld [vmem:[#allocation5 + $0x350] sm:$0xff] }
 0x162   :  { %3548 = vmatprep.subr.bf16.mxu0 %v6104_v50  ;;  %3591 = vmatprep.subr.bf16.mxu1 %v6232_v51  ;;  %v236_v49 = vld [vmem:[#allocation5 + $0x370] sm:$0xff] }
 0x163   :  { %v360_v50 = vld [vmem:[#allocation5 + $0x750] sm:$0xff]  ;;  %v6176_v54 = vcombine.high %v232_v45, %v236_v49  ;;  %v6175_v61 = vcombine.low %v232_v45, %v236_v49 }
 0x164   :  { %v364_v51 = vld [vmem:[#allocation5 + $0x770] sm:$0xff] }
 0x165   :  { %3549 = vmatpush1.bf16.msra.mxu0 %v6103_v56  ;;  %3592 = vmatpush1.bf16.msra.mxu1 %v6231_v57  ;;  %v6304_v55 = vcombine.high %v360_v50, %v364_v51  ;;  %v224_v56 = vld [vmem:[#allocation5 + $0x310] sm:$0xff]  ;;  %v6303_v62 = vcombine.low %v360_v50, %v364_v51 }
 0x166   :  { %3550 = vmatprep.subr.bf16.mxu0 %v6096_v59  ;;  %3593 = vmatprep.subr.bf16.mxu1 %v6224_v60  ;;  %v228_v57 = vld [vmem:[#allocation5 + $0x330] sm:$0xff] }
 0x167   :  { %v352_v59 = vld [vmem:[#allocation5 + $0x710] sm:$0xff]  ;;  %v6168_v0 = vcombine.high %v224_v56, %v228_v57  ;;  %v6167_v6 = vcombine.low %v224_v56, %v228_v57  ;;  %v7582_v57 = vpop.f32.mrf.mxu0 }
 0x168   :  { %v356_v60 = vld [vmem:[#allocation5 + $0x730] sm:$0xff] }
 0x169   :  { %3551 = vmatpush1.bf16.msra.mxu0 %v6095_v2  ;;  %3594 = vmatpush1.bf16.msra.mxu1 %v6223_v3  ;;  %v6296_v1 = vcombine.high %v352_v59, %v356_v60  ;;  %v216_v2 = vld [vmem:[#allocation5 + $0x2d0] sm:$0xff]  ;;  %v6295_v7 = vcombine.low %v352_v59, %v356_v60 }
 0x16a   :  { %3552 = vmatprep.subr.bf16.mxu0 %v6088_v4  ;;  %3595 = vmatprep.subr.bf16.mxu1 %v6216_v5  ;;  %v220_v3 = vld [vmem:[#allocation5 + $0x2f0] sm:$0xff] }
 0x16b   :  { %v344_v4 = vld [vmem:[#allocation5 + $0x6d0] sm:$0xff]  ;;  %v6160_v8 = vcombine.high %v216_v2, %v220_v3  ;;  %v6159_v14 = vcombine.low %v216_v2, %v220_v3 }
 0x16c   :  { %v348_v5 = vld [vmem:[#allocation5 + $0x6f0] sm:$0xff] }
 0x16d   :  { %3553 = vmatpush1.bf16.msra.mxu0 %v6087_v10  ;;  %3596 = vmatpush1.bf16.msra.mxu1 %v6215_v11  ;;  %v6288_v9 = vcombine.high %v344_v4, %v348_v5  ;;  %v208_v10 = vld [vmem:[#allocation5 + $0x290] sm:$0xff]  ;;  %v6287_v15 = vcombine.low %v344_v4, %v348_v5 }
 0x16e   :  { %3554 = vmatprep.subr.bf16.mxu0 %v6080_v12  ;;  %3597 = vmatprep.subr.bf16.mxu1 %v6208_v13  ;;  %v212_v11 = vld [vmem:[#allocation5 + $0x2b0] sm:$0xff] }
 0x16f   :  { %v336_v12 = vld [vmem:[#allocation5 + $0x690] sm:$0xff]  ;;  %v6152_v16 = vcombine.high %v208_v10, %v212_v11  ;;  %v6151_v23 = vcombine.low %v208_v10, %v212_v11 }
 0x170   :  { %v340_v13 = vld [vmem:[#allocation5 + $0x6b0] sm:$0xff] }
 0x171   :  { %3555 = vmatpush1.bf16.msra.mxu0 %v6079_v18  ;;  %3598 = vmatpush1.bf16.msra.mxu1 %v6207_v19  ;;  %v6280_v17 = vcombine.high %v336_v12, %v340_v13  ;;  %v200_v18 = vld [vmem:[#allocation5 + $0x250] sm:$0xff]  ;;  %v6279_v24 = vcombine.low %v336_v12, %v340_v13 }
 0x172   :  { %3556 = vmatprep.subr.bf16.mxu0 %v6072_v20  ;;  %3599 = vmatprep.subr.bf16.mxu1 %v6200_v22  ;;  %v204_v19 = vld [vmem:[#allocation5 + $0x270] sm:$0xff] }
 0x173   :  { %v328_v20 = vld [vmem:[#allocation5 + $0x650] sm:$0xff]  ;;  %v6144_v26 = vcombine.high %v200_v18, %v204_v19  ;;  %v6143_v35 = vcombine.low %v200_v18, %v204_v19 }
 0x174   :  { %v332_v22 = vld [vmem:[#allocation5 + $0x670] sm:$0xff] }
 0x175   :  { %3557 = vmatpush1.bf16.msra.mxu0 %v6071_v28  ;;  %3600 = vmatpush1.bf16.msra.mxu1 %v6199_v29  ;;  %v6272_v27 = vcombine.high %v328_v20, %v332_v22  ;;  %v192_v28 = vld [vmem:[#allocation5 + $0x210] sm:$0xff]  ;;  %v6271_v38 = vcombine.low %v328_v20, %v332_v22 }
 0x176   :  { %3558 = vmatprep.subr.bf16.mxu0 %v6192_v30  ;;  %3601 = vmatprep.subr.bf16.mxu1 %v6320_v33  ;;  %v196_v29 = vld [vmem:[#allocation5 + $0x230] sm:$0xff] }
 0x177   :  { %v320_v30 = vld [vmem:[#allocation5 + $0x610] sm:$0xff]  ;;  %v6136_v39 = vcombine.high %v192_v28, %v196_v29  ;;  %v6135_v45 = vcombine.low %v192_v28, %v196_v29 }
 0x178   :  { %v324_v33 = vld [vmem:[#allocation5 + $0x630] sm:$0xff] }
 0x179   :  { %3559 = vmatpush2.bf16.msra.mxu0 %v6191_v41  ;;  %3602 = vmatpush2.bf16.msra.mxu1 %v6319_v42  ;;  %v6264_v40 = vcombine.high %v320_v30, %v324_v33  ;;  %v440_v41 = vld [vmem:[#allocation5 + $0x9d0] sm:$0xff]  ;;  %v6263_v49 = vcombine.low %v320_v30, %v324_v33 }
 0x17a   :  { %3560 = vmatprep.subr.bf16.mxu0 %v6184_v43  ;;  %3603 = vmatprep.subr.bf16.mxu1 %v6312_v44  ;;  %v444_v42 = vld [vmem:[#allocation5 + $0x9f0] sm:$0xff] }
 0x17b   :  { %v568_v43 = vld [vmem:[#allocation5 + $0xdd0] sm:$0xff]  ;;  %v6384_v50 = vcombine.high %v440_v41, %v444_v42  ;;  %v6383_v56 = vcombine.low %v440_v41, %v444_v42 }
 0x17c   :  { %v572_v44 = vld [vmem:[#allocation5 + $0xdf0] sm:$0xff] }
 0x17d   :  { %3561 = vmatpush2.bf16.msra.mxu0 %v6183_v52  ;;  %3604 = vmatpush2.bf16.msra.mxu1 %v6311_v53  ;;  %v6512_v51 = vcombine.high %v568_v43, %v572_v44  ;;  %v432_v52 = vld [vmem:[#allocation5 + $0x990] sm:$0xff]  ;;  %v6511_v59 = vcombine.low %v568_v43, %v572_v44 }
 0x17e   :  { %3562 = vmatprep.subr.bf16.mxu0 %v6176_v54  ;;  %3605 = vmatprep.subr.bf16.mxu1 %v6304_v55  ;;  %v436_v53 = vld [vmem:[#allocation5 + $0x9b0] sm:$0xff] }
 0x17f   :  { %v560_v54 = vld [vmem:[#allocation5 + $0xd90] sm:$0xff]  ;;  %v6376_v60 = vcombine.high %v432_v52, %v436_v53 }
 0x180   :  { %v564_v55 = vld [vmem:[#allocation5 + $0xdb0] sm:$0xff] }
 0x181   :  { %3563 = vmatpush2.bf16.msra.mxu0 %v6175_v61  ;;  %3606 = vmatpush2.bf16.msra.mxu1 %v6303_v62  ;;  %v7584_v61 = vpop.f32.mrf.mxu1  ;;  %v6504_v62 = vcombine.high %v560_v54, %v564_v55  ;;  %v552_v3 = vld [vmem:[#allocation5 + $0xd50] sm:$0xff] }
 0x182   :  { %3564 = vmatprep.subr.bf16.mxu0 %v6168_v0  ;;  %3607 = vmatprep.subr.bf16.mxu1 %v6296_v1  ;;  %v424_v0 = vld [vmem:[#allocation5 + $0x950] sm:$0xff] }
 0x183   :  { %v428_v1 = vld [vmem:[#allocation5 + $0x970] sm:$0xff] }
 0x184   :  { %v556_v4 = vld [vmem:[#allocation5 + $0xd70] sm:$0xff]  ;;  %v6368_v10 = vcombine.high %v424_v0, %v428_v1  ;;  %v6367_v19 = vcombine.low %v424_v0, %v428_v1 }
 0x185   :  { %3565 = vmatpush2.bf16.msra.mxu0 %v6167_v6  ;;  %3608 = vmatpush2.bf16.msra.mxu1 %v6295_v7  ;;  %v6375_v7 = vcombine.low %v432_v52, %v436_v53  ;;  %v6496_v13 = vcombine.high %v552_v3, %v556_v4  ;;  %v6495_v22 = vcombine.low %v552_v3, %v556_v4  ;;  %v412_v28 = vld [vmem:[#allocation5 + $0x8f0] sm:$0xff] }
 0x186   :  { %3566 = vmatprep.subr.bf16.mxu0 %v6160_v8  ;;  %3609 = vmatprep.subr.bf16.mxu1 %v6288_v9  ;;  %v6503_v9 = vcombine.low %v560_v54, %v564_v55  ;;  %v536_v29 = vld [vmem:[#allocation5 + $0xcd0] sm:$0xff] }
 0x187   :  { %v540_v30 = vld [vmem:[#allocation5 + $0xcf0] sm:$0xff] }
 0x188   :  { %v404_v41 = vld [vmem:[#allocation5 + $0x8b0] sm:$0xff] }
 0x189   :  { %3567 = vmatpush2.bf16.msra.mxu0 %v6159_v14  ;;  %3610 = vmatpush2.bf16.msra.mxu1 %v6287_v15  ;;  %v416_v14 = vld [vmem:[#allocation5 + $0x910] sm:$0xff] }
 0x18a   :  { %3568 = vmatprep.subr.bf16.mxu0 %v6152_v16  ;;  %3611 = vmatprep.subr.bf16.mxu1 %v6280_v17  ;;  %v420_v15 = vld [vmem:[#allocation5 + $0x930] sm:$0xff] }
 0x18b   :  { %v544_v16 = vld [vmem:[#allocation5 + $0xd10] sm:$0xff] }
 0x18c   :  { %v548_v17 = vld [vmem:[#allocation5 + $0xd30] sm:$0xff] }
 0x18d   :  { %3569 = vmatpush2.bf16.msra.mxu0 %v6151_v23  ;;  %3612 = vmatpush2.bf16.msra.mxu1 %v6279_v24  ;;  %v6360_v23 = vcombine.high %v416_v14, %v420_v15  ;;  %v528_v42 = vld [vmem:[#allocation5 + $0xc90] sm:$0xff] }
 0x18e   :  { %3570 = vmatprep.subr.bf16.mxu0 %v6144_v26  ;;  %3613 = vmatprep.subr.bf16.mxu1 %v6272_v27  ;;  %v6488_v26 = vcombine.high %v544_v16, %v548_v17  ;;  %v408_v27 = vld [vmem:[#allocation5 + $0x8d0] sm:$0xff] }
 0x18f   :  { %v532_v43 = vld [vmem:[#allocation5 + $0xcb0] sm:$0xff]  ;;  %v6351_v44 = vcombine.low %v408_v27, %v412_v28 }
 0x190   :  { %v396_v52 = vld [vmem:[#allocation5 + $0x870] sm:$0xff] }
 0x191   :  { %3571 = vmatpush2.bf16.msra.mxu0 %v6143_v35  ;;  %3614 = vmatpush2.bf16.msra.mxu1 %v6271_v38  ;;  %v6359_v35 = vcombine.low %v416_v14, %v420_v15  ;;  %v6352_v38 = vcombine.high %v408_v27, %v412_v28  ;;  %v520_v53 = vld [vmem:[#allocation5 + $0xc50] sm:$0xff] }
 0x192   :  { %3572 = vmatprep.subr.bf16.mxu0 %v6136_v39  ;;  %3615 = vmatprep.subr.bf16.mxu1 %v6264_v40  ;;  %v6480_v39 = vcombine.high %v536_v29, %v540_v30  ;;  %v400_v40 = vld [vmem:[#allocation5 + $0x890] sm:$0xff] }
 0x193   :  { %v524_v54 = vld [vmem:[#allocation5 + $0xc70] sm:$0xff]  ;;  %v6343_v55 = vcombine.low %v400_v40, %v404_v41 }
 0x194   :  { %v388_v0 = vld [vmem:[#allocation5 + $0x830] sm:$0xff]  ;;  %v6463_v4 = vcombine.low %v520_v53, %v524_v54 }
 0x195   :  { %3573 = vmatpush2.bf16.msra.mxu0 %v6135_v45  ;;  %3616 = vmatpush2.bf16.msra.mxu1 %v6263_v49  ;;  %v6479_v45 = vcombine.low %v536_v29, %v540_v30  ;;  %v6344_v49 = vcombine.high %v400_v40, %v404_v41  ;;  %v512_v1 = vld [vmem:[#allocation5 + $0xc10] sm:$0xff] }
 0x196   :  { %3628 = vmatprep.subr.bf16.mxu0 %v6384_v50  ;;  %3671 = vmatprep.subr.bf16.mxu1 %v6512_v51  ;;  %v6472_v50 = vcombine.high %v528_v42, %v532_v43  ;;  %v392_v51 = vld [vmem:[#allocation5 + $0x850] sm:$0xff] }
 0x197   :  { %v6335_v3 = vcombine.low %v392_v51, %v396_v52  ;;  %v492_v27 = vld [vmem:[#allocation5 + $0xb70] sm:$0xff] }
 0x198   :  { %v3318_v2 = vpop.f32.mrf.mxu0  ;;  %3575 = vmatmul.mubr.bf16.vlgmr.msra.gmra.mxu0 %v7546_v21  ;;  %v3361_v6 = vpop.f32.mrf.mxu1  ;;  %3618 = vmatmul.mubr.bf16.vlgmr.msra.gmra.mxu1 %v7548_v25  ;;  %v616_v28 = vld [vmem:[#allocation5 + $0xf50] sm:$0xff] }
 0x199   :  { %v3319_v5 = vadd.f32 %v3318_v2, %v7572_v31  ;;  %3629 = vmatpush1.bf16.msra.mxu0 %v6383_v56  ;;  %3672 = vmatpush1.bf16.msra.mxu1 %v6511_v59  ;;  %v6471_v56 = vcombine.low %v528_v42, %v532_v43  ;;  %v6336_v59 = vcombine.high %v392_v51, %v396_v52  ;;  %v516_v2 = vld [vmem:[#allocation5 + $0xc30] sm:$0xff] }
 0x19a   :  { %v7589_v8 = vpop.f32.mrf.mxu0  ;;  %3630 = vmatprep.subr.bf16.mxu0 %v6376_v60  ;;  %v7591_v12 = vpop.f32.mrf.mxu1  ;;  %3673 = vmatprep.subr.bf16.mxu1 %v6504_v62  ;;  %v6464_v60 = vcombine.high %v520_v53, %v524_v54  ;;  %v384_v62 = vld [vmem:[#allocation5 + $0x810] sm:$0xff]  ;;  %v6455_v14 = vcombine.low %v512_v1, %v516_v2 }
 0x19b   :  { %v3362_v11 = vadd.f32 %v3361_v6, %v3319_v5  ;;  %3660 = vmatprep.mubr.bf16.mxu0 %v7550_v34  ;;  %3703 = vmatprep.mubr.bf16.mxu1 %v7553_v37  ;;  %v6328_v5 = vcombine.high %v384_v62, %v388_v0  ;;  %v6456_v6 = vcombine.high %v512_v1, %v516_v2  ;;  %v620_v29 = vld [vmem:[#allocation5 + $0xf70] sm:$0xff] }
 0x19c   :  { %v3322_v31 = vpop.f32.mrf.mxu0  ;;  %v3365_v20 = vpop.f32.mrf.mxu1  ;;  %v484_v40 = vld [vmem:[#allocation5 + $0xb30] sm:$0xff] }
 0x19d   :  { %v3323_v18 = vadd.f32 %v3322_v31, %v7580_v48  ;;  %3631 = vmatpush1.bf16.msra.mxu0 %v6375_v7  ;;  %3674 = vmatpush1.bf16.msra.mxu1 %v6503_v9  ;;  %v6487_v48 = vcombine.low %v544_v16, %v548_v17  ;;  %v504_v7 = vld [vmem:[#allocation5 + $0xbd0] sm:$0xff] }
 0x19e   :  { %3632 = vmatprep.subr.bf16.mxu0 %v6368_v10  ;;  %3675 = vmatprep.subr.bf16.mxu1 %v6496_v13  ;;  %v508_v9 = vld [vmem:[#allocation5 + $0xbf0] sm:$0xff]  ;;  %v6327_v13 = vcombine.low %v384_v62, %v388_v0 }
 0x19f   :  { %v3366_v24 = vadd.f32 %v3365_v20, %v3323_v18  ;;  %v632_v10 = vld [vmem:[#allocation5 + $0xfd0] sm:$0xff]  ;;  %v6448_v15 = vcombine.high %v504_v7, %v508_v9  ;;  %v6447_v20 = vcombine.low %v504_v7, %v508_v9 }
 0x1a0   :  { %v496_v16 = vld [vmem:[#allocation5 + $0xb90] sm:$0xff] }
 0x1a1   :  { %v7596_v33 = vpack.c.bf16 %v3366_v24, %v3362_v11  ;;  %3633 = vmatpush1.bf16.msra.mxu0 %v6367_v19  ;;  %3676 = vmatpush1.bf16.msra.mxu1 %v6495_v22  ;;  %v636_v11 = vld [vmem:[#allocation5 + $0xff0] sm:$0xff] }
 0x1a2   :  { %3634 = vmatprep.subr.bf16.mxu0 %v6360_v23  ;;  %3677 = vmatprep.subr.bf16.mxu1 %v6488_v26  ;;  %v6576_v31 = vcombine.high %v632_v10, %v636_v11  ;;  %v500_v17 = vld [vmem:[#allocation5 + $0xbb0] sm:$0xff]  ;;  %v6575_v22 = vcombine.low %v632_v10, %v636_v11 }
 0x1a3   :  { %v624_v18 = vld [vmem:[#allocation5 + $0xf90] sm:$0xff]  ;;  %v6440_v23 = vcombine.high %v496_v16, %v500_v17  ;;  %v6439_v30 = vcombine.low %v496_v16, %v500_v17 }
 0x1a4   :  { %v628_v19 = vld [vmem:[#allocation5 + $0xfb0] sm:$0xff] }
 0x1a5   :  { %3635 = vmatpush1.bf16.msra.mxu0 %v6359_v35  ;;  %3678 = vmatpush1.bf16.msra.mxu1 %v6487_v48  ;;  %v6568_v24 = vcombine.high %v624_v18, %v628_v19  ;;  %v488_v26 = vld [vmem:[#allocation5 + $0xb50] sm:$0xff]  ;;  %v6567_v35 = vcombine.low %v624_v18, %v628_v19 }
 0x1a6   :  { %3636 = vmatprep.subr.bf16.mxu0 %v6352_v38  ;;  %3679 = vmatprep.subr.bf16.mxu1 %v6480_v39  ;;  %v6432_v48 = vcombine.high %v488_v26, %v492_v27  ;;  %v6560_v38 = vcombine.high %v616_v28, %v620_v29  ;;  %v480_v39 = vld [vmem:[#allocation5 + $0xb10] sm:$0xff]  ;;  %v6431_v43 = vcombine.low %v488_v26, %v492_v27  ;;  %v189_v26 = vld [vmem:[#allocation5 + $0x1f8] sm:$0xff] }
 0x1a7   :  { %v608_v41 = vld [vmem:[#allocation5 + $0xf10] sm:$0xff]  ;;  %v6423_v54 = vcombine.low %v480_v39, %v484_v40  ;;  %v313_v27 = vld [vmem:[#allocation5 + $0x5d8] sm:$0xff] }
 0x1a8   :  { %v612_v42 = vld [vmem:[#allocation5 + $0xf30] sm:$0xff] }
 0x1a9   :  { %3637 = vmatpush1.bf16.msra.mxu0 %v6351_v44  ;;  %3680 = vmatpush1.bf16.msra.mxu1 %v6479_v45  ;;  %v6559_v44 = vcombine.low %v616_v28, %v620_v29  ;;  %v6424_v45 = vcombine.high %v480_v39, %v484_v40  ;;  %v476_v51 = vld [vmem:[#allocation5 + $0xaf0] sm:$0xff]  ;;  %v317_v28 = vld [vmem:[#allocation5 + $0x5f8] sm:$0xff] }
 0x1aa   :  { %3638 = vmatprep.subr.bf16.mxu0 %v6344_v49  ;;  %3681 = vmatprep.subr.bf16.mxu1 %v6472_v50  ;;  %v6552_v49 = vcombine.high %v608_v41, %v612_v42  ;;  %v472_v50 = vld [vmem:[#allocation5 + $0xad0] sm:$0xff]  ;;  %v181_v39 = vld [vmem:[#allocation5 + $0x1b8] sm:$0xff] }
 0x1ab   :  { %v600_v52 = vld [vmem:[#allocation5 + $0xed0] sm:$0xff]  ;;  %v6415_v2 = vcombine.low %v472_v50, %v476_v51  ;;  %v305_v40 = vld [vmem:[#allocation5 + $0x598] sm:$0xff] }
 0x1ac   :  { %v604_v53 = vld [vmem:[#allocation5 + $0xef0] sm:$0xff] }
 0x1ad   :  { %3639 = vmatpush1.bf16.msra.mxu0 %v6343_v55  ;;  %3682 = vmatpush1.bf16.msra.mxu1 %v6471_v56  ;;  %v6551_v55 = vcombine.low %v608_v41, %v612_v42  ;;  %v6416_v56 = vcombine.high %v472_v50, %v476_v51  ;;  %v468_v62 = vld [vmem:[#allocation5 + $0xab0] sm:$0xff]  ;;  %v309_v41 = vld [vmem:[#allocation5 + $0x5b8] sm:$0xff] }
 0x1ae   :  { %3640 = vmatprep.subr.bf16.mxu0 %v6336_v59  ;;  %3683 = vmatprep.subr.bf16.mxu1 %v6464_v60  ;;  %v6544_v59 = vcombine.high %v600_v52, %v604_v53  ;;  %v464_v60 = vld [vmem:[#allocation5 + $0xa90] sm:$0xff]  ;;  %v6250_v50 = vcombine.high %v305_v40, %v309_v41  ;;  %v169_v51 = vld [vmem:[#allocation5 + $0x158] sm:$0xff] }
 0x1af   :  { %v592_v0 = vld [vmem:[#allocation5 + $0xe90] sm:$0xff]  ;;  %v6407_v11 = vcombine.low %v464_v60, %v468_v62 }
 0x1b0   :  { %v596_v1 = vld [vmem:[#allocation5 + $0xeb0] sm:$0xff] }
 0x1b1   :  { %3641 = vmatpush1.bf16.msra.mxu0 %v6335_v3  ;;  %3684 = vmatpush1.bf16.msra.mxu1 %v6463_v4  ;;  %v6543_v3 = vcombine.low %v600_v52, %v604_v53  ;;  %v6408_v4 = vcombine.high %v464_v60, %v468_v62  ;;  %v460_v7 = vld [vmem:[#allocation5 + $0xa70] sm:$0xff]  ;;  %v173_v52 = vld [vmem:[#allocation5 + $0x178] sm:$0xff] }
 0x1b2   :  { %3642 = vmatprep.subr.bf16.mxu0 %v6328_v5  ;;  %3685 = vmatprep.subr.bf16.mxu1 %v6456_v6  ;;  %v6536_v5 = vcombine.high %v592_v0, %v596_v1  ;;  %v456_v6 = vld [vmem:[#allocation5 + $0xa50] sm:$0xff] }
 0x1b3   :  { %v584_v9 = vld [vmem:[#allocation5 + $0xe50] sm:$0xff]  ;;  %v6399_v19 = vcombine.low %v456_v6, %v460_v7 }
 0x1b4   :  { %v588_v10 = vld [vmem:[#allocation5 + $0xe70] sm:$0xff] }
 0x1b5   :  { %3643 = vmatpush1.bf16.msra.mxu0 %v6327_v13  ;;  %3686 = vmatpush1.bf16.msra.mxu1 %v6455_v14  ;;  %v6535_v13 = vcombine.low %v592_v0, %v596_v1  ;;  %v6400_v14 = vcombine.high %v456_v6, %v460_v7  ;;  %v452_v16 = vld [vmem:[#allocation5 + $0xa30] sm:$0xff]  ;;  %v6249_v0 = vcombine.low %v305_v40, %v309_v41  ;;  %v289_v7 = vld [vmem:[#allocation5 + $0x518] sm:$0xff] }
 0x1b6   :  { %3644 = vmatprep.subr.bf16.mxu0 %v6448_v15  ;;  %3687 = vmatprep.subr.bf16.mxu1 %v6576_v31  ;;  %v6528_v15 = vcombine.high %v584_v9, %v588_v10  ;;  %v448_v31 = vld [vmem:[#allocation5 + $0xa10] sm:$0xff]  ;;  %v6114_v1 = vcombine.high %v169_v51, %v173_v52  ;;  %v269_v40 = vld [vmem:[#allocation5 + $0x478] sm:$0xff] }
 0x1b7   :  { %v576_v17 = vld [vmem:[#allocation5 + $0xe10] sm:$0xff]  ;;  %v6391_v29 = vcombine.low %v448_v31, %v452_v16 }
 0x1b8   :  { %v580_v18 = vld [vmem:[#allocation5 + $0xe30] sm:$0xff] }
 0x1b9   :  { %3645 = vmatpush2.bf16.msra.mxu0 %v6447_v20  ;;  %3688 = vmatpush2.bf16.msra.mxu1 %v6575_v22  ;;  %v6527_v20 = vcombine.low %v584_v9, %v588_v10  ;;  %v6392_v22 = vcombine.high %v448_v31, %v452_v16  ;;  %v293_v9 = vld [vmem:[#allocation5 + $0x538] sm:$0xff] }
 0x1ba   :  { %3646 = vmatprep.subr.bf16.mxu0 %v6440_v23  ;;  %3689 = vmatprep.subr.bf16.mxu1 %v6568_v24  ;;  %v6520_v23 = vcombine.high %v576_v17, %v580_v18  ;;  %v185_v24 = vld [vmem:[#allocation5 + $0x1d8] sm:$0xff]  ;;  %v6234_v31 = vcombine.high %v289_v7, %v293_v9 }
 0x1bb   :  { %v6129_v42 = vcombine.low %v185_v24, %v189_v26  ;;  %v153_v16 = vld [vmem:[#allocation5 + $0xd8] sm:$0xff] }
 0x1bd   :  { %3647 = vmatpush2.bf16.msra.mxu0 %v6439_v30  ;;  %3690 = vmatpush2.bf16.msra.mxu1 %v6567_v35  ;;  %v6519_v30 = vcombine.low %v576_v17, %v580_v18  ;;  %v6130_v35 = vcombine.high %v185_v24, %v189_v26  ;;  %v157_v17 = vld [vmem:[#allocation5 + $0xf8] sm:$0xff] }
 0x1be   :  { %3648 = vmatprep.subr.bf16.mxu0 %v6432_v48  ;;  %3691 = vmatprep.subr.bf16.mxu1 %v6560_v38  ;;  %v6258_v48 = vcombine.high %v313_v27, %v317_v28  ;;  %v177_v38 = vld [vmem:[#allocation5 + $0x198] sm:$0xff] }
 0x1bf   :  { %v281_v18 = vld [vmem:[#allocation5 + $0x4d8] sm:$0xff] }
 0x1c0   :  { %v149_v24 = vld [vmem:[#allocation5 + $0xb8] sm:$0xff] }
 0x1c1   :  { %3649 = vmatpush2.bf16.msra.mxu0 %v6431_v43  ;;  %3692 = vmatpush2.bf16.msra.mxu1 %v6559_v44  ;;  %v7598_v43 = vpop.f32.mrf.mxu0  ;;  %v6257_v44 = vcombine.low %v313_v27, %v317_v28  ;;  %v273_v26 = vld [vmem:[#allocation5 + $0x498] sm:$0xff]  ;;  %v6097_v28 = vcombine.low %v153_v16, %v157_v17 }
 0x1c2   :  { %3650 = vmatprep.subr.bf16.mxu0 %v6424_v45  ;;  %3693 = vmatprep.subr.bf16.mxu1 %v6552_v49  ;;  %v6122_v45 = vcombine.high %v177_v38, %v181_v39  ;;  %v7600_v49 = vpop.f32.mrf.mxu1  ;;  %v277_v27 = vld [vmem:[#allocation5 + $0x4b8] sm:$0xff] }
 0x1c5   :  { %3651 = vmatpush2.bf16.msra.mxu0 %v6423_v54  ;;  %3694 = vmatpush2.bf16.msra.mxu1 %v6551_v55  ;;  %v297_v54 = vld [vmem:[#allocation5 + $0x558] sm:$0xff] }
 0x1c6   :  { %3652 = vmatprep.subr.bf16.mxu0 %v6416_v56  ;;  %3695 = vmatprep.subr.bf16.mxu1 %v6544_v59  ;;  %v301_v55 = vld [vmem:[#allocation5 + $0x578] sm:$0xff]  ;;  %v6121_v59 = vcombine.low %v177_v38, %v181_v39 }
 0x1c7   :  { %v141_v38 = vld [vmem:[#allocation5 + $0x78] sm:$0xff] }
 0x1c8   :  { %v265_v39 = vld [vmem:[#allocation5 + $0x458] sm:$0xff] }
 0x1c9   :  { %3653 = vmatpush2.bf16.msra.mxu0 %v6415_v2  ;;  %3696 = vmatpush2.bf16.msra.mxu1 %v6543_v3  ;;  %v6242_v3 = vcombine.high %v297_v54, %v301_v55 }
 0x1ca   :  { %3654 = vmatprep.subr.bf16.mxu0 %v6408_v4  ;;  %3697 = vmatprep.subr.bf16.mxu1 %v6536_v5  ;;  %v161_v4 = vld [vmem:[#allocation5 + $0x118] sm:$0xff] }
 0x1cb   :  { %v165_v5 = vld [vmem:[#allocation5 + $0x138] sm:$0xff] }
 0x1cd   :  { %3655 = vmatpush2.bf16.msra.mxu0 %v6407_v11  ;;  %3698 = vmatpush2.bf16.msra.mxu1 %v6535_v13  ;;  %v6113_v11 = vcombine.low %v169_v51, %v173_v52  ;;  %v133_v51 = vld [vmem:[#allocation5 + $0x38] sm:$0xff] }
 0x1ce   :  { %3656 = vmatprep.subr.bf16.mxu0 %v6400_v14  ;;  %3699 = vmatprep.subr.bf16.mxu1 %v6528_v15  ;;  %v6241_v14 = vcombine.low %v297_v54, %v301_v55  ;;  %v6106_v15 = vcombine.high %v161_v4, %v165_v5  ;;  %v257_v52 = vld [vmem:[#allocation5 + $0x418] sm:$0xff]  ;;  %v6209_v55 = vcombine.low %v265_v39, %v269_v40 }
 0x1d1   :  { %3657 = vmatpush2.bf16.msra.mxu0 %v6399_v19  ;;  %3700 = vmatpush2.bf16.msra.mxu1 %v6527_v20  ;;  %v6105_v19 = vcombine.low %v161_v4, %v165_v5  ;;  %v6098_v20 = vcombine.high %v153_v16, %v157_v17  ;;  %v381_v4 = vld [vmem:[#allocation5 + $0x7f8] sm:$0xff] }
 0x1d2   :  { %3658 = vmatprep.subr.bf16.mxu0 %v6392_v22  ;;  %3701 = vmatprep.subr.bf16.mxu1 %v6520_v23  ;;  %v145_v23 = vld [vmem:[#allocation5 + $0x98] sm:$0xff] }
 0x1d3   :  { %v6089_v41 = vcombine.low %v145_v23, %v149_v24 }
 0x1d5   :  { %3659 = vmatpush2.bf16.msra.mxu0 %v6391_v29  ;;  %3702 = vmatpush2.bf16.msra.mxu1 %v6519_v30  ;;  %v6090_v30 = vcombine.high %v145_v23, %v149_v24 }
 0x1d6   :  { %3714 = vmatprep.subr.bf16.mxu0 %v6130_v35  ;;  %3757 = vmatprep.subr.bf16.mxu1 %v6258_v48  ;;  %v6218_v35 = vcombine.high %v273_v26, %v277_v27  ;;  %v137_v48 = vld [vmem:[#allocation5 + $0x58] sm:$0xff] }
 0x1d7   :  { %v6081_v54 = vcombine.low %v137_v48, %v141_v38 }
 0x1d8   :  { %v3404_v53 = vpop.f32.mrf.mxu0  ;;  %3661 = vmatmul.mubr.bf16.vlgmr.msra.gmra.mxu0 %v7558_v46  ;;  %v3447_v56 = vpop.f32.mrf.mxu1  ;;  %3704 = vmatmul.mubr.bf16.vlgmr.msra.gmra.mxu1 %v7560_v47 }
 0x1d9   :  { %3715 = vmatpush1.bf16.msra.mxu0 %v6129_v42  ;;  %v7604_v60 = vadd.f32 %v3447_v56, %v3404_v53  ;;  %3758 = vmatpush1.bf16.msra.mxu1 %v6257_v44  ;;  %v6217_v42 = vcombine.low %v273_v26, %v277_v27  ;;  %v6082_v44 = vcombine.high %v137_v48, %v141_v38  ;;  %v261_v53 = vld [vmem:[#allocation5 + $0x438] sm:$0xff] }
 0x1da   :  { %v7606_v62 = vpop.f32.mrf.mxu0  ;;  %3716 = vmatprep.subr.bf16.mxu0 %v6122_v45  ;;  %v7608_v2 = vpop.f32.mrf.mxu1  ;;  %3759 = vmatprep.subr.bf16.mxu1 %v6250_v50  ;;  %v6210_v45 = vcombine.high %v265_v39, %v269_v40  ;;  %v129_v50 = vld [vmem:[#allocation5 + $0x18] sm:$0xff] }
 0x1db   :  { %3746 = vmatprep.mubr.bf16.mxu0 %v7540_v58  ;;  %3789 = vmatprep.mubr.bf16.mxu1 %v7542_v63  ;;  %v285_v58 = vld [vmem:[#allocation5 + $0x4f8] sm:$0xff]  ;;  %v6233_v63 = vcombine.low %v289_v7, %v293_v9  ;;  %v6074_v56 = vcombine.high %v129_v50, %v133_v51  ;;  %v6073_v5 = vcombine.low %v129_v50, %v133_v51 }
 0x1dc   :  { %v3408_v6 = vpop.f32.mrf.mxu0  ;;  %v3451_v10 = vpop.f32.mrf.mxu1  ;;  %v6226_v22 = vcombine.high %v281_v18, %v285_v58  ;;  %v6225_v29 = vcombine.low %v281_v18, %v285_v58  ;;  %v233_v58 = vld [vmem:[#allocation5 + $0x358] sm:$0xff] }
 0x1dd   :  { %3717 = vmatpush1.bf16.msra.mxu0 %v6121_v59  ;;  %v7612_v13 = vadd.f32 %v3451_v10, %v3408_v6  ;;  %3760 = vmatpush1.bf16.msra.mxu1 %v6249_v0  ;;  %v6202_v59 = vcombine.high %v257_v52, %v261_v53  ;;  %v249_v0 = vld [vmem:[#allocation5 + $0x3d8] sm:$0xff]  ;;  %v6201_v6 = vcombine.low %v257_v52, %v261_v53 }
 0x1de   :  { %3718 = vmatprep.subr.bf16.mxu0 %v6114_v1  ;;  %3761 = vmatprep.subr.bf16.mxu1 %v6242_v3  ;;  %v253_v1 = vld [vmem:[#allocation5 + $0x3f8] sm:$0xff] }
 0x1df   :  { %v377_v3 = vld [vmem:[#allocation5 + $0x7d8] sm:$0xff]  ;;  %v6194_v7 = vcombine.high %v249_v0, %v253_v1 }
 0x1e0   :  { %v6322_v9 = vcombine.high %v377_v3, %v381_v4  ;;  %v241_v10 = vld [vmem:[#allocation5 + $0x398] sm:$0xff]  ;;  %v6321_v16 = vcombine.low %v377_v3, %v381_v4 }
 0x1e1   :  { %3719 = vmatpush1.bf16.msra.mxu0 %v6113_v11  ;;  %3762 = vmatpush1.bf16.msra.mxu1 %v6241_v14  ;;  %v245_v11 = vld [vmem:[#allocation5 + $0x3b8] sm:$0xff] }
 0x1e2   :  { %3720 = vmatprep.subr.bf16.mxu0 %v6106_v15  ;;  %3763 = vmatprep.subr.bf16.mxu1 %v6234_v31  ;;  %v369_v14 = vld [vmem:[#allocation5 + $0x798] sm:$0xff]  ;;  %v6193_v31 = vcombine.low %v249_v0, %v253_v1  ;;  %v6186_v17 = vcombine.high %v241_v10, %v245_v11 }
 0x1e3   :  { %v373_v15 = vld [vmem:[#allocation5 + $0x7b8] sm:$0xff] }
 0x1e4   :  { %v6314_v18 = vcombine.high %v369_v14, %v373_v15  ;;  %v6313_v23 = vcombine.low %v369_v14, %v373_v15  ;;  %v225_v27 = vld [vmem:[#allocation5 + $0x318] sm:$0xff] }
 0x1e5   :  { %3721 = vmatpush1.bf16.msra.mxu0 %v6105_v19  ;;  %3764 = vmatpush1.bf16.msra.mxu1 %v6233_v63  ;;  %v237_v19 = vld [vmem:[#allocation5 + $0x378] sm:$0xff] }
 0x1e6   :  { %3722 = vmatprep.subr.bf16.mxu0 %v6098_v20  ;;  %3765 = vmatprep.subr.bf16.mxu1 %v6226_v22  ;;  %v361_v63 = vld [vmem:[#allocation5 + $0x758] sm:$0xff]  ;;  %v6185_v22 = vcombine.low %v241_v10, %v245_v11  ;;  %v6178_v24 = vcombine.high %v233_v58, %v237_v19 }
 0x1e7   :  { %v365_v20 = vld [vmem:[#allocation5 + $0x778] sm:$0xff] }
 0x1e8   :  { %v6306_v26 = vcombine.high %v361_v63, %v365_v20  ;;  %v6305_v48 = vcombine.low %v361_v63, %v365_v20  ;;  %v217_v40 = vld [vmem:[#allocation5 + $0x2d8] sm:$0xff] }
 0x1e9   :  { %3723 = vmatpush1.bf16.msra.mxu0 %v6097_v28  ;;  %3766 = vmatpush1.bf16.msra.mxu1 %v6225_v29  ;;  %v229_v28 = vld [vmem:[#allocation5 + $0x338] sm:$0xff] }
 0x1ea   :  { %3724 = vmatprep.subr.bf16.mxu0 %v6090_v30  ;;  %3767 = vmatprep.subr.bf16.mxu1 %v6218_v35  ;;  %v353_v29 = vld [vmem:[#allocation5 + $0x718] sm:$0xff]  ;;  %v6177_v35 = vcombine.low %v233_v58, %v237_v19  ;;  %v6170_v38 = vcombine.high %v225_v27, %v229_v28 }
 0x1eb   :  { %v357_v30 = vld [vmem:[#allocation5 + $0x738] sm:$0xff] }
 0x1ec   :  { %v6298_v39 = vcombine.high %v353_v29, %v357_v30  ;;  %v6297_v50 = vcombine.low %v353_v29, %v357_v30  ;;  %v209_v53 = vld [vmem:[#allocation5 + $0x298] sm:$0xff] }
 0x1ed   :  { %3725 = vmatpush1.bf16.msra.mxu0 %v6089_v41  ;;  %3768 = vmatpush1.bf16.msra.mxu1 %v6217_v42  ;;  %v221_v41 = vld [vmem:[#allocation5 + $0x2f8] sm:$0xff] }
 0x1ee   :  { %3726 = vmatprep.subr.bf16.mxu0 %v6082_v44  ;;  %3769 = vmatprep.subr.bf16.mxu1 %v6210_v45  ;;  %v345_v42 = vld [vmem:[#allocation5 + $0x6d8] sm:$0xff]  ;;  %v6169_v45 = vcombine.low %v225_v27, %v229_v28  ;;  %v6162_v51 = vcombine.high %v217_v40, %v221_v41 }
 0x1ef   :  { %v349_v44 = vld [vmem:[#allocation5 + $0x6f8] sm:$0xff] }
 0x1f0   :  { %v6290_v52 = vcombine.high %v345_v42, %v349_v44  ;;  %v6289_v0 = vcombine.low %v345_v42, %v349_v44  ;;  %v201_v4 = vld [vmem:[#allocation5 + $0x258] sm:$0xff]  ;;  %v7616_v44 = vpop.f32.mrf.mxu1 }
 0x1f1   :  { %3727 = vmatpush1.bf16.msra.mxu0 %v6081_v54  ;;  %3770 = vmatpush1.bf16.msra.mxu1 %v6209_v55  ;;  %v213_v54 = vld [vmem:[#allocation5 + $0x2b8] sm:$0xff] }
 0x1f2   :  { %3728 = vmatprep.subr.bf16.mxu0 %v6074_v56  ;;  %3771 = vmatprep.subr.bf16.mxu1 %v6202_v59  ;;  %v337_v55 = vld [vmem:[#allocation5 + $0x698] sm:$0xff]  ;;  %v6161_v59 = vcombine.low %v217_v40, %v221_v41  ;;  %v6154_v1 = vcombine.high %v209_v53, %v213_v54  ;;  %v7614_v40 = vpop.f32.mrf.mxu0 }
 0x1f3   :  { %v341_v56 = vld [vmem:[#allocation5 + $0x6b8] sm:$0xff] }
 0x1f4   :  { %v6282_v3 = vcombine.high %v337_v55, %v341_v56  ;;  %v6281_v10 = vcombine.low %v337_v55, %v341_v56  ;;  %v193_v15 = vld [vmem:[#allocation5 + $0x218] sm:$0xff] }
 0x1f5   :  { %3729 = vmatpush1.bf16.msra.mxu0 %v6073_v5  ;;  %3772 = vmatpush1.bf16.msra.mxu1 %v6201_v6  ;;  %v205_v5 = vld [vmem:[#allocation5 + $0x278] sm:$0xff] }
 0x1f6   :  { %3730 = vmatprep.subr.bf16.mxu0 %v6194_v7  ;;  %3773 = vmatprep.subr.bf16.mxu1 %v6322_v9  ;;  %v329_v6 = vld [vmem:[#allocation5 + $0x658] sm:$0xff]  ;;  %v6153_v9 = vcombine.low %v209_v53, %v213_v54  ;;  %v6146_v11 = vcombine.high %v201_v4, %v205_v5 }
 0x1f7   :  { %v333_v7 = vld [vmem:[#allocation5 + $0x678] sm:$0xff] }
 0x1f8   :  { %v6274_v14 = vcombine.high %v329_v6, %v333_v7  ;;  %v6273_v58 = vcombine.low %v329_v6, %v333_v7  ;;  %v441_v20 = vld [vmem:[#allocation5 + $0x9d8] sm:$0xff] }
 0x1f9   :  { %3731 = vmatpush2.bf16.msra.mxu0 %v6193_v31  ;;  %3774 = vmatpush2.bf16.msra.mxu1 %v6321_v16  ;;  %v197_v31 = vld [vmem:[#allocation5 + $0x238] sm:$0xff] }
 0x1fa   :  { %3732 = vmatprep.subr.bf16.mxu0 %v6186_v17  ;;  %3775 = vmatprep.subr.bf16.mxu1 %v6314_v18  ;;  %v321_v16 = vld [vmem:[#allocation5 + $0x618] sm:$0xff]  ;;  %v6145_v18 = vcombine.low %v201_v4, %v205_v5  ;;  %v6138_v19 = vcombine.high %v193_v15, %v197_v31 }
 0x1fb   :  { %v325_v17 = vld [vmem:[#allocation5 + $0x638] sm:$0xff] }
 0x1fc   :  { %v6266_v63 = vcombine.high %v321_v16, %v325_v17  ;;  %v6265_v27 = vcombine.low %v321_v16, %v325_v17  ;;  %v433_v30 = vld [vmem:[#allocation5 + $0x998] sm:$0xff] }
 0x1fd   :  { %3733 = vmatpush2.bf16.msra.mxu0 %v6185_v22  ;;  %3776 = vmatpush2.bf16.msra.mxu1 %v6313_v23  ;;  %v445_v22 = vld [vmem:[#allocation5 + $0x9f8] sm:$0xff] }
 0x1fe   :  { %3734 = vmatprep.subr.bf16.mxu0 %v6178_v24  ;;  %3777 = vmatprep.subr.bf16.mxu1 %v6306_v26  ;;  %v569_v23 = vld [vmem:[#allocation5 + $0xdd8] sm:$0xff]  ;;  %v6137_v26 = vcombine.low %v193_v15, %v197_v31  ;;  %v6386_v28 = vcombine.high %v441_v20, %v445_v22 }
 0x1ff   :  { %v573_v24 = vld [vmem:[#allocation5 + $0xdf8] sm:$0xff] }
 0x200   :  { %v6514_v29 = vcombine.high %v569_v23, %v573_v24  ;;  %v6513_v41 = vcombine.low %v569_v23, %v573_v24  ;;  %v553_v53 = vld [vmem:[#allocation5 + $0xd58] sm:$0xff] }
 0x201   :  { %3735 = vmatpush2.bf16.msra.mxu0 %v6177_v35  ;;  %3778 = vmatpush2.bf16.msra.mxu1 %v6305_v48  ;;  %v437_v35 = vld [vmem:[#allocation5 + $0x9b8] sm:$0xff] }
 0x202   :  { %3736 = vmatprep.subr.bf16.mxu0 %v6170_v38  ;;  %3779 = vmatprep.subr.bf16.mxu1 %v6298_v39  ;;  %v561_v48 = vld [vmem:[#allocation5 + $0xd98] sm:$0xff]  ;;  %v6385_v39 = vcombine.low %v441_v20, %v445_v22  ;;  %v6378_v42 = vcombine.high %v433_v30, %v437_v35 }
 0x203   :  { %v565_v38 = vld [vmem:[#allocation5 + $0xdb8] sm:$0xff] }
 0x204   :  { %v557_v54 = vld [vmem:[#allocation5 + $0xd78] sm:$0xff] }
 0x205   :  { %3737 = vmatpush2.bf16.msra.mxu0 %v6169_v45  ;;  %3780 = vmatpush2.bf16.msra.mxu1 %v6297_v50  ;;  %v6506_v45 = vcombine.high %v561_v48, %v565_v38  ;;  %v425_v50 = vld [vmem:[#allocation5 + $0x958] sm:$0xff]  ;;  %v6497_v15 = vcombine.low %v553_v53, %v557_v54 }
 0x206   :  { %3738 = vmatprep.subr.bf16.mxu0 %v6162_v51  ;;  %3781 = vmatprep.subr.bf16.mxu1 %v6290_v52  ;;  %v429_v51 = vld [vmem:[#allocation5 + $0x978] sm:$0xff] }
 0x207   :  { %v417_v6 = vld [vmem:[#allocation5 + $0x918] sm:$0xff] }
 0x208   :  { %v421_v7 = vld [vmem:[#allocation5 + $0x938] sm:$0xff] }
 0x209   :  { %3739 = vmatpush2.bf16.msra.mxu0 %v6161_v59  ;;  %3782 = vmatpush2.bf16.msra.mxu1 %v6289_v0  ;;  %v6377_v59 = vcombine.low %v433_v30, %v437_v35  ;;  %v6362_v31 = vcombine.high %v417_v6, %v421_v7  ;;  %v401_v23 = vld [vmem:[#allocation5 + $0x898] sm:$0xff] }
 0x20a   :  { %3740 = vmatprep.subr.bf16.mxu0 %v6154_v1  ;;  %3783 = vmatprep.subr.bf16.mxu1 %v6282_v3  ;;  %v6505_v1 = vcombine.low %v561_v48, %v565_v38  ;;  %v6370_v3 = vcombine.high %v425_v50, %v429_v51  ;;  %v405_v24 = vld [vmem:[#allocation5 + $0x8b8] sm:$0xff] }
 0x20b   :  { %v6346_v30 = vcombine.high %v401_v23, %v405_v24  ;;  %v393_v48 = vld [vmem:[#allocation5 + $0x858] sm:$0xff] }
 0x20c   :  { %v397_v38 = vld [vmem:[#allocation5 + $0x878] sm:$0xff] }
 0x20d   :  { %3741 = vmatpush2.bf16.msra.mxu0 %v6153_v9  ;;  %3784 = vmatpush2.bf16.msra.mxu1 %v6281_v10  ;;  %v545_v9 = vld [vmem:[#allocation5 + $0xd18] sm:$0xff] }
 0x20e   :  { %3742 = vmatprep.subr.bf16.mxu0 %v6146_v11  ;;  %3785 = vmatprep.subr.bf16.mxu1 %v6274_v14  ;;  %v6369_v11 = vcombine.low %v425_v50, %v429_v51  ;;  %v6338_v50 = vcombine.high %v393_v48, %v397_v38 }
 0x211   :  { %3743 = vmatpush2.bf16.msra.mxu0 %v6145_v18  ;;  %3786 = vmatpush2.bf16.msra.mxu1 %v6273_v58  ;;  %v409_v18 = vld [vmem:[#allocation5 + $0x8d8] sm:$0xff] }
 0x212   :  { %3744 = vmatprep.subr.bf16.mxu0 %v6138_v19  ;;  %3787 = vmatprep.subr.bf16.mxu1 %v6266_v63  ;;  %v413_v58 = vld [vmem:[#allocation5 + $0x8f8] sm:$0xff] }
 0x213   :  { %v541_v19 = vld [vmem:[#allocation5 + $0xcf8] sm:$0xff]  ;;  %v6354_v20 = vcombine.high %v409_v18, %v413_v58 }
 0x215   :  { %3745 = vmatpush2.bf16.msra.mxu0 %v6137_v26  ;;  %3788 = vmatpush2.bf16.msra.mxu1 %v6265_v27  ;;  %v529_v26 = vld [vmem:[#allocation5 + $0xc98] sm:$0xff] }
 0x216   :  { %3800 = vmatprep.subr.bf16.mxu0 %v6386_v28  ;;  %3843 = vmatprep.subr.bf16.mxu1 %v6514_v29  ;;  %v533_v27 = vld [vmem:[#allocation5 + $0xcb8] sm:$0xff]  ;;  %v6353_v28 = vcombine.low %v409_v18, %v413_v58 }
 0x217   :  { %v6474_v35 = vcombine.high %v529_v26, %v533_v27 }
 0x218   :  { %v3490_v52 = vpop.f32.mrf.mxu0  ;;  %3747 = vmatmul.mubr.bf16.vlgmr.msra.gmra.mxu0 %v7546_v21  ;;  %v3533_v56 = vpop.f32.mrf.mxu1  ;;  %3790 = vmatmul.mubr.bf16.vlgmr.msra.gmra.mxu1 %v7548_v25  ;;  %v6498_v21 = vcombine.high %v553_v53, %v557_v54  ;;  %v549_v25 = vld [vmem:[#allocation5 + $0xd38] sm:$0xff] }
 0x219   :  { %v3491_v55 = vadd.f32 %v3490_v52, %v7604_v60  ;;  %3801 = vmatpush1.bf16.msra.mxu0 %v6385_v39  ;;  %3844 = vmatpush1.bf16.msra.mxu1 %v6513_v41  ;;  %v6490_v17 = vcombine.high %v545_v9, %v549_v25  ;;  %v521_v39 = vld [vmem:[#allocation5 + $0xc58] sm:$0xff] }
 0x21a   :  { %v7621_v0 = vpop.f32.mrf.mxu0  ;;  %3802 = vmatprep.subr.bf16.mxu0 %v6378_v42  ;;  %v7623_v5 = vpop.f32.mrf.mxu1  ;;  %3845 = vmatprep.subr.bf16.mxu1 %v6506_v45  ;;  %v525_v41 = vld [vmem:[#allocation5 + $0xc78] sm:$0xff]  ;;  %v6345_v42 = vcombine.low %v401_v23, %v405_v24  ;;  %v6473_v45 = vcombine.low %v529_v26, %v533_v27 }
 0x21b   :  { %v3534_v4 = vadd.f32 %v3533_v56, %v3491_v55  ;;  %3832 = vmatprep.mubr.bf16.mxu0 %v7550_v34  ;;  %3875 = vmatprep.mubr.bf16.mxu1 %v7553_v37  ;;  %v537_v34 = vld [vmem:[#allocation5 + $0xcd8] sm:$0xff]  ;;  %v6361_v37 = vcombine.low %v417_v6, %v421_v7  ;;  %v6466_v51 = vcombine.high %v521_v39, %v525_v41 }
 0x21c   :  { %v3494_v60 = vpop.f32.mrf.mxu0  ;;  %v3537_v14 = vpop.f32.mrf.mxu1  ;;  %v6482_v22 = vcombine.high %v537_v34, %v541_v19  ;;  %v6481_v29 = vcombine.low %v537_v34, %v541_v19  ;;  %v385_v52 = vld [vmem:[#allocation5 + $0x818] sm:$0xff]  ;;  %v6337_v56 = vcombine.low %v393_v48, %v397_v38 }
 0x21d   :  { %v3495_v10 = vadd.f32 %v3494_v60, %v7612_v13  ;;  %3803 = vmatpush1.bf16.msra.mxu0 %v6377_v59  ;;  %3846 = vmatpush1.bf16.msra.mxu1 %v6505_v1  ;;  %v6489_v13 = vcombine.low %v545_v9, %v549_v25  ;;  %v389_v53 = vld [vmem:[#allocation5 + $0x838] sm:$0xff]  ;;  %v6465_v59 = vcombine.low %v521_v39, %v525_v41 }
 0x21e   :  { %3804 = vmatprep.subr.bf16.mxu0 %v6370_v3  ;;  %3847 = vmatprep.subr.bf16.mxu1 %v6498_v21  ;;  %v513_v54 = vld [vmem:[#allocation5 + $0xc18] sm:$0xff]  ;;  %v6330_v1 = vcombine.high %v385_v52, %v389_v53  ;;  %v6329_v60 = vcombine.low %v385_v52, %v389_v53 }
 0x21f   :  { %v3538_v16 = vadd.f32 %v3537_v14, %v3495_v10  ;;  %v517_v55 = vld [vmem:[#allocation5 + $0xc38] sm:$0xff] }
 0x220   :  { %v6458_v3 = vcombine.high %v513_v54, %v517_v55  ;;  %v509_v21 = vld [vmem:[#allocation5 + $0xbf8] sm:$0xff]  ;;  %v6457_v9 = vcombine.low %v513_v54, %v517_v55 }
 0x221   :  { %v7628_v63 = vpack.c.bf16 %v3538_v16, %v3534_v4  ;;  %3805 = vmatpush1.bf16.msra.mxu0 %v6369_v11  ;;  %3848 = vmatpush1.bf16.msra.mxu1 %v6497_v15  ;;  %v505_v4 = vld [vmem:[#allocation5 + $0xbd8] sm:$0xff] }
 0x222   :  { %3806 = vmatprep.subr.bf16.mxu0 %v6362_v31  ;;  %3849 = vmatprep.subr.bf16.mxu1 %v6490_v17  ;;  %v633_v6 = vld [vmem:[#allocation5 + $0xfd8] sm:$0xff]  ;;  %v6450_v25 = vcombine.high %v505_v4, %v509_v21  ;;  %v6449_v16 = vcombine.low %v505_v4, %v509_v21 }
 0x223   :  { %v637_v7 = vld [vmem:[#allocation5 + $0xff8] sm:$0xff] }
 0x224   :  { %v6578_v10 = vcombine.high %v633_v6, %v637_v7  ;;  %v497_v11 = vld [vmem:[#allocation5 + $0xb98] sm:$0xff]  ;;  %v6577_v17 = vcombine.low %v633_v6, %v637_v7 }
 0x225   :  { %3807 = vmatpush1.bf16.msra.mxu0 %v6361_v37  ;;  %3850 = vmatpush1.bf16.msra.mxu1 %v6489_v13  ;;  %v501_v14 = vld [vmem:[#allocation5 + $0xbb8] sm:$0xff] }
 0x226   :  { %3808 = vmatprep.subr.bf16.mxu0 %v6354_v20  ;;  %3851 = vmatprep.subr.bf16.mxu1 %v6482_v22  ;;  %v625_v15 = vld [vmem:[#allocation5 + $0xf98] sm:$0xff]  ;;  %v6442_v18 = vcombine.high %v497_v11, %v501_v14  ;;  %v6441_v20 = vcombine.low %v497_v11, %v501_v14 }
 0x227   :  { %v629_v31 = vld [vmem:[#allocation5 + $0xfb8] sm:$0xff] }
 0x228   :  { %v6570_v58 = vcombine.high %v625_v15, %v629_v31  ;;  %v489_v34 = vld [vmem:[#allocation5 + $0xb58] sm:$0xff]  ;;  %v6569_v22 = vcombine.low %v625_v15, %v629_v31 }
 0x229   :  { %3809 = vmatpush1.bf16.msra.mxu0 %v6353_v28  ;;  %3852 = vmatpush1.bf16.msra.mxu1 %v6481_v29  ;;  %v493_v19 = vld [vmem:[#allocation5 + $0xb78] sm:$0xff] }
 0x22a   :  { %3810 = vmatprep.subr.bf16.mxu0 %v6346_v30  ;;  %3853 = vmatprep.subr.bf16.mxu1 %v6474_v35  ;;  %v617_v37 = vld [vmem:[#allocation5 + $0xf58] sm:$0xff]  ;;  %v6434_v23 = vcombine.high %v489_v34, %v493_v19  ;;  %v6433_v30 = vcombine.low %v489_v34, %v493_v19  ;;  %v3496_v34 = vpop.f32.mrf.mxu0 }
 0x22b   :  { %v621_v13 = vld [vmem:[#allocation5 + $0xf78] sm:$0xff] }
 0x22c   :  { %v6562_v24 = vcombine.high %v617_v37, %v621_v13  ;;  %v481_v26 = vld [vmem:[#allocation5 + $0xb18] sm:$0xff]  ;;  %v6561_v35 = vcombine.low %v617_v37, %v621_v13  ;;  %v3454_v13 = vadd.f32 %v7616_v44, %v7614_v40  ;;  %v6932_v44 = vld [vmem:[#allocation7 + $0x2e4] ss:$16 sps:$4 sm:$0xff]  }
 0x22d   :  { %3811 = vmatpush1.bf16.msra.mxu0 %v6345_v42  ;;  %3854 = vmatpush1.bf16.msra.mxu1 %v6473_v45  ;;  %v485_v27 = vld [vmem:[#allocation5 + $0xb38] sm:$0xff] }
 0x22e   :  { %3812 = vmatprep.subr.bf16.mxu0 %v6338_v50  ;;  %3855 = vmatprep.subr.bf16.mxu1 %v6466_v51  ;;  %v609_v28 = vld [vmem:[#allocation5 + $0xf18] sm:$0xff]  ;;  %v6426_v48 = vcombine.high %v481_v26, %v485_v27  ;;  %v6425_v50 = vcombine.low %v481_v26, %v485_v27  ;;  %v3497_v26 = vadd.f32 %v3496_v34, %v3454_v13  ;;  %v6987_v34 = vld [vmem:[#allocation7 + $0x1a0] ss:$16 sps:$4 sm:$0xff]   ;;  %v6998_v13 = vld [vmem:[#allocation7 + $0x384] ss:$16 sps:$4 sm:$0xff]  }
 0x22f   :  { %v613_v29 = vld [vmem:[#allocation5 + $0xf38] sm:$0xff] }
 0x230   :  { %v6554_v38 = vcombine.high %v609_v28, %v613_v29  ;;  %v473_v39 = vld [vmem:[#allocation5 + $0xad8] sm:$0xff]  ;;  %v6553_v51 = vcombine.low %v609_v28, %v613_v29  ;;  %v6929_v28 = vld [vmem:[#allocation7 + $0xe4] ss:$16 sps:$4 sm:$0xff]   ;;  %v6927_v29 = vld [vmem:[#allocation7 + $0xe0] ss:$16 sps:$4 sm:$0xff]  }
 0x231   :  { %3813 = vmatpush1.bf16.msra.mxu0 %v6337_v56  ;;  %3856 = vmatpush1.bf16.msra.mxu1 %v6465_v59  ;;  %v477_v41 = vld [vmem:[#allocation5 + $0xaf8] sm:$0xff] }
 0x232   :  { %3814 = vmatprep.subr.bf16.mxu0 %v6330_v1  ;;  %3857 = vmatprep.subr.bf16.mxu1 %v6458_v3  ;;  %v601_v42 = vld [vmem:[#allocation5 + $0xed8] sm:$0xff]  ;;  %v6418_v52 = vcombine.high %v473_v39, %v477_v41  ;;  %v6417_v1 = vcombine.low %v473_v39, %v477_v41  ;;  %v6939_v39 = vld [vmem:[#allocation7 + $0xa0] ss:$16 sps:$4 sm:$0xff]   ;;  %v6947_v41 = vld [vmem:[#allocation7 + $0x84] ss:$16 sps:$4 sm:$0xff]  }
 0x233   :  { %v605_v45 = vld [vmem:[#allocation5 + $0xef8] sm:$0xff] }
 0x234   :  { %v6546_v53 = vcombine.high %v601_v42, %v605_v45  ;;  %v465_v54 = vld [vmem:[#allocation5 + $0xa98] sm:$0xff]  ;;  %v6545_v3 = vcombine.low %v601_v42, %v605_v45  ;;  %v6945_v42 = vld [vmem:[#allocation7 + $0x80] ss:$16 sps:$4 sm:$0xff]  }
 0x235   :  { %3815 = vmatpush1.bf16.msra.mxu0 %v6329_v60  ;;  %3858 = vmatpush1.bf16.msra.mxu1 %v6457_v9  ;;  %v469_v55 = vld [vmem:[#allocation5 + $0xab8] sm:$0xff]  ;;  %v6948_v45 = vld [vmem:[#allocation7 + $0x280] ss:$16 sps:$4 sm:$0xff]  }
 0x236   :  { %3816 = vmatprep.subr.bf16.mxu0 %v6450_v25  ;;  %3859 = vmatprep.subr.bf16.mxu1 %v6578_v10  ;;  %v593_v56 = vld [vmem:[#allocation5 + $0xe98] sm:$0xff]  ;;  %v6410_v4 = vcombine.high %v465_v54, %v469_v55  ;;  %v6409_v25 = vcombine.low %v465_v54, %v469_v55  ;;  %v6959_v54 = vld [vmem:[#allocation7 + $0x44] ss:$16 sps:$4 sm:$0xff]  }
 0x237   :  { %v597_v59 = vld [vmem:[#allocation5 + $0xeb8] sm:$0xff]  ;;  %v6962_v55 = vld [vmem:[#allocation7 + $0x244] ss:$16 sps:$4 sm:$0xff]  }
 0x238   :  { %v6538_v21 = vcombine.high %v593_v56, %v597_v59  ;;  %v457_v6 = vld [vmem:[#allocation5 + $0xa58] sm:$0xff]  ;;  %v6537_v10 = vcombine.low %v593_v56, %v597_v59  ;;  %v6957_v56 = vld [vmem:[#allocation7 + $0x40] ss:$16 sps:$4 sm:$0xff]  }
 0x239   :  { %3817 = vmatpush2.bf16.msra.mxu0 %v6449_v16  ;;  %3860 = vmatpush2.bf16.msra.mxu1 %v6577_v17  ;;  %v461_v7 = vld [vmem:[#allocation5 + $0xa78] sm:$0xff]  ;;  %v6960_v59 = vld [vmem:[#allocation7 + $0x240] ss:$16 sps:$4 sm:$0xff]  }
 0x23a   :  { %3818 = vmatprep.subr.bf16.mxu0 %v6442_v18  ;;  %3861 = vmatprep.subr.bf16.mxu1 %v6570_v58  ;;  %v585_v60 = vld [vmem:[#allocation5 + $0xe58] sm:$0xff]  ;;  %v6402_v11 = vcombine.high %v457_v6, %v461_v7  ;;  %v6401_v18 = vcombine.low %v457_v6, %v461_v7  ;;  %v3282_v58 = vadd.f32 %v7584_v61, %v7582_v57  ;;  %v6971_v6 = vld [vmem:[#allocation7 + $0x4] ss:$16 sps:$4 sm:$0xff]  }
 0x23b   :  { %v589_v9 = vld [vmem:[#allocation5 + $0xe78] sm:$0xff]  ;;  %v6974_v7 = vld [vmem:[#allocation7 + $0x204] ss:$16 sps:$4 sm:$0xff]  }
 0x23c   :  { %v6530_v14 = vcombine.high %v585_v60, %v589_v9  ;;  %v449_v15 = vld [vmem:[#allocation5 + $0xa18] sm:$0xff]  ;;  %v6529_v19 = vcombine.low %v585_v60, %v589_v9  ;;  %v6969_v60 = vld [vmem:[#allocation7] ss:$16 sps:$4 sm:$0xff]  }
 0x23d   :  { %3819 = vmatpush2.bf16.msra.mxu0 %v6441_v20  ;;  %3862 = vmatpush2.bf16.msra.mxu1 %v6569_v22  ;;  %v453_v31 = vld [vmem:[#allocation5 + $0xa38] sm:$0xff]  ;;  %v3278_v22 = vadd.f32 %v7576_v36, %v7574_v32  ;;  %v3539_v36 = vpop.f32.mrf.mxu1  ;;  %v6972_v9 = vld [vmem:[#allocation7 + $0x200] ss:$16 sps:$4 sm:$0xff]  }
 0x23e   :  { %3820 = vmatprep.subr.bf16.mxu0 %v6434_v23  ;;  %3863 = vmatprep.subr.bf16.mxu1 %v6562_v24  ;;  %v577_v16 = vld [vmem:[#allocation5 + $0xe18] sm:$0xff]  ;;  %v6394_v37 = vcombine.high %v449_v15, %v453_v31  ;;  %v3325_v23 = vadd.f32 %v7598_v43, %v3282_v58  ;;  %v3450_v24 = vadd.f32 %v7608_v2, %v7606_v62  ;;  %v6930_v2 = vld [vmem:[#allocation7 + $0x2e0] ss:$16 sps:$4 sm:$0xff]   ;;  %v6992_v58 = vld [vmem:[#allocation7 + $0x3a4] ss:$16 sps:$4 sm:$0xff]  }
 0x23f   :  { %v581_v17 = vld [vmem:[#allocation5 + $0xe38] sm:$0xff]  ;;  %v6393_v57 = vcombine.low %v449_v15, %v453_v31  ;;  %v3321_v61 = vadd.f32 %v7589_v8, %v3278_v22  ;;  %v3540_v43 = vadd.f32 %v3539_v36, %v3497_v26  ;;  %v6983_v15 = vld [vmem:[#allocation7 + $0x1c4] ss:$16 sps:$4 sm:$0xff]   ;;  %v6996_v22 = vld [vmem:[#allocation7 + $0x380] ss:$16 sps:$4 sm:$0xff]  }
 0x240   :  { %v6522_v20 = vcombine.high %v577_v16, %v581_v17  ;;  %v6521_v27 = vcombine.low %v577_v16, %v581_v17  ;;  %v3493_v40 = vadd.f32 %v7621_v0, %v3450_v24  ;;  %v3368_v32 = vadd.f32 %v7600_v49, %v3325_v23  ;;  %v6938_v0 = vld [vmem:[#allocation7 + $0x2c4] ss:$16 sps:$4 sm:$0xff]   ;;  %v6933_v49 = vld [vmem:[#allocation7 + $0xc0] ss:$16 sps:$4 sm:$0xff]  }
 0x241   :  { %3821 = vmatpush2.bf16.msra.mxu0 %v6433_v30  ;;  %3864 = vmatpush2.bf16.msra.mxu1 %v6561_v35  ;;  %v3364_v62 = vadd.f32 %v7591_v12, %v3321_v61  ;;  %v6935_v30 = vld [vmem:[#allocation7 + $0xc4] ss:$16 sps:$4 sm:$0xff]   ;;  %v6936_v12 = vld [vmem:[#allocation7 + $0x2c0] ss:$16 sps:$4 sm:$0xff]  }
 0x242   :  { %3822 = vmatprep.subr.bf16.mxu0 %v6426_v48  ;;  %3865 = vmatprep.subr.bf16.mxu1 %v6554_v38  ;;  %v3536_v8 = vadd.f32 %v7623_v5, %v3493_v40  ;;  %v6941_v38 = vld [vmem:[#allocation7 + $0xa4] ss:$16 sps:$4 sm:$0xff]   ;;  %v6981_v16 = vld [vmem:[#allocation7 + $0x1c0] ss:$16 sps:$4 sm:$0xff]  }
 0x243   :  { %v7644_v35 = vpack.c.bf16 %v3368_v32, %v3364_v62  ;;  %v6944_v5 = vld [vmem:[#allocation7 + $0x2a4] ss:$16 sps:$4 sm:$0xff]   ;;  %v6984_v17 = vld [vmem:[#allocation7 + $0x3c0] ss:$16 sps:$4 sm:$0xff]  }
 0x244   :  { %v7647_v48 = vpack.c.bf16 %v3540_v43, %v3536_v8  ;;  %v6986_v31 = vld [vmem:[#allocation7 + $0x3c4] ss:$16 sps:$4 sm:$0xff]   ;;  %v6999_v26 = vld [vmem:[#allocation7 + $0x160] ss:$16 sps:$4 sm:$0xff]  }
 0x245   :  { %3823 = vmatpush2.bf16.msra.mxu0 %v6425_v50  ;;  %3866 = vmatpush2.bf16.msra.mxu1 %v6553_v51  ;;  %v6953_v50 = vld [vmem:[#allocation7 + $0x64] ss:$16 sps:$4 sm:$0xff]  }
 0x246   :  { %3824 = vmatprep.subr.bf16.mxu0 %v6418_v52  ;;  %3867 = vmatprep.subr.bf16.mxu1 %v6546_v53  ;;  %v6956_v51 = vld [vmem:[#allocation7 + $0x264] ss:$16 sps:$4 sm:$0xff]   ;;  %v6951_v52 = vld [vmem:[#allocation7 + $0x60] ss:$16 sps:$4 sm:$0xff]  }
 0x247   :  { %v6954_v53 = vld [vmem:[#allocation7 + $0x260] ss:$16 sps:$4 sm:$0xff]   ;;  %v7001_v23 = vld [vmem:[#allocation7 + $0x164] ss:$16 sps:$4 sm:$0xff]  }
 0x248   :  { %v7004_v24 = vld [vmem:[#allocation7 + $0x364] ss:$16 sps:$4 sm:$0xff]  }
 0x249   :  { %3825 = vmatpush2.bf16.msra.mxu0 %v6417_v1  ;;  %3868 = vmatpush2.bf16.msra.mxu1 %v6545_v3  ;;  %v6965_v1 = vld [vmem:[#allocation7 + $0x24] ss:$16 sps:$4 sm:$0xff]  }
 0x24a   :  { %3826 = vmatprep.subr.bf16.mxu0 %v6410_v4  ;;  %3869 = vmatprep.subr.bf16.mxu1 %v6538_v21  ;;  %v6968_v3 = vld [vmem:[#allocation7 + $0x224] ss:$16 sps:$4 sm:$0xff]   ;;  %v6963_v4 = vld [vmem:[#allocation7 + $0x20] ss:$16 sps:$4 sm:$0xff]  }
 0x24b   :  { %v6966_v21 = vld [vmem:[#allocation7 + $0x220] ss:$16 sps:$4 sm:$0xff]   ;;  %v7007_v61 = vld [vmem:[#allocation7 + $0x144] ss:$16 sps:$4 sm:$0xff]  }
 0x24c   :  { %v7013_v32 = vld [vmem:[#allocation7 + $0x124] ss:$16 sps:$4 sm:$0xff]  }
 0x24d   :  { %3827 = vmatpush2.bf16.msra.mxu0 %v6409_v25  ;;  %3870 = vmatpush2.bf16.msra.mxu1 %v6537_v10  ;;  %v6977_v25 = vld [vmem:[#allocation7 + $0x1e4] ss:$16 sps:$4 sm:$0xff]  }
 0x24e   :  { %3828 = vmatprep.subr.bf16.mxu0 %v6402_v11  ;;  %3871 = vmatprep.subr.bf16.mxu1 %v6530_v14  ;;  %v6980_v10 = vld [vmem:[#allocation7 + $0x3e4] ss:$16 sps:$4 sm:$0xff]   ;;  %v6975_v11 = vld [vmem:[#allocation7 + $0x1e0] ss:$16 sps:$4 sm:$0xff]  }
 0x24f   :  { %v6978_v14 = vld [vmem:[#allocation7 + $0x3e0] ss:$16 sps:$4 sm:$0xff]   ;;  %v7016_v43 = vld [vmem:[#allocation7 + $0x324] ss:$16 sps:$4 sm:$0xff]  }
 0x250   :  { %v7019_v8 = vld [vmem:[#allocation7 + $0x104] ss:$16 sps:$4 sm:$0xff]  }
 0x251   :  { %3829 = vmatpush2.bf16.msra.mxu0 %v6401_v18  ;;  %3872 = vmatpush2.bf16.msra.mxu1 %v6529_v19  ;;  %v6989_v18 = vld [vmem:[#allocation7 + $0x1a4] ss:$16 sps:$4 sm:$0xff]   ;;  %v6990_v19 = vld [vmem:[#allocation7 + $0x3a0] ss:$16 sps:$4 sm:$0xff]  }
 0x252   :  { %3830 = vmatprep.subr.bf16.mxu0 %v6394_v37  ;;  %3873 = vmatprep.subr.bf16.mxu1 %v6522_v20  ;;  %v6995_v37 = vld [vmem:[#allocation7 + $0x184] ss:$16 sps:$4 sm:$0xff]   ;;  %v6993_v20 = vld [vmem:[#allocation7 + $0x180] ss:$16 sps:$4 sm:$0xff]  }
 0x255   :  { %3831 = vmatpush2.bf16.msra.mxu0 %v6393_v57  ;;  %3874 = vmatpush2.bf16.msra.mxu1 %v6521_v27  ;;  %v7002_v57 = vld [vmem:[#allocation7 + $0x360] ss:$16 sps:$4 sm:$0xff]   ;;  %v7010_v27 = vld [vmem:[#allocation7 + $0x344] ss:$16 sps:$4 sm:$0xff]  }
 0x256   :  { %5452 = vmatprep.subr.bf16.mxu0 %v6929_v28  ;;  %5495 = vmatprep.subr.bf16.mxu1 %v6932_v44  ;;  %v7005_v28 = vld [vmem:[#allocation7 + $0x140] ss:$16 sps:$4 sm:$0xff]  }
 0x257   :  { %v7008_v44 = vld [vmem:[#allocation7 + $0x340] ss:$16 sps:$4 sm:$0xff]  }
 0x258   :  { %3833 = vmatmul.mubr.bf16.vlgmr.msra.gmra.mxu0 %v7558_v46  ;;  %3876 = vmatmul.mubr.bf16.vlgmr.msra.gmra.mxu1 %v7560_v47  ;;  %v6942_v46 = vld [vmem:[#allocation7 + $0x2a0] ss:$16 sps:$4 sm:$0xff]   ;;  %v6950_v47 = vld [vmem:[#allocation7 + $0x284] ss:$16 sps:$4 sm:$0xff]   ;;  %v7652_v40 = vpop.f32.mrf.mxu0  ;;  %v7654_v36 = vpop.f32.mrf.mxu1 }
 0x259   :  { %5453 = vmatpush1.bf16.msra.mxu0 %v6927_v29  ;;  %5484 = vmatprep.mubr.bf16.mxu0 %v7644_v35  ;;  %v7011_v29 = vld [vmem:[#allocation7 + $0x120] ss:$16 sps:$4 sm:$0xff]  }
 0x25a   :  { %5496 = vmatpush1.bf16.msra.mxu1 %v6930_v2  ;;  %5527 = vmatprep.mubr.bf16.mxu1 %v7647_v48  ;;  %v3578_v62 = vpop.f32.mrf.mxu0  ;;  %v7014_v2 = vld [vmem:[#allocation7 + $0x320] ss:$16 sps:$4 sm:$0xff]  }
 0x25b   :  { %5454 = vmatprep.subr.bf16.mxu0 %v6935_v30  ;;  %5497 = vmatprep.subr.bf16.mxu1 %v6938_v0  ;;  %v3621_v30 = vpop.f32.mrf.mxu1  ;;  %v7022_v0 = vld [vmem:[#allocation7 + $0x304] ss:$16 sps:$4 sm:$0xff]  }
 0x25d   :  { %5455 = vmatpush1.bf16.msra.mxu0 %v6933_v49  ;;  %v7017_v49 = vld [vmem:[#allocation7 + $0x100] ss:$16 sps:$4 sm:$0xff]  }
 0x25e   :  { %5498 = vmatpush1.bf16.msra.mxu1 %v6936_v12  ;;  %5456 = vmatprep.subr.bf16.mxu0 %v6941_v38  ;;  %v7656_v12 = vpop.f32.mrf.mxu0  ;;  %v7020_v38 = vld [vmem:[#allocation7 + $0x300] ss:$16 sps:$4 sm:$0xff]  }
 0x25f   :  { %5499 = vmatprep.subr.bf16.mxu1 %v6944_v5  ;;  %v7025_v5 = vld [vmem:[#allocation7 + $0x4e4] ss:$16 sps:$4 sm:$0xff]  }
 0x261   :  { %5457 = vmatpush1.bf16.msra.mxu0 %v6939_v39  ;;  %v7658_v39 = vpop.f32.mrf.mxu1 }
 0x262   :  { %5500 = vmatpush1.bf16.msra.mxu1 %v6942_v46  ;;  %5458 = vmatprep.subr.bf16.mxu0 %v6947_v41  ;;  %v7085_v46 = vld [vmem:[#allocation7 + $0x6e4] ss:$16 sps:$4 sm:$0xff]   ;;  %v7023_v41 = vld [vmem:[#allocation7 + $0x4e0] ss:$16 sps:$4 sm:$0xff]  }
 0x263   :  { %5501 = vmatprep.subr.bf16.mxu1 %v6950_v47  ;;  %v3582_v47 = vpop.f32.mrf.mxu0 }
 0x265   :  { %5459 = vmatpush1.bf16.msra.mxu0 %v6945_v42  ;;  %v7028_v42 = vld [vmem:[#allocation7 + $0x4c4] ss:$16 sps:$4 sm:$0xff]  }
 0x266   :  { %5502 = vmatpush1.bf16.msra.mxu1 %v6948_v45  ;;  %5460 = vmatprep.subr.bf16.mxu0 %v6953_v50  ;;  %v7083_v45 = vld [vmem:[#allocation7 + $0x6e0] ss:$16 sps:$4 sm:$0xff]   ;;  %v3625_v50 = vpop.f32.mrf.mxu1 }
 0x267   :  { %5503 = vmatprep.subr.bf16.mxu1 %v6956_v51  ;;  %v7091_v51 = vld [vmem:[#allocation7 + $0x6c4] ss:$16 sps:$4 sm:$0xff]  }
 0x269   :  { %5461 = vmatpush1.bf16.msra.mxu0 %v6951_v52 }
 0x26a   :  { %5504 = vmatpush1.bf16.msra.mxu1 %v6954_v53  ;;  %5462 = vmatprep.subr.bf16.mxu0 %v6959_v54  ;;  %v7026_v54 = vld [vmem:[#allocation7 + $0x4c0] ss:$16 sps:$4 sm:$0xff]  }
 0x26b   :  { %5505 = vmatprep.subr.bf16.mxu1 %v6962_v55 }
 0x26d   :  { %5463 = vmatpush1.bf16.msra.mxu0 %v6957_v56  ;;  %v7031_v56 = vld [vmem:[#allocation7 + $0x4a4] ss:$16 sps:$4 sm:$0xff]  }
 0x26e   :  { %5506 = vmatpush1.bf16.msra.mxu1 %v6960_v59  ;;  %5464 = vmatprep.subr.bf16.mxu0 %v6965_v1  ;;  %v7089_v59 = vld [vmem:[#allocation7 + $0x6c0] ss:$16 sps:$4 sm:$0xff]   ;;  %v3622_v1 = vadd.f32 %v3621_v30, %v3578_v62  ;;  %v7052_v30 = vld [vmem:[#allocation7 + $0x5c4] ss:$16 sps:$4 sm:$0xff]  }
 0x26f   :  { %5507 = vmatprep.subr.bf16.mxu1 %v6968_v3  ;;  %v7125_v62 = vld [vmem:[#allocation7 + $0x600] ss:$16 sps:$4 sm:$0xff]  }
 0x271   :  { %5465 = vmatpush1.bf16.msra.mxu0 %v6963_v4  ;;  %v7097_v4 = vld [vmem:[#allocation7 + $0x6a4] ss:$16 sps:$4 sm:$0xff]  }
 0x272   :  { %5508 = vmatpush1.bf16.msra.mxu1 %v6966_v21  ;;  %5466 = vmatprep.subr.bf16.mxu0 %v6971_v6  ;;  %v3626_v6 = vadd.f32 %v3625_v50, %v3582_v47  ;;  %v7053_v47 = vld [vmem:[#allocation7 + $0x5a0] ss:$16 sps:$4 sm:$0xff]   ;;  %v7151_v50 = vld [vmem:[#allocation7 + $0x784] ss:$16 sps:$4 sm:$0xff]  }
 0x273   :  { %5509 = vmatprep.subr.bf16.mxu1 %v6974_v7 }
 0x275   :  { %5467 = vmatpush1.bf16.msra.mxu0 %v6969_v60 }
 0x276   :  { %5510 = vmatpush1.bf16.msra.mxu1 %v6972_v9  ;;  %5468 = vmatprep.subr.bf16.mxu0 %v6977_v25  ;;  %v7029_v9 = vld [vmem:[#allocation7 + $0x4a0] ss:$16 sps:$4 sm:$0xff]  }
 0x277   :  { %5511 = vmatprep.subr.bf16.mxu1 %v6980_v10  ;;  %v7034_v10 = vld [vmem:[#allocation7 + $0x484] ss:$16 sps:$4 sm:$0xff]  }
 0x279   :  { %5469 = vmatpush2.bf16.msra.mxu0 %v6975_v11  ;;  %v7095_v11 = vld [vmem:[#allocation7 + $0x6a0] ss:$16 sps:$4 sm:$0xff]  }
 0x27a   :  { %5512 = vmatpush2.bf16.msra.mxu1 %v6978_v14  ;;  %5470 = vmatprep.subr.bf16.mxu0 %v6983_v15  ;;  %v7103_v15 = vld [vmem:[#allocation7 + $0x684] ss:$16 sps:$4 sm:$0xff]  }
 0x27b   :  { %5513 = vmatprep.subr.bf16.mxu1 %v6986_v31 }
 0x27d   :  { %5471 = vmatpush2.bf16.msra.mxu0 %v6981_v16 }
 0x27e   :  { %5514 = vmatpush2.bf16.msra.mxu1 %v6984_v17  ;;  %5472 = vmatprep.subr.bf16.mxu0 %v6989_v18  ;;  %v7032_v18 = vld [vmem:[#allocation7 + $0x480] ss:$16 sps:$4 sm:$0xff]  }
 0x27f   :  { %5515 = vmatprep.subr.bf16.mxu1 %v6992_v58  ;;  %v7037_v58 = vld [vmem:[#allocation7 + $0x464] ss:$16 sps:$4 sm:$0xff]  }
 0x281   :  { %5473 = vmatpush2.bf16.msra.mxu0 %v6987_v34  ;;  %v7101_v34 = vld [vmem:[#allocation7 + $0x680] ss:$16 sps:$4 sm:$0xff]  }
 0x282   :  { %5516 = vmatpush2.bf16.msra.mxu1 %v6990_v19  ;;  %5474 = vmatprep.subr.bf16.mxu0 %v6995_v37  ;;  %v7109_v37 = vld [vmem:[#allocation7 + $0x664] ss:$16 sps:$4 sm:$0xff]  }
 0x283   :  { %5517 = vmatprep.subr.bf16.mxu1 %v6998_v13  ;;  %v7035_v13 = vld [vmem:[#allocation7 + $0x460] ss:$16 sps:$4 sm:$0xff]  }
 0x285   :  { %5475 = vmatpush2.bf16.msra.mxu0 %v6993_v20  ;;  %v7040_v20 = vld [vmem:[#allocation7 + $0x444] ss:$16 sps:$4 sm:$0xff]  }
 0x286   :  { %5518 = vmatpush2.bf16.msra.mxu1 %v6996_v22  ;;  %5476 = vmatprep.subr.bf16.mxu0 %v7001_v23  ;;  %v7107_v22 = vld [vmem:[#allocation7 + $0x660] ss:$16 sps:$4 sm:$0xff]   ;;  %v7115_v23 = vld [vmem:[#allocation7 + $0x644] ss:$16 sps:$4 sm:$0xff]  }
 0x287   :  { %5519 = vmatprep.subr.bf16.mxu1 %v7004_v24  ;;  %v7038_v24 = vld [vmem:[#allocation7 + $0x440] ss:$16 sps:$4 sm:$0xff]  }
 0x289   :  { %5477 = vmatpush2.bf16.msra.mxu0 %v6999_v26  ;;  %v7043_v26 = vld [vmem:[#allocation7 + $0x424] ss:$16 sps:$4 sm:$0xff]  }
 0x28a   :  { %5520 = vmatpush2.bf16.msra.mxu1 %v7002_v57  ;;  %5478 = vmatprep.subr.bf16.mxu0 %v7007_v61  ;;  %v7113_v57 = vld [vmem:[#allocation7 + $0x640] ss:$16 sps:$4 sm:$0xff]   ;;  %v7121_v61 = vld [vmem:[#allocation7 + $0x624] ss:$16 sps:$4 sm:$0xff]  }
 0x28b   :  { %5521 = vmatprep.subr.bf16.mxu1 %v7010_v27  ;;  %v7041_v27 = vld [vmem:[#allocation7 + $0x420] ss:$16 sps:$4 sm:$0xff]  }
 0x28d   :  { %5479 = vmatpush2.bf16.msra.mxu0 %v7005_v28  ;;  %v7046_v28 = vld [vmem:[#allocation7 + $0x404] ss:$16 sps:$4 sm:$0xff]  }
 0x28e   :  { %5522 = vmatpush2.bf16.msra.mxu1 %v7008_v44  ;;  %5480 = vmatprep.subr.bf16.mxu0 %v7013_v32  ;;  %v7119_v44 = vld [vmem:[#allocation7 + $0x620] ss:$16 sps:$4 sm:$0xff]   ;;  %v7127_v32 = vld [vmem:[#allocation7 + $0x604] ss:$16 sps:$4 sm:$0xff]  }
 0x28f   :  { %5523 = vmatprep.subr.bf16.mxu1 %v7016_v43  ;;  %v7044_v43 = vld [vmem:[#allocation7 + $0x400] ss:$16 sps:$4 sm:$0xff]  }
 0x291   :  { %5481 = vmatpush2.bf16.msra.mxu0 %v7011_v29  ;;  %v7049_v29 = vld [vmem:[#allocation7 + $0x5e4] ss:$16 sps:$4 sm:$0xff]  }
 0x292   :  { %5524 = vmatpush2.bf16.msra.mxu1 %v7014_v2  ;;  %5482 = vmatprep.subr.bf16.mxu0 %v7019_v8  ;;  %v7133_v2 = vld [vmem:[#allocation7 + $0x7e4] ss:$16 sps:$4 sm:$0xff]   ;;  %v7047_v8 = vld [vmem:[#allocation7 + $0x5e0] ss:$16 sps:$4 sm:$0xff]  }
 0x293   :  { %5525 = vmatprep.subr.bf16.mxu1 %v7022_v0  ;;  %v7131_v0 = vld [vmem:[#allocation7 + $0x7e0] ss:$16 sps:$4 sm:$0xff]  }
 0x295   :  { %5483 = vmatpush2.bf16.msra.mxu0 %v7017_v49  ;;  %v7139_v49 = vld [vmem:[#allocation7 + $0x7c4] ss:$16 sps:$4 sm:$0xff]  }
 0x296   :  { %5526 = vmatpush2.bf16.msra.mxu1 %v7020_v38  ;;  %5538 = vmatprep.subr.bf16.mxu0 %v7025_v5  ;;  %v7050_v38 = vld [vmem:[#allocation7 + $0x5c0] ss:$16 sps:$4 sm:$0xff]   ;;  %v7055_v5 = vld [vmem:[#allocation7 + $0x5a4] ss:$16 sps:$4 sm:$0xff]  }
 0x297   :  { %5581 = vmatprep.subr.bf16.mxu1 %v7085_v46  ;;  %v7137_v46 = vld [vmem:[#allocation7 + $0x7c0] ss:$16 sps:$4 sm:$0xff]  }
 0x298   :  { %v7660_v52 = vpop.f32.mrf.mxu0  ;;  %5485 = vmatmul.mubr.bf16.vlgmr.msra.gmra.mxu0 %v7596_v33  ;;  %v7663_v53 = vpop.f32.mrf.mxu1 }
 0x299   :  { %5528 = vmatmul.mubr.bf16.vlgmr.msra.gmra.mxu1 %v7628_v63  ;;  %5539 = vmatpush1.bf16.msra.mxu0 %v7023_v41  ;;  %v7145_v41 = vld [vmem:[#allocation7 + $0x7a4] ss:$16 sps:$4 sm:$0xff]  }
 0x29a   :  { %v3664_v55 = vpop.f32.mrf.mxu0  ;;  %5540 = vmatprep.subr.bf16.mxu0 %v7028_v42  ;;  %5582 = vmatpush1.bf16.msra.mxu1 %v7083_v45  ;;  %v3707_v3 = vpop.f32.mrf.mxu1  ;;  %v7058_v42 = vld [vmem:[#allocation7 + $0x584] ss:$16 sps:$4 sm:$0xff]   ;;  %v7143_v45 = vld [vmem:[#allocation7 + $0x7a0] ss:$16 sps:$4 sm:$0xff]  }
 0x29b   :  { %5583 = vmatprep.subr.bf16.mxu1 %v7091_v51  ;;  %v3665_v7 = vadd.f32 %v3664_v55, %v3622_v1  ;;  %v7056_v51 = vld [vmem:[#allocation7 + $0x580] ss:$16 sps:$4 sm:$0xff]   ;;  %v7064_v1 = vld [vmem:[#allocation7 + $0x544] ss:$16 sps:$4 sm:$0xff]  }
 0x29c   :  { %v7666_v21 = vpop.f32.mrf.mxu0  ;;  %v7668_v60 = vpop.f32.mrf.mxu1  ;;  %v7149_v55 = vld [vmem:[#allocation7 + $0x780] ss:$16 sps:$4 sm:$0xff]  }
 0x29d   :  { %5541 = vmatpush1.bf16.msra.mxu0 %v7026_v54  ;;  %v3708_v16 = vadd.f32 %v3707_v3, %v3665_v7  ;;  %v7061_v54 = vld [vmem:[#allocation7 + $0x564] ss:$16 sps:$4 sm:$0xff]   ;;  %v7155_v3 = vld [vmem:[#allocation7 + $0x760] ss:$16 sps:$4 sm:$0xff]  }
 0x29e   :  { %v3668_v25 = vpop.f32.mrf.mxu0  ;;  %5542 = vmatprep.subr.bf16.mxu0 %v7031_v56  ;;  %5584 = vmatpush1.bf16.msra.mxu1 %v7089_v59  ;;  %v3711_v31 = vpop.f32.mrf.mxu1  ;;  %v7157_v56 = vld [vmem:[#allocation7 + $0x764] ss:$16 sps:$4 sm:$0xff]   ;;  %v7059_v59 = vld [vmem:[#allocation7 + $0x560] ss:$16 sps:$4 sm:$0xff]  }
 0x29f   :  { %v3669_v14 = vadd.f32 %v3668_v25, %v3626_v6  ;;  %5585 = vmatprep.subr.bf16.mxu1 %v7097_v4  ;;  %v7163_v4 = vld [vmem:[#allocation7 + $0x744] ss:$16 sps:$4 sm:$0xff]   ;;  %v7062_v6 = vld [vmem:[#allocation7 + $0x540] ss:$16 sps:$4 sm:$0xff]  }
 0x2a0   :  { %v7067_v7 = vld [vmem:[#allocation7 + $0x524] ss:$16 sps:$4 sm:$0xff]  }
 0x2a1   :  { %v3712_v17 = vadd.f32 %v3711_v31, %v3669_v14  ;;  %5543 = vmatpush1.bf16.msra.mxu0 %v7029_v9  ;;  %v7161_v9 = vld [vmem:[#allocation7 + $0x740] ss:$16 sps:$4 sm:$0xff]   ;;  %v7169_v25 = vld [vmem:[#allocation7 + $0x724] ss:$16 sps:$4 sm:$0xff]   ;;  %v3620_v14 = vadd.f32 %v7654_v36, %v7652_v40  ;;  %v7181_v40 = vld [vmem:[#allocation7 + $0x2ec] ss:$16 sps:$4 sm:$0xff]  }
 0x2a2   :  { %5544 = vmatprep.subr.bf16.mxu0 %v7034_v10  ;;  %5586 = vmatpush1.bf16.msra.mxu1 %v7095_v11  ;;  %v3624_v10 = vadd.f32 %v7658_v39, %v7656_v12  ;;  %v7065_v11 = vld [vmem:[#allocation7 + $0x520] ss:$16 sps:$4 sm:$0xff]   ;;  %v7070_v31 = vld [vmem:[#allocation7 + $0x504] ss:$16 sps:$4 sm:$0xff]   ;;  %v7073_v12 = vld [vmem:[#allocation7 + $0xec] ss:$16 sps:$4 sm:$0xff]  }
 0x2a3   :  { %v7670_v19 = vpack.c.bf16 %v3712_v17, %v3708_v16  ;;  %5587 = vmatprep.subr.bf16.mxu1 %v7103_v15  ;;  %v7167_v16 = vld [vmem:[#allocation7 + $0x720] ss:$16 sps:$4 sm:$0xff]   ;;  %v7175_v17 = vld [vmem:[#allocation7 + $0x704] ss:$16 sps:$4 sm:$0xff]  }
 0x2a4   :  { %v3667_v15 = vadd.f32 %v7666_v21, %v3624_v10  ;;  %v7173_v39 = vld [vmem:[#allocation7 + $0x700] ss:$16 sps:$4 sm:$0xff]   ;;  %v7071_v21 = vld [vmem:[#allocation7 + $0xe8] ss:$16 sps:$4 sm:$0xff]  }
 0x2a5   :  { %5545 = vmatpush1.bf16.msra.mxu0 %v7032_v18  ;;  %5570 = vmatprep.mubr.bf16.mxu0 %v7670_v19  ;;  %v3663_v18 = vadd.f32 %v7660_v52, %v3620_v14  ;;  %v7074_v52 = vld [vmem:[#allocation7 + $0xc8] ss:$16 sps:$4 sm:$0xff]  }
 0x2a6   :  { %5546 = vmatprep.subr.bf16.mxu0 %v7037_v58  ;;  %5588 = vmatpush1.bf16.msra.mxu1 %v7101_v34  ;;  %v7068_v58 = vld [vmem:[#allocation7 + $0x500] ss:$16 sps:$4 sm:$0xff]   ;;  %v3710_v34 = vadd.f32 %v7668_v60, %v3667_v15  ;;  %v7079_v60 = vld [vmem:[#allocation7 + $0xac] ss:$16 sps:$4 sm:$0xff]  }
 0x2a7   :  { %5589 = vmatprep.subr.bf16.mxu1 %v7109_v37  ;;  %v3706_v36 = vadd.f32 %v7663_v53, %v3663_v18  ;;  %v7082_v53 = vld [vmem:[#allocation7 + $0x8c] ss:$16 sps:$4 sm:$0xff]  }
 0x2a9   :  { %5547 = vmatpush1.bf16.msra.mxu0 %v7035_v13  ;;  %v7681_v37 = vpack.c.bf16 %v3710_v34, %v3706_v36  ;;  %v7076_v13 = vld [vmem:[#allocation7 + $0xcc] ss:$16 sps:$4 sm:$0xff]  }
 0x2aa   :  { %5548 = vmatprep.subr.bf16.mxu0 %v7040_v20  ;;  %5590 = vmatpush1.bf16.msra.mxu1 %v7107_v22  ;;  %v7077_v20 = vld [vmem:[#allocation7 + $0xa8] ss:$16 sps:$4 sm:$0xff]   ;;  %v7178_v36 = vld [vmem:[#allocation7 + $0x48c] ss:$16 sps:$4 sm:$0xff]  }
 0x2ab   :  { %5591 = vmatprep.subr.bf16.mxu1 %v7115_v23  ;;  %v7080_v22 = vld [vmem:[#allocation7 + $0x88] ss:$16 sps:$4 sm:$0xff]   ;;  %v7088_v23 = vld [vmem:[#allocation7 + $0x6c] ss:$16 sps:$4 sm:$0xff]  }
 0x2ad   :  { %5549 = vmatpush1.bf16.msra.mxu0 %v7038_v24  ;;  %v7086_v24 = vld [vmem:[#allocation7 + $0x68] ss:$16 sps:$4 sm:$0xff]  }
 0x2ae   :  { %5550 = vmatprep.subr.bf16.mxu0 %v7043_v26  ;;  %5592 = vmatpush1.bf16.msra.mxu1 %v7113_v57  ;;  %v7094_v26 = vld [vmem:[#allocation7 + $0x4c] ss:$16 sps:$4 sm:$0xff]   ;;  %v7092_v57 = vld [vmem:[#allocation7 + $0x48] ss:$16 sps:$4 sm:$0xff]  }
 0x2af   :  { %5593 = vmatprep.subr.bf16.mxu1 %v7121_v61  ;;  %v7100_v61 = vld [vmem:[#allocation7 + $0x2c] ss:$16 sps:$4 sm:$0xff]  }
 0x2b1   :  { %5551 = vmatpush1.bf16.msra.mxu0 %v7041_v27  ;;  %v7106_v27 = vld [vmem:[#allocation7 + $0xc] ss:$16 sps:$4 sm:$0xff]  }
 0x2b2   :  { %5552 = vmatprep.subr.bf16.mxu0 %v7046_v28  ;;  %5594 = vmatpush1.bf16.msra.mxu1 %v7119_v44  ;;  %v7104_v28 = vld [vmem:[#allocation7 + $0x8] ss:$16 sps:$4 sm:$0xff]   ;;  %v7112_v44 = vld [vmem:[#allocation7 + $0x1ec] ss:$16 sps:$4 sm:$0xff]  }
 0x2b3   :  { %5595 = vmatprep.subr.bf16.mxu1 %v7127_v32  ;;  %v7110_v32 = vld [vmem:[#allocation7 + $0x1e8] ss:$16 sps:$4 sm:$0xff]  }
 0x2b5   :  { %5553 = vmatpush1.bf16.msra.mxu0 %v7044_v43  ;;  %v7118_v43 = vld [vmem:[#allocation7 + $0x1cc] ss:$16 sps:$4 sm:$0xff]  }
 0x2b6   :  { %5554 = vmatprep.subr.bf16.mxu0 %v7049_v29  ;;  %5596 = vmatpush1.bf16.msra.mxu1 %v7125_v62  ;;  %v7116_v29 = vld [vmem:[#allocation7 + $0x1c8] ss:$16 sps:$4 sm:$0xff]   ;;  %v7124_v62 = vld [vmem:[#allocation7 + $0x1ac] ss:$16 sps:$4 sm:$0xff]  }
 0x2b7   :  { %5597 = vmatprep.subr.bf16.mxu1 %v7133_v2  ;;  %v7122_v2 = vld [vmem:[#allocation7 + $0x1a8] ss:$16 sps:$4 sm:$0xff]  }
 0x2b9   :  { %5555 = vmatpush2.bf16.msra.mxu0 %v7047_v8  ;;  %v7130_v8 = vld [vmem:[#allocation7 + $0x18c] ss:$16 sps:$4 sm:$0xff]  }
 0x2ba   :  { %5556 = vmatprep.subr.bf16.mxu0 %v7052_v30  ;;  %5598 = vmatpush2.bf16.msra.mxu1 %v7131_v0  ;;  %v7128_v30 = vld [vmem:[#allocation7 + $0x188] ss:$16 sps:$4 sm:$0xff]   ;;  %v7136_v0 = vld [vmem:[#allocation7 + $0x16c] ss:$16 sps:$4 sm:$0xff]  }
 0x2bb   :  { %5599 = vmatprep.subr.bf16.mxu1 %v7139_v49  ;;  %v7134_v49 = vld [vmem:[#allocation7 + $0x168] ss:$16 sps:$4 sm:$0xff]  }
 0x2bd   :  { %5557 = vmatpush2.bf16.msra.mxu0 %v7050_v38  ;;  %v7142_v38 = vld [vmem:[#allocation7 + $0x14c] ss:$16 sps:$4 sm:$0xff]  }
 0x2be   :  { %5558 = vmatprep.subr.bf16.mxu0 %v7055_v5  ;;  %5600 = vmatpush2.bf16.msra.mxu1 %v7137_v46  ;;  %v7140_v5 = vld [vmem:[#allocation7 + $0x148] ss:$16 sps:$4 sm:$0xff]  }
 0x2bf   :  { %5601 = vmatprep.subr.bf16.mxu1 %v7145_v41  ;;  %v7148_v41 = vld [vmem:[#allocation7 + $0x12c] ss:$16 sps:$4 sm:$0xff]  }
 0x2c1   :  { %5559 = vmatpush2.bf16.msra.mxu0 %v7053_v47 }
 0x2c2   :  { %5560 = vmatprep.subr.bf16.mxu0 %v7058_v42  ;;  %5602 = vmatpush2.bf16.msra.mxu1 %v7143_v45  ;;  %v7146_v42 = vld [vmem:[#allocation7 + $0x128] ss:$16 sps:$4 sm:$0xff]  }
 0x2c3   :  { %5603 = vmatprep.subr.bf16.mxu1 %v7151_v50  ;;  %v7154_v50 = vld [vmem:[#allocation7 + $0x10c] ss:$16 sps:$4 sm:$0xff]  }
 0x2c5   :  { %5561 = vmatpush2.bf16.msra.mxu0 %v7056_v51 }
 0x2c6   :  { %5562 = vmatprep.subr.bf16.mxu0 %v7061_v54  ;;  %5604 = vmatpush2.bf16.msra.mxu1 %v7149_v55  ;;  %v7152_v54 = vld [vmem:[#allocation7 + $0x108] ss:$16 sps:$4 sm:$0xff]  }
 0x2c7   :  { %5605 = vmatprep.subr.bf16.mxu1 %v7157_v56  ;;  %v7160_v56 = vld [vmem:[#allocation7 + $0x4ec] ss:$16 sps:$4 sm:$0xff]  }
 0x2c9   :  { %5563 = vmatpush2.bf16.msra.mxu0 %v7059_v59 }
 0x2ca   :  { %5564 = vmatprep.subr.bf16.mxu0 %v7064_v1  ;;  %5606 = vmatpush2.bf16.msra.mxu1 %v7155_v3  ;;  %v7158_v1 = vld [vmem:[#allocation7 + $0x4e8] ss:$16 sps:$4 sm:$0xff]  }
 0x2cb   :  { %5607 = vmatprep.subr.bf16.mxu1 %v7163_v4  ;;  %v7166_v4 = vld [vmem:[#allocation7 + $0x4cc] ss:$16 sps:$4 sm:$0xff]  }
 0x2cd   :  { %5565 = vmatpush2.bf16.msra.mxu0 %v7062_v6 }
 0x2ce   :  { %5566 = vmatprep.subr.bf16.mxu0 %v7067_v7  ;;  %5608 = vmatpush2.bf16.msra.mxu1 %v7161_v9 }
 0x2cf   :  { %5609 = vmatprep.subr.bf16.mxu1 %v7169_v25  ;;  %v7164_v25 = vld [vmem:[#allocation7 + $0x4c8] ss:$16 sps:$4 sm:$0xff]  }
 0x2d1   :  { %5567 = vmatpush2.bf16.msra.mxu0 %v7065_v11  ;;  %v7172_v11 = vld [vmem:[#allocation7 + $0x4ac] ss:$16 sps:$4 sm:$0xff]  }
 0x2d2   :  { %5568 = vmatprep.subr.bf16.mxu0 %v7070_v31  ;;  %5610 = vmatpush2.bf16.msra.mxu1 %v7167_v16 }
 0x2d3   :  { %5611 = vmatprep.subr.bf16.mxu1 %v7175_v17 }
 0x2d5   :  { %5569 = vmatpush2.bf16.msra.mxu0 %v7068_v58 }
 0x2d6   :  { %5624 = vmatprep.subr.bf16.mxu0 %v7073_v12  ;;  %5612 = vmatpush2.bf16.msra.mxu1 %v7173_v39  ;;  %v7170_v39 = vld [vmem:[#allocation7 + $0x4a8] ss:$16 sps:$4 sm:$0xff]  }
 0x2d7   :  { %5667 = vmatprep.subr.bf16.mxu1 %v7181_v40 }
 0x2d8   :  { %5571 = vmatmul.mubr.bf16.vlgmr.msra.gmra.mxu0 %v7681_v37  ;;  %v3748_v46 = vpop.f32.mrf.mxu0  ;;  %v3791_v47 = vpop.f32.mrf.mxu1 }
 0x2d9   :  { %5625 = vmatpush1.bf16.msra.mxu0 %v7071_v21  ;;  %5656 = vmatprep.mubr.bf16.mxu0 %v7644_v35  ;;  %v7098_v35 = vld [vmem:[#allocation7 + $0x28] ss:$16 sps:$4 sm:$0xff]   ;;  %v3792_v16 = vadd.f32 %v3791_v47, %v3748_v46  ;;  %v7214_v46 = vld [vmem:[#allocation7 + $0x5cc] ss:$16 sps:$4 sm:$0xff]  }
 0x2da   :  { %5626 = vmatprep.subr.bf16.mxu0 %v7076_v13  ;;  %v3750_v45 = vpop.f32.mrf.mxu0  ;;  %v3793_v51 = vpop.f32.mrf.mxu1  ;;  %v7217_v47 = vld [vmem:[#allocation7 + $0x22c] ss:$16 sps:$4 sm:$0xff]  }
 0x2db   :  { %v3794_v14 = vadd.f32 %v3793_v51, %v3750_v45  ;;  %v7220_v45 = vld [vmem:[#allocation7 + $0x5ac] ss:$16 sps:$4 sm:$0xff]  }
 0x2dc   :  { %v3752_v55 = vpop.f32.mrf.mxu0  ;;  %v3795_v59 = vpop.f32.mrf.mxu1  ;;  %v7223_v51 = vld [vmem:[#allocation7 + $0x20c] ss:$16 sps:$4 sm:$0xff]  }
 0x2dd   :  { %5627 = vmatpush1.bf16.msra.mxu0 %v7074_v52  ;;  %v3796_v15 = vadd.f32 %v3795_v59, %v3752_v55  ;;  %v7226_v55 = vld [vmem:[#allocation7 + $0x58c] ss:$16 sps:$4 sm:$0xff]  }
 0x2de   :  { %5628 = vmatprep.subr.bf16.mxu0 %v7079_v60  ;;  %v3754_v3 = vpop.f32.mrf.mxu0  ;;  %v3797_v6 = vpop.f32.mrf.mxu1  ;;  %v7229_v59 = vld [vmem:[#allocation7 + $0x3ec] ss:$16 sps:$4 sm:$0xff]  }
 0x2df   :  { %v3798_v18 = vadd.f32 %v3797_v6, %v3754_v3  ;;  %v7232_v3 = vld [vmem:[#allocation7 + $0x56c] ss:$16 sps:$4 sm:$0xff]  }
 0x2e0   :  { %v7235_v6 = vld [vmem:[#allocation7 + $0x3cc] ss:$16 sps:$4 sm:$0xff]  }
 0x2e1   :  { %5629 = vmatpush1.bf16.msra.mxu0 %v7077_v20  ;;  %v7176_v20 = vld [vmem:[#allocation7 + $0x488] ss:$16 sps:$4 sm:$0xff]  }
 0x2e2   :  { %5630 = vmatprep.subr.bf16.mxu0 %v7082_v53 }
 0x2e5   :  { %5631 = vmatpush1.bf16.msra.mxu0 %v7080_v22  ;;  %v7184_v22 = vld [vmem:[#allocation7 + $0x46c] ss:$16 sps:$4 sm:$0xff]  }
 0x2e6   :  { %5632 = vmatprep.subr.bf16.mxu0 %v7088_v23 }
 0x2e9   :  { %5633 = vmatpush1.bf16.msra.mxu0 %v7086_v24  ;;  %v7179_v24 = vld [vmem:[#allocation7 + $0x2e8] ss:$16 sps:$4 sm:$0xff]  }
 0x2ea   :  { %5634 = vmatprep.subr.bf16.mxu0 %v7094_v26 }
 0x2ed   :  { %5635 = vmatpush1.bf16.msra.mxu0 %v7092_v57  ;;  %v7187_v57 = vld [vmem:[#allocation7 + $0x2cc] ss:$16 sps:$4 sm:$0xff]  }
 0x2ee   :  { %5636 = vmatprep.subr.bf16.mxu0 %v7100_v61  ;;  %v7182_v61 = vld [vmem:[#allocation7 + $0x468] ss:$16 sps:$4 sm:$0xff]  }
 0x2f1   :  { %5637 = vmatpush1.bf16.msra.mxu0 %v7098_v35  ;;  %v7190_v35 = vld [vmem:[#allocation7 + $0x44c] ss:$16 sps:$4 sm:$0xff]  }
 0x2f2   :  { %5638 = vmatprep.subr.bf16.mxu0 %v7106_v27  ;;  %v7185_v27 = vld [vmem:[#allocation7 + $0x2c8] ss:$16 sps:$4 sm:$0xff]  }
 0x2f5   :  { %5639 = vmatpush1.bf16.msra.mxu0 %v7104_v28  ;;  %v7193_v28 = vld [vmem:[#allocation7 + $0x2ac] ss:$16 sps:$4 sm:$0xff]  }
 0x2f6   :  { %5640 = vmatprep.subr.bf16.mxu0 %v7112_v44  ;;  %v7188_v44 = vld [vmem:[#allocation7 + $0x448] ss:$16 sps:$4 sm:$0xff]  }
 0x2f9   :  { %5641 = vmatpush2.bf16.msra.mxu0 %v7110_v32  ;;  %v7196_v32 = vld [vmem:[#allocation7 + $0x42c] ss:$16 sps:$4 sm:$0xff]  }
 0x2fa   :  { %5642 = vmatprep.subr.bf16.mxu0 %v7118_v43  ;;  %v7191_v43 = vld [vmem:[#allocation7 + $0x2a8] ss:$16 sps:$4 sm:$0xff]  }
 0x2fd   :  { %5643 = vmatpush2.bf16.msra.mxu0 %v7116_v29  ;;  %v7199_v29 = vld [vmem:[#allocation7 + $0x28c] ss:$16 sps:$4 sm:$0xff]  }
 0x2fe   :  { %5644 = vmatprep.subr.bf16.mxu0 %v7124_v62  ;;  %v7194_v62 = vld [vmem:[#allocation7 + $0x428] ss:$16 sps:$4 sm:$0xff]  }
 0x301   :  { %5645 = vmatpush2.bf16.msra.mxu0 %v7122_v2  ;;  %v7202_v2 = vld [vmem:[#allocation7 + $0x40c] ss:$16 sps:$4 sm:$0xff]  }
 0x302   :  { %5646 = vmatprep.subr.bf16.mxu0 %v7130_v8  ;;  %v7197_v8 = vld [vmem:[#allocation7 + $0x288] ss:$16 sps:$4 sm:$0xff]  }
 0x305   :  { %5647 = vmatpush2.bf16.msra.mxu0 %v7128_v30  ;;  %v7205_v30 = vld [vmem:[#allocation7 + $0x26c] ss:$16 sps:$4 sm:$0xff]  }
 0x306   :  { %5648 = vmatprep.subr.bf16.mxu0 %v7136_v0  ;;  %v7208_v0 = vld [vmem:[#allocation7 + $0x5ec] ss:$16 sps:$4 sm:$0xff]  }
 0x309   :  { %5649 = vmatpush2.bf16.msra.mxu0 %v7134_v49  ;;  %v7203_v49 = vld [vmem:[#allocation7 + $0x268] ss:$16 sps:$4 sm:$0xff]  }
 0x30a   :  { %5650 = vmatprep.subr.bf16.mxu0 %v7142_v38  ;;  %v7211_v38 = vld [vmem:[#allocation7 + $0x24c] ss:$16 sps:$4 sm:$0xff]  }
 0x30d   :  { %5651 = vmatpush2.bf16.msra.mxu0 %v7140_v5  ;;  %v7206_v5 = vld [vmem:[#allocation7 + $0x5e8] ss:$16 sps:$4 sm:$0xff]  }
 0x30e   :  { %5652 = vmatprep.subr.bf16.mxu0 %v7148_v41  ;;  %v7209_v41 = vld [vmem:[#allocation7 + $0x248] ss:$16 sps:$4 sm:$0xff]  }
 0x311   :  { %5653 = vmatpush2.bf16.msra.mxu0 %v7146_v42  ;;  %v7212_v42 = vld [vmem:[#allocation7 + $0x5c8] ss:$16 sps:$4 sm:$0xff]  }
 0x312   :  { %5654 = vmatprep.subr.bf16.mxu0 %v7154_v50  ;;  %v7215_v50 = vld [vmem:[#allocation7 + $0x228] ss:$16 sps:$4 sm:$0xff]  }
 0x315   :  { %5655 = vmatpush2.bf16.msra.mxu0 %v7152_v54  ;;  %v7218_v54 = vld [vmem:[#allocation7 + $0x5a8] ss:$16 sps:$4 sm:$0xff]  }
 0x316   :  { %5710 = vmatprep.subr.bf16.mxu0 %v7160_v56  ;;  %v7221_v56 = vld [vmem:[#allocation7 + $0x208] ss:$16 sps:$4 sm:$0xff]  }
 0x318   :  { %v3834_v7 = vpop.f32.mrf.mxu0  ;;  %5657 = vmatmul.mubr.bf16.vlgmr.msra.gmra.mxu0 %v7596_v33  ;;  %v3877_v9 = vpop.f32.mrf.mxu1 }
 0x319   :  { %5711 = vmatpush1.bf16.msra.mxu0 %v7158_v1  ;;  %5742 = vmatprep.mubr.bf16.mxu0 %v7670_v19  ;;  %v3835_v33 = vadd.f32 %v3834_v7, %v3792_v16  ;;  %v7224_v1 = vld [vmem:[#allocation7 + $0x588] ss:$16 sps:$4 sm:$0xff]  }
 0x31a   :  { %v3836_v10 = vpop.f32.mrf.mxu0  ;;  %5712 = vmatprep.subr.bf16.mxu0 %v7166_v4  ;;  %v3879_v31 = vpop.f32.mrf.mxu1  ;;  %v7227_v4 = vld [vmem:[#allocation7 + $0x3e8] ss:$16 sps:$4 sm:$0xff]  }
 0x31b   :  { %v3837_v58 = vadd.f32 %v3836_v10, %v3794_v14  ;;  %v3878_v53 = vadd.f32 %v3877_v9, %v3835_v33  ;;  %v7230_v7 = vld [vmem:[#allocation7 + $0x568] ss:$16 sps:$4 sm:$0xff]   ;;  %v7238_v9 = vld [vmem:[#allocation7 + $0x54c] ss:$16 sps:$4 sm:$0xff]  }
 0x31c   :  { %v3838_v17 = vpop.f32.mrf.mxu0  ;;  %v3881_v12 = vpop.f32.mrf.mxu1  ;;  %v7241_v10 = vld [vmem:[#allocation7 + $0x3ac] ss:$16 sps:$4 sm:$0xff]   ;;  %v7242_v16 = vld [vmem:[#allocation7 + $0x528] ss:$16 sps:$4 sm:$0xff]  }
 0x31d   :  { %v3839_v34 = vadd.f32 %v3838_v17, %v3796_v15  ;;  %5713 = vmatpush1.bf16.msra.mxu0 %v7164_v25  ;;  %v3880_v52 = vadd.f32 %v3879_v31, %v3837_v58  ;;  %v7233_v25 = vld [vmem:[#allocation7 + $0x3c8] ss:$16 sps:$4 sm:$0xff]   ;;  %v7244_v14 = vld [vmem:[#allocation7 + $0x52c] ss:$16 sps:$4 sm:$0xff]  }
 0x31e   :  { %v3840_v40 = vpop.f32.mrf.mxu0  ;;  %5714 = vmatprep.subr.bf16.mxu0 %v7172_v11  ;;  %v3883_v13 = vpop.f32.mrf.mxu1  ;;  %v7236_v11 = vld [vmem:[#allocation7 + $0x548] ss:$16 sps:$4 sm:$0xff]   ;;  %v7247_v31 = vld [vmem:[#allocation7 + $0x38c] ss:$16 sps:$4 sm:$0xff]  }
 0x31f   :  { %v3841_v19 = vadd.f32 %v3840_v40, %v3798_v18  ;;  %v3882_v21 = vadd.f32 %v3881_v12, %v3839_v34  ;;  %v7239_v15 = vld [vmem:[#allocation7 + $0x3a8] ss:$16 sps:$4 sm:$0xff]   ;;  %v7250_v17 = vld [vmem:[#allocation7 + $0x50c] ss:$16 sps:$4 sm:$0xff]  }
 0x320   :  { %v7245_v18 = vld [vmem:[#allocation7 + $0x388] ss:$16 sps:$4 sm:$0xff]   ;;  %v7253_v58 = vld [vmem:[#allocation7 + $0x36c] ss:$16 sps:$4 sm:$0xff]  }
 0x321   :  { %v3884_v60 = vadd.f32 %v3883_v13, %v3841_v19  ;;  %5715 = vmatpush1.bf16.msra.mxu0 %v7170_v39  ;;  %v7689_v26 = vpack.c.bf16 %v3882_v21, %v3878_v53  ;;  %v7248_v34 = vld [vmem:[#allocation7 + $0x508] ss:$16 sps:$4 sm:$0xff]   ;;  %v5835_v39 = vld [vmem:[#allocation10 + $0xf8] sm:$0xff] }
 0x322   :  { %5716 = vmatprep.subr.bf16.mxu0 %v7178_v36  ;;  %v7251_v12 = vld [vmem:[#allocation7 + $0x368] ss:$16 sps:$4 sm:$0xff]   ;;  %v7256_v33 = vld [vmem:[#allocation7 + $0x34c] ss:$16 sps:$4 sm:$0xff]  }
 0x323   :  { %v7687_v23 = vpack.c.bf16 %v3884_v60, %v3880_v52  ;;  %v5819_v40 = vld [vmem:[#allocation10 + $0x78] sm:$0xff]  ;;  %v7254_v36 = vld [vmem:[#allocation7 + $0x348] ss:$16 sps:$4 sm:$0xff]   ;;  %v5833_v52 = vld [vmem:[#allocation10 + $0xe8] sm:$0xff] }
 0x324   :  { %v5834_v19 = vld [vmem:[#allocation10 + $0xf0] sm:$0xff]  ;;  %v7259_v21 = vld [vmem:[#allocation7 + $0x32c] ss:$16 sps:$4 sm:$0xff]   ;;  %v5832_v53 = vld [vmem:[#allocation10 + $0xe0] sm:$0xff] }
 0x325   :  { %5613 = vmatprep.mubr.bf16.mxu1 %v7687_v23  ;;  %5717 = vmatpush1.bf16.msra.mxu0 %v7176_v20  ;;  %v5818_v13 = vld [vmem:[#allocation10 + $0x70] sm:$0xff]  ;;  %v5817_v60 = vld [vmem:[#allocation10 + $0x68] sm:$0xff] }
 0x326   :  { %5614 = vmatmul.mubr.bf16.vlgmr.msra.gmra.mxu1 %v7689_v26  ;;  %5718 = vmatprep.subr.bf16.mxu0 %v7184_v22  ;;  %v7257_v20 = vld [vmem:[#allocation7 + $0x328] ss:$16 sps:$4 sm:$0xff]   ;;  %v7262_v22 = vld [vmem:[#allocation7 + $0x30c] ss:$16 sps:$4 sm:$0xff]  }
 0x327   :  { %5668 = vmatpush1.bf16.msra.mxu1 %v7179_v24  ;;  %5699 = vmatprep.mubr.bf16.mxu1 %v7647_v48  ;;  %v7200_v48 = vld [vmem:[#allocation7 + $0x408] ss:$16 sps:$4 sm:$0xff]  }
 0x328   :  { %5669 = vmatprep.subr.bf16.mxu1 %v7187_v57  ;;  %v5816_v24 = vld [vmem:[#allocation10 + $0x60] sm:$0xff]  ;;  %v5831_v57 = vld [vmem:[#allocation10 + $0xd8] sm:$0xff] }
 0x329   :  { %5719 = vmatpush1.bf16.msra.mxu0 %v7182_v61  ;;  %v5815_v61 = vld [vmem:[#allocation10 + $0x58] sm:$0xff] }
 0x32a   :  { %5720 = vmatprep.subr.bf16.mxu0 %v7190_v35  ;;  %v5830_v35 = vld [vmem:[#allocation10 + $0xd0] sm:$0xff] }
 0x32b   :  { %5670 = vmatpush1.bf16.msra.mxu1 %v7185_v27  ;;  %v7265_v27 = vld [vmem:[#allocation7 + $0x6ec] ss:$16 sps:$4 sm:$0xff]  }
 0x32c   :  { %5671 = vmatprep.subr.bf16.mxu1 %v7193_v28  ;;  %v5814_v28 = vld [vmem:[#allocation10 + $0x50] sm:$0xff] }
 0x32d   :  { %5721 = vmatpush1.bf16.msra.mxu0 %v7188_v44  ;;  %v5829_v44 = vld [vmem:[#allocation10 + $0xc8] sm:$0xff] }
 0x32e   :  { %5722 = vmatprep.subr.bf16.mxu0 %v7196_v32  ;;  %v5813_v32 = vld [vmem:[#allocation10 + $0x48] sm:$0xff] }
 0x32f   :  { %5672 = vmatpush1.bf16.msra.mxu1 %v7191_v43  ;;  %v7263_v43 = vld [vmem:[#allocation7 + $0x6e8] ss:$16 sps:$4 sm:$0xff]  }
 0x330   :  { %5673 = vmatprep.subr.bf16.mxu1 %v7199_v29  ;;  %v5828_v29 = vld [vmem:[#allocation10 + $0xc0] sm:$0xff] }
 0x331   :  { %5723 = vmatpush1.bf16.msra.mxu0 %v7194_v62  ;;  %v7268_v62 = vld [vmem:[#allocation7 + $0x6cc] ss:$16 sps:$4 sm:$0xff]  }
 0x332   :  { %5724 = vmatprep.subr.bf16.mxu0 %v7202_v2  ;;  %v5812_v2 = vld [vmem:[#allocation10 + $0x40] sm:$0xff] }
 0x333   :  { %5674 = vmatpush1.bf16.msra.mxu1 %v7197_v8  ;;  %v5827_v8 = vld [vmem:[#allocation10 + $0xb8] sm:$0xff] }
 0x334   :  { %5675 = vmatprep.subr.bf16.mxu1 %v7205_v30  ;;  %v7266_v30 = vld [vmem:[#allocation7 + $0x6c8] ss:$16 sps:$4 sm:$0xff]  }
 0x335   :  { %5725 = vmatpush1.bf16.msra.mxu0 %v7200_v48  ;;  %v5811_v48 = vld [vmem:[#allocation10 + $0x38] sm:$0xff] }
 0x336   :  { %5726 = vmatprep.subr.bf16.mxu0 %v7208_v0  ;;  %v7271_v0 = vld [vmem:[#allocation7 + $0x6ac] ss:$16 sps:$4 sm:$0xff]  }
 0x337   :  { %5676 = vmatpush1.bf16.msra.mxu1 %v7203_v49  ;;  %v5826_v49 = vld [vmem:[#allocation10 + $0xb0] sm:$0xff] }
 0x338   :  { %5677 = vmatprep.subr.bf16.mxu1 %v7211_v38  ;;  %v5810_v38 = vld [vmem:[#allocation10 + $0x30] sm:$0xff] }
 0x339   :  { %5727 = vmatpush2.bf16.msra.mxu0 %v7206_v5  ;;  %v5825_v5 = vld [vmem:[#allocation10 + $0xa8] sm:$0xff] }
 0x33a   :  { %5728 = vmatprep.subr.bf16.mxu0 %v7214_v46  ;;  %v7269_v46 = vld [vmem:[#allocation7 + $0x6a8] ss:$16 sps:$4 sm:$0xff]  }
 0x33b   :  { %5678 = vmatpush1.bf16.msra.mxu1 %v7209_v41  ;;  %v5809_v41 = vld [vmem:[#allocation10 + $0x28] sm:$0xff] }
 0x33c   :  { %5679 = vmatprep.subr.bf16.mxu1 %v7217_v47  ;;  %v5824_v47 = vld [vmem:[#allocation10 + $0xa0] sm:$0xff] }
 0x33d   :  { %5729 = vmatpush2.bf16.msra.mxu0 %v7212_v42  ;;  %v5823_v42 = vld [vmem:[#allocation10 + $0x98] sm:$0xff] }
 0x33e   :  { %5730 = vmatprep.subr.bf16.mxu0 %v7220_v45  ;;  %v7272_v45 = vld [vmem:[#allocation7 + $0x688] ss:$16 sps:$4 sm:$0xff]  }
 0x33f   :  { %5680 = vmatpush1.bf16.msra.mxu1 %v7215_v50  ;;  %v5807_v50 = vld [vmem:[#allocation10 + $0x18] sm:$0xff] }
 0x340   :  { %5681 = vmatprep.subr.bf16.mxu1 %v7223_v51  ;;  %v7277_v51 = vld [vmem:[#allocation7 + $0x66c] ss:$16 sps:$4 sm:$0xff]  }
 0x341   :  { %5731 = vmatpush2.bf16.msra.mxu0 %v7218_v54  ;;  %v5822_v54 = vld [vmem:[#allocation10 + $0x90] sm:$0xff] }
 0x342   :  { %5732 = vmatprep.subr.bf16.mxu0 %v7226_v55  ;;  %v5806_v55 = vld [vmem:[#allocation10 + $0x10] sm:$0xff] }
 0x343   :  { %5682 = vmatpush1.bf16.msra.mxu1 %v7221_v56  ;;  %v5821_v56 = vld [vmem:[#allocation10 + $0x88] sm:$0xff] }
 0x344   :  { %5683 = vmatprep.subr.bf16.mxu1 %v7229_v59  ;;  %v7275_v59 = vld [vmem:[#allocation7 + $0x668] ss:$16 sps:$4 sm:$0xff]  }
 0x345   :  { %5733 = vmatpush2.bf16.msra.mxu0 %v7224_v1  ;;  %v5805_v1 = vld [vmem:[#allocation10 + $0x8] sm:$0xff] }
 0x346   :  { %5734 = vmatprep.subr.bf16.mxu0 %v7232_v3  ;;  %v7280_v3 = vld [vmem:[#allocation7 + $0x64c] ss:$16 sps:$4 sm:$0xff]  }
 0x347   :  { %5684 = vmatpush2.bf16.msra.mxu1 %v7227_v4  ;;  %v5820_v4 = vld [vmem:[#allocation10 + $0x80] sm:$0xff] }
 0x348   :  { %5685 = vmatprep.subr.bf16.mxu1 %v7235_v6  ;;  %v5804_v6 = vld [vmem:[#allocation10] sm:$0xff] }
 0x349   :  { %5735 = vmatpush2.bf16.msra.mxu0 %v7230_v7  ;;  %v7278_v7 = vld [vmem:[#allocation7 + $0x648] ss:$16 sps:$4 sm:$0xff]  }
 0x34a   :  { %5736 = vmatprep.subr.bf16.mxu0 %v7238_v9  ;;  %v7283_v9 = vld [vmem:[#allocation7 + $0x62c] ss:$16 sps:$4 sm:$0xff]  }
 0x34b   :  { %5686 = vmatpush2.bf16.msra.mxu1 %v7233_v25  ;;  %v7281_v25 = vld [vmem:[#allocation7 + $0x628] ss:$16 sps:$4 sm:$0xff]  }
 0x34c   :  { %5687 = vmatprep.subr.bf16.mxu1 %v7241_v10  ;;  %v7286_v10 = vld [vmem:[#allocation7 + $0x60c] ss:$16 sps:$4 sm:$0xff]  }
 0x34d   :  { %5737 = vmatpush2.bf16.msra.mxu0 %v7236_v11  ;;  %v7284_v11 = vld [vmem:[#allocation7 + $0x608] ss:$16 sps:$4 sm:$0xff]  }
 0x34e   :  { %5738 = vmatprep.subr.bf16.mxu0 %v7244_v14  ;;  %v7289_v14 = vld [vmem:[#allocation7 + $0x7ec] ss:$16 sps:$4 sm:$0xff]  }
 0x34f   :  { %5688 = vmatpush2.bf16.msra.mxu1 %v7239_v15  ;;  %v7287_v15 = vld [vmem:[#allocation7 + $0x7e8] ss:$16 sps:$4 sm:$0xff]  }
 0x350   :  { %5689 = vmatprep.subr.bf16.mxu1 %v7247_v31  ;;  %v7292_v31 = vld [vmem:[#allocation7 + $0x7cc] ss:$16 sps:$4 sm:$0xff]  }
 0x351   :  { %5739 = vmatpush2.bf16.msra.mxu0 %v7242_v16  ;;  %v7290_v16 = vld [vmem:[#allocation7 + $0x7c8] ss:$16 sps:$4 sm:$0xff]  }
 0x352   :  { %5740 = vmatprep.subr.bf16.mxu0 %v7250_v17  ;;  %v7295_v17 = vld [vmem:[#allocation7 + $0x7ac] ss:$16 sps:$4 sm:$0xff]  }
 0x353   :  { %5690 = vmatpush2.bf16.msra.mxu1 %v7245_v18  ;;  %v7293_v18 = vld [vmem:[#allocation7 + $0x7a8] ss:$16 sps:$4 sm:$0xff]  }
 0x354   :  { %5691 = vmatprep.subr.bf16.mxu1 %v7253_v58  ;;  %v7298_v58 = vld [vmem:[#allocation7 + $0x78c] ss:$16 sps:$4 sm:$0xff]  }
 0x355   :  { %5741 = vmatpush2.bf16.msra.mxu0 %v7248_v34  ;;  %v7296_v34 = vld [vmem:[#allocation7 + $0x788] ss:$16 sps:$4 sm:$0xff]  }
 0x356   :  { %6836 = vmatprep.subr.mxu0 %v5835_v39  ;;  %v7299_v39 = vld [vmem:[#allocation7 + $0x768] ss:$16 sps:$4 sm:$0xff]  }
 0x357   :  { %5692 = vmatpush2.bf16.msra.mxu1 %v7251_v12  ;;  %v7301_v12 = vld [vmem:[#allocation7 + $0x76c] ss:$16 sps:$4 sm:$0xff]  }
 0x358   :  { %5743 = vmatmul.mubr.bf16.vlgmr.msra.gmra.mxu0 %v7681_v37  ;;  %5693 = vmatprep.subr.bf16.mxu1 %v7256_v33  ;;  %v7260_v37 = vld [vmem:[#allocation7 + $0x308] ss:$16 sps:$4 sm:$0xff]   ;;  %v7304_v33 = vld [vmem:[#allocation7 + $0x74c] ss:$16 sps:$4 sm:$0xff]  }
 0x359   :  { %6837 = vmatpush3.msra.mxu0 %v5819_v40  ;;  %v7302_v40 = vld [vmem:[#allocation7 + $0x748] ss:$16 sps:$4 sm:$0xff]  }
 0x35a   :  { %6838 = vmatprep.subr.mxu0 %v5834_v19  ;;  %v7305_v19 = vld [vmem:[#allocation7 + $0x728] ss:$16 sps:$4 sm:$0xff]  }
 0x35b   :  { %5694 = vmatpush2.bf16.msra.mxu1 %v7254_v36  ;;  %6839 = vmatpush3.msra.mxu0 %v5818_v13  ;;  %v7307_v36 = vld [vmem:[#allocation7 + $0x72c] ss:$16 sps:$4 sm:$0xff]   ;;  %v7308_v13 = vld [vmem:[#allocation7 + $0x708] ss:$16 sps:$4 sm:$0xff]  }
 0x35c   :  { %5695 = vmatprep.subr.bf16.mxu1 %v7259_v21  ;;  %6840 = vmatprep.subr.mxu0 %v5833_v52  ;;  %v7310_v21 = vld [vmem:[#allocation7 + $0x70c] ss:$16 sps:$4 sm:$0xff]  }
 0x35d   :  { %6841 = vmatpush3.msra.mxu0 %v5817_v60  ;;  %v5867_v52 = vld [vmem:[#allocation10 + $0x1f8] sm:$0xff] }
 0x35e   :  { %6842 = vmatprep.subr.mxu0 %v5832_v53  ;;  %v5851_v60 = vld [vmem:[#allocation10 + $0x178] sm:$0xff]  ;;  %v5850_v53 = vld [vmem:[#allocation10 + $0x170] sm:$0xff] }
 0x35f   :  { %5696 = vmatpush2.bf16.msra.mxu1 %v7257_v20  ;;  %6843 = vmatpush3.msra.mxu0 %v5816_v24  ;;  %v5866_v20 = vld [vmem:[#allocation10 + $0x1f0] sm:$0xff]  ;;  %v5849_v24 = vld [vmem:[#allocation10 + $0x168] sm:$0xff] }
 0x360   :  { %5697 = vmatprep.subr.bf16.mxu1 %v7262_v22  ;;  %6844 = vmatprep.subr.mxu0 %v5831_v57  ;;  %v5865_v22 = vld [vmem:[#allocation10 + $0x1e8] sm:$0xff]  ;;  %v5864_v57 = vld [vmem:[#allocation10 + $0x1e0] sm:$0xff] }
 0x361   :  { %6845 = vmatpush3.msra.mxu0 %v5815_v61  ;;  %v5848_v61 = vld [vmem:[#allocation10 + $0x160] sm:$0xff] }
 0x362   :  { %6846 = vmatprep.subr.mxu0 %v5830_v35  ;;  %v5847_v35 = vld [vmem:[#allocation10 + $0x158] sm:$0xff] }
 0x363   :  { %5698 = vmatpush2.bf16.msra.mxu1 %v7260_v37  ;;  %6847 = vmatpush3.msra.mxu0 %v5814_v28  ;;  %v5863_v37 = vld [vmem:[#allocation10 + $0x1d8] sm:$0xff]  ;;  %v5861_v28 = vld [vmem:[#allocation10 + $0x1c8] sm:$0xff] }
 0x364   :  { %5753 = vmatprep.subr.bf16.mxu1 %v7265_v27  ;;  %6848 = vmatprep.subr.mxu0 %v5829_v44  ;;  %v5862_v27 = vld [vmem:[#allocation10 + $0x1d0] sm:$0xff]  ;;  %v5845_v44 = vld [vmem:[#allocation10 + $0x148] sm:$0xff] }
 0x365   :  { %6849 = vmatpush3.msra.mxu0 %v5813_v32  ;;  %v5860_v32 = vld [vmem:[#allocation10 + $0x1c0] sm:$0xff] }
 0x366   :  { %5700 = vmatmul.mubr.bf16.vlgmr.msra.gmra.mxu1 %v7628_v63  ;;  %6850 = vmatprep.subr.mxu0 %v5828_v29  ;;  %v7274_v63 = vld [vmem:[#allocation7 + $0x68c] ss:$16 sps:$4 sm:$0xff]  }
 0x367   :  { %5754 = vmatpush1.bf16.msra.mxu1 %v7263_v43  ;;  %5785 = vmatprep.mubr.bf16.mxu1 %v7687_v23  ;;  %v5808_v23 = vld [vmem:[#allocation10 + $0x20] sm:$0xff]  ;;  %v5859_v29 = vld [vmem:[#allocation10 + $0x1b8] sm:$0xff] }
 0x368   :  { %5755 = vmatprep.subr.bf16.mxu1 %v7268_v62  ;;  %6851 = vmatpush3.msra.mxu0 %v5812_v2  ;;  %v5844_v43 = vld [vmem:[#allocation10 + $0x140] sm:$0xff]  ;;  %v5843_v62 = vld [vmem:[#allocation10 + $0x138] sm:$0xff]  ;;  %v5858_v2 = vld [vmem:[#allocation10 + $0x1b0] sm:$0xff] }
 0x369   :  { %6852 = vmatprep.subr.mxu0 %v5827_v8  ;;  %v5842_v8 = vld [vmem:[#allocation10 + $0x130] sm:$0xff] }
 0x36a   :  { %6853 = vmatpush3.msra.mxu0 %v5811_v48  ;;  %v5841_v48 = vld [vmem:[#allocation10 + $0x128] sm:$0xff] }
 0x36b   :  { %5756 = vmatpush1.bf16.msra.mxu1 %v7266_v30  ;;  %6854 = vmatprep.subr.mxu0 %v5826_v49  ;;  %v5857_v30 = vld [vmem:[#allocation10 + $0x1a8] sm:$0xff]  ;;  %v5840_v49 = vld [vmem:[#allocation10 + $0x120] sm:$0xff] }
 0x36c   :  { %5757 = vmatprep.subr.bf16.mxu1 %v7271_v0  ;;  %6855 = vmatpush3.msra.mxu0 %v5810_v38  ;;  %v5856_v0 = vld [vmem:[#allocation10 + $0x1a0] sm:$0xff]  ;;  %v5486_v38 = vpop.f32.mrf.mxu0 }
 0x36d   :  { %6856 = vmatprep.subr.mxu0 %v5825_v5  ;;  %v4152_v5 = vlaneseq }
 0x36e   :  { %6857 = vmatpush3.msra.mxu0 %v5809_v41 }
 0x36f   :  { %5758 = vmatpush1.bf16.msra.mxu1 %v7269_v46  ;;  %6858 = vmatprep.subr.mxu0 %v5824_v47  ;;  %v5488_v46 = vpop.f32.mrf.mxu0  ;;  %v7698_v41 = vshrl.u32 %v4152_v5, 7 }
 0x370   :  { %5759 = vmatprep.subr.bf16.mxu1 %v7274_v63  ;;  %6859 = vmatpush3.msra.mxu0 %v5808_v23  ;;  %v5529_v23 = vpop.f32.mrf.mxu1 }
 0x371   :  { %6860 = vmatprep.subr.mxu0 %v5823_v42  ;;  %v5490_v63 = vpop.f32.mrf.mxu0  ;;  %v4154_v47 = vsub.s32 0, %v7698_v41  ;;  %v7701_v42 = vld [vmem:[#allocation8] sm:$0xf] }
 0x372   :  { %6861 = vmatpush3.msra.mxu0 %v5807_v50 }
 0x373   :  { %5760 = vmatpush1.bf16.msra.mxu1 %v7272_v45  ;;  %6862 = vmatprep.subr.mxu0 %v5822_v54  ;;  %v4158_v45 = vsub.s32 1, %v7698_v41  ;;  %v5492_v50 = vpop.f32.mrf.mxu0  ;;  %v5531_v54 = vpop.f32.mrf.mxu1 }
 0x374   :  { %5761 = vmatprep.subr.bf16.mxu1 %v7277_v51  ;;  %6863 = vmatpush3.msra.mxu0 %v5806_v55  ;;  %v4155_v51 = vrot.slane %v7701_v42, %v4154_v47 }
 0x375   :  { %6864 = vmatprep.subr.mxu0 %v5821_v56  ;;  %v4159_v56 = vrot.slane %v7701_v42, %v4158_v45 }
 0x376   :  { %6865 = vmatpush3.msra.mxu0 %v5805_v1  ;;  %v5533_v1 = vpop.f32.mrf.mxu1 }
 0x377   :  { %5762 = vmatpush1.bf16.msra.mxu1 %v7275_v59  ;;  %6866 = vmatprep.subr.mxu0 %v5820_v4  ;;  %v5487_v59 = vadd.f32 %v5486_v38, %v4155_v51  ;;  %v5489_v4 = vadd.f32 %v5488_v46, %v4159_v56 }
 0x378   :  { %5763 = vmatprep.subr.bf16.mxu1 %v7280_v3  ;;  %6867 = vmatpush3.msra.mxu0 %v5804_v6 }
 0x379   :  { %v5530_v6 = vadd.f32 %v5529_v23, %v5487_v59 }
 0x37b   :  { %5764 = vmatpush1.bf16.msra.mxu1 %v7278_v7  ;;  %v5491_v7 = vadd.f32 %v5490_v63, %v4155_v51 }
 0x37c   :  { %5765 = vmatprep.subr.bf16.mxu1 %v7283_v9  ;;  %v5535_v9 = vpop.f32.mrf.mxu1 }
 0x37f   :  { %5766 = vmatpush1.bf16.msra.mxu1 %v7281_v25 }
 0x380   :  { %5767 = vmatprep.subr.bf16.mxu1 %v7286_v10  ;;  %v5532_v10 = vadd.f32 %v5531_v54, %v5489_v4 }
 0x383   :  { %5768 = vmatpush1.bf16.msra.mxu1 %v7284_v11  ;;  %v5493_v11 = vadd.f32 %v5492_v50, %v4159_v56 }
 0x384   :  { %5769 = vmatprep.subr.bf16.mxu1 %v7289_v14 }
 0x387   :  { %5770 = vmatpush2.bf16.msra.mxu1 %v7287_v15 }
 0x388   :  { %5771 = vmatprep.subr.bf16.mxu1 %v7292_v31  ;;  %v5855_v31 = vld [vmem:[#allocation10 + $0x198] sm:$0xff] }
 0x38b   :  { %5772 = vmatpush2.bf16.msra.mxu1 %v7290_v16 }
 0x38c   :  { %5773 = vmatprep.subr.bf16.mxu1 %v7295_v17  ;;  %v5839_v17 = vld [vmem:[#allocation10 + $0x118] sm:$0xff] }
 0x38f   :  { %5774 = vmatpush2.bf16.msra.mxu1 %v7293_v18  ;;  %v5534_v18 = vadd.f32 %v5533_v1, %v5491_v7 }
 0x390   :  { %5775 = vmatprep.subr.bf16.mxu1 %v7298_v58 }
 0x393   :  { %5776 = vmatpush2.bf16.msra.mxu1 %v7296_v34 }
 0x394   :  { %5777 = vmatprep.subr.bf16.mxu1 %v7301_v12 }
 0x397   :  { %5778 = vmatpush2.bf16.msra.mxu1 %v7299_v39  ;;  %v5854_v39 = vld [vmem:[#allocation10 + $0x190] sm:$0xff] }
 0x398   :  { %5779 = vmatprep.subr.bf16.mxu1 %v7304_v33  ;;  %v5572_v55 = vpop.f32.mrf.mxu0  ;;  %v5536_v33 = vadd.f32 %v5535_v9, %v5493_v11 }
 0x399   :  { %v5573_v14 = vadd.f32 %v5572_v55, %v5530_v6 }
 0x39a   :  { %v5574_v3 = vpop.f32.mrf.mxu0 }
 0x39b   :  { %5780 = vmatpush2.bf16.msra.mxu1 %v7302_v40  ;;  %v5575_v16 = vadd.f32 %v5574_v3, %v5532_v10 }
 0x39c   :  { %5781 = vmatprep.subr.bf16.mxu1 %v7307_v36  ;;  %v5576_v25 = vpop.f32.mrf.mxu0  ;;  %v5838_v36 = vld [vmem:[#allocation10 + $0x110] sm:$0xff] }
 0x39e   :  { %v5578_v58 = vpop.f32.mrf.mxu0 }
 0x39f   :  { %5782 = vmatpush2.bf16.msra.mxu1 %v7305_v19  ;;  %v5577_v19 = vadd.f32 %v5576_v25, %v5534_v18 }
 0x3a0   :  { %5783 = vmatprep.subr.bf16.mxu1 %v7310_v21 }
 0x3a3   :  { %5784 = vmatpush2.bf16.msra.mxu1 %v7308_v13  ;;  %v5853_v13 = vld [vmem:[#allocation10 + $0x188] sm:$0xff] }
 0x3a4   :  { %6874 = vmatprep.subr.mxu1 %v5867_v52  ;;  %v5579_v52 = vadd.f32 %v5578_v58, %v5536_v33 }
 0x3a6   :  { %5786 = vmatmul.mubr.bf16.vlgmr.msra.gmra.mxu1 %v7689_v26  ;;  %v5846_v26 = vld [vmem:[#allocation10 + $0x150] sm:$0xff] }
 0x3a7   :  { %6875 = vmatpush3.msra.mxu1 %v5851_v60 }
 0x3a8   :  { %6876 = vmatprep.subr.mxu1 %v5866_v20  ;;  %v5837_v20 = vld [vmem:[#allocation10 + $0x108] sm:$0xff] }
 0x3a9   :  { %6877 = vmatpush3.msra.mxu1 %v5850_v53 }
 0x3aa   :  { %6878 = vmatprep.subr.mxu1 %v5865_v22 }
 0x3ab   :  { %6879 = vmatpush3.msra.mxu1 %v5849_v24 }
 0x3ac   :  { %6880 = vmatprep.subr.mxu1 %v5864_v57  ;;  %v5852_v57 = vld [vmem:[#allocation10 + $0x180] sm:$0xff] }
 0x3ad   :  { %6881 = vmatpush3.msra.mxu1 %v5848_v61 }
 0x3ae   :  { %6882 = vmatprep.subr.mxu1 %v5863_v37  ;;  %v5836_v37 = vld [vmem:[#allocation10 + $0x100] sm:$0xff] }
 0x3af   :  { %6883 = vmatpush3.msra.mxu1 %v5847_v35 }
 0x3b0   :  { %6884 = vmatprep.subr.mxu1 %v5862_v27 }
 0x3b1   :  { %6885 = vmatpush3.msra.mxu1 %v5846_v26 }
 0x3b2   :  { %6886 = vmatprep.subr.mxu1 %v5861_v28 }
 0x3b3   :  { %6887 = vmatpush3.msra.mxu1 %v5845_v44  ;;  %v4162_v44 = vsub.s32 2, %v7698_v41 }
 0x3b4   :  { %6888 = vmatprep.subr.mxu1 %v5860_v32 }
 0x3b5   :  { %6889 = vmatpush3.msra.mxu1 %v5844_v43 }
 0x3b6   :  { %6890 = vmatprep.subr.mxu1 %v5859_v29  ;;  %v4166_v29 = vsub.s32 3, %v7698_v41 }
 0x3b7   :  { %6891 = vmatpush3.msra.mxu1 %v5843_v62  ;;  %v4163_v62 = vrot.slane %v7701_v42, %v4162_v44 }
 0x3b8   :  { %6892 = vmatprep.subr.mxu1 %v5858_v2 }
 0x3b9   :  { %6893 = vmatpush3.msra.mxu1 %v5842_v8 }
 0x3ba   :  { %6894 = vmatprep.subr.mxu1 %v5857_v30  ;;  %v4167_v30 = vrot.slane %v7701_v42, %v4166_v29 }
 0x3bb   :  { %6895 = vmatpush3.msra.mxu1 %v5841_v48 }
 0x3bc   :  { %6896 = vmatprep.subr.mxu1 %v5856_v0 }
 0x3bd   :  { %6897 = vmatpush3.msra.mxu1 %v5840_v49 }
 0x3be   :  { %6898 = vmatprep.subr.mxu1 %v5855_v31 }
 0x3bf   :  { %6899 = vmatpush3.msra.mxu1 %v5839_v17 }
 0x3c0   :  { %6900 = vmatprep.subr.mxu1 %v5854_v39 }
 0x3c1   :  { %6901 = vmatpush3.msra.mxu1 %v5838_v36 }
 0x3c2   :  { %6902 = vmatprep.subr.mxu1 %v5853_v13 }
 0x3c3   :  { %6903 = vmatpush3.msra.mxu1 %v5837_v20 }
 0x3c4   :  { %6904 = vmatprep.subr.mxu1 %v5852_v57 }
 0x3c5   :  { %6905 = vmatpush3.msra.mxu1 %v5836_v37 }
 0x3d8   :  { %v5658_v26 = vpop.f32.mrf.mxu0 }
 0x3d9   :  { %v5659_v0 = vadd.f32 %v5658_v26, %v4163_v62 }
 0x3da   :  { %v5660_v28 = vpop.f32.mrf.mxu0 }
 0x3db   :  { %v5661_v38 = vadd.f32 %v5660_v28, %v4167_v30 }
 0x3dc   :  { %v5662_v32 = vpop.f32.mrf.mxu0 }
 0x3dd   :  { %v5663_v47 = vadd.f32 %v5662_v32, %v4163_v62 }
 0x3de   :  { %v5664_v2 = vpop.f32.mrf.mxu0 }
 0x3df   :  { %v5665_v45 = vadd.f32 %v5664_v2, %v4167_v30 }
 0x3e6   :  { %v5615_v15 = vpop.f32.mrf.mxu1 }
 0x3e7   :  { %v5616_v34 = vadd.f32 %v5615_v15, %v5573_v14 }
 0x3e8   :  { %v5617_v12 = vpop.f32.mrf.mxu1 }
 0x3e9   :  { %v5618_v40 = vadd.f32 %v5617_v12, %v5575_v16  ;;  %v5796_v53 = vmax.f32 %v5616_v34, 0.0  ;;  %v6835_v34 = vld [vmem:[#allocation11] ss:$0 sm:$0xff] }
 0x3ea   :  { %v5619_v21 = vpop.f32.mrf.mxu1 }
 0x3eb   :  { %v5797_v60 = vmax.f32 %v5618_v40, 0.0  ;;  %v5620_v22 = vadd.f32 %v5619_v21, %v5577_v19 }
 0x3ec   :  { %v5621_v24 = vpop.f32.mrf.mxu1 }
 0x3ed   :  { %v5622_v61 = vadd.f32 %v5621_v24, %v5579_v52  ;;  %5939 = vmatprep.mubr.f32.mxu0 %v5797_v60  ;;  %v5800_v27 = vmax.f32 %v5620_v22, 0.0 }
 0x3ee   :  { %5940 = vmatmul.mubr.f32.vlgmr.msra.gmra.mxu0 %v5796_v53 }
 0x3ef   :  { %v5801_v35 = vmax.f32 %v5622_v61, 0.0 }
 0x3f1   :  { %5944 = vmatprep.mubr.f32.mxu0 %v5801_v35 }
 0x3f2   :  { %5945 = vmatmul.mubr.f32.gmra.mxu0 %v5800_v27 }
 0x418   :  { %v5744_v48 = vpop.f32.mrf.mxu0 }
 0x41a   :  { %v5746_v5 = vpop.f32.mrf.mxu0 }
 0x41c   :  { %v5748_v50 = vpop.f32.mrf.mxu0 }
 0x41e   :  { %v5750_v42 = vpop.f32.mrf.mxu0 }
 0x426   :  { %v5701_v43 = vpop.f32.mrf.mxu1 }
 0x427   :  { %v5702_v46 = vadd.f32 %v5701_v43, %v5659_v0 }
 0x428   :  { %v5703_v8 = vpop.f32.mrf.mxu1 }
 0x429   :  { %v5704_v63 = vadd.f32 %v5703_v8, %v5661_v38  ;;  %v5745_v54 = vadd.f32 %v5744_v48, %v5702_v46 }
 0x42a   :  { %v5705_v49 = vpop.f32.mrf.mxu1 }
 0x42b   :  { %v5706_v51 = vadd.f32 %v5705_v49, %v5663_v47  ;;  %v5747_v56 = vadd.f32 %v5746_v5, %v5704_v63 }
 0x42c   :  { %v5707_v23 = vpop.f32.mrf.mxu1 }
 0x42d   :  { %v5708_v55 = vadd.f32 %v5707_v23, %v5665_v45  ;;  %v5749_v4 = vadd.f32 %v5748_v50, %v5706_v51 }
 0x42f   :  { %v5751_v9 = vadd.f32 %v5750_v42, %v5708_v55 }
 0x466   :  { %v5787_v41 = vpop.f32.mrf.mxu1 }
 0x467   :  { %v5788_v59 = vadd.f32 %v5787_v41, %v5745_v54 }
 0x468   :  { %v5789_v1 = vpop.f32.mrf.mxu1 }
 0x469   :  { %v5790_v3 = vadd.f32 %v5789_v1, %v5747_v56  ;;  %v5798_v25 = vmax.f32 %v5788_v59, 0.0 }
 0x46a   :  { %v5791_v6 = vpop.f32.mrf.mxu1 }
 0x46b   :  { %v5799_v7 = vmax.f32 %v5790_v3, 0.0  ;;  %v5792_v10 = vadd.f32 %v5791_v6, %v5749_v4 }
 0x46c   :  { %v5793_v11 = vpop.f32.mrf.mxu1 }
 0x46d   :  { %v5794_v14 = vadd.f32 %v5793_v11, %v5751_v9  ;;  %6014 = vmatprep.mubr.f32.mxu1 %v5799_v7  ;;  %v5802_v31 = vmax.f32 %v5792_v10, 0.0 }
 0x46e   :  { %6015 = vmatmul.mubr.f32.vlgmr.msra.gmra.mxu1 %v5798_v25 }
 0x46f   :  { %v5803_v15 = vmax.f32 %v5794_v14, 0.0 }
 0x471   :  { %6019 = vmatprep.mubr.f32.mxu1 %v5803_v15 }
 0x472   :  { %6020 = vmatmul.mubr.f32.gmra.mxu1 %v5802_v31 }
 0x4ae   :  { %v6868_v16 = vpop.f32.mrf.mxu0 }
 0x4b0   :  { %v6869_v17 = vpop.f32.mrf.mxu0 }
 0x4b1   :  { %v6870_v58 = vadd.f32 %v6869_v17, %v6868_v16 }
 0x4b2   :  { %v6871_v18 = vpop.f32.mrf.mxu0 }
 0x4b3   :  { %v5942_v40 = vadd.f32 %v6870_v58, %v6835_v34 }
 0x4b4   :  { %v6872_v12 = vpop.f32.mrf.mxu0 }
 0x4b5   :  { %v6873_v36 = vadd.f32 %v6872_v12, %v6871_v18 }
 0x4b7   :  { %v5947_v60 = vadd.f32 %v6873_v36, %v6835_v34 }
 0x52e   :  { %v6906_v39 = vpop.f32.mrf.mxu1 }
 0x530   :  { %v6907_v33 = vpop.f32.mrf.mxu1 }
 0x531   :  { %v6908_v19 = vadd.f32 %v6907_v33, %v6906_v39 }
 0x532   :  { %v6909_v21 = vpop.f32.mrf.mxu1 }
 0x533   :  { %v6017_v13 = vadd.f32 %v6908_v19, %v5942_v40 }
 0x534   :  { %v6910_v52 = vpop.f32.mrf.mxu1 }
 0x535   :  { %v6911_v20 = vadd.f32 %v6910_v52, %v6909_v21  ;;  %6025 = vmax.xlane.f32.xlu0 %v6017_v13 }
 0x537   :  { %v6022_v53 = vadd.f32 %v6911_v20, %v5947_v60 }
 0x539   :  { %6027 = vmax.xlane.f32.xlu0 %v6022_v53 }
 0x5be   :  { %v6026_v22 = vpop.xlane.xlu0 %6025 }
 0x5bf   :  { %v6029_v24 = vsub.f32 %v6017_v13, %v6026_v22 }
 0x5c1   :  { %v6031_v57 = vmul.f32 1.442695, %v6029_v24 }
 0x5c2   :  { %v6028_v61 = vpop.xlane.xlu0 %6027 }
 0x5c3   :  { %v6030_v37 = vsub.f32 %v6022_v53, %v6028_v61  ;;  %7311 = vpow2.f32 %v6031_v57 }
 0x5c5   :  { %v6033_v35 = vmul.f32 1.442695, %v6030_v37 }
 0x5c7   :  { %7313 = vpow2.f32 %v6033_v35 }
 0x5d0   :  { %v7312_v27 = vpop.eup %7311 }
 0x5d1   :  { %6035 = vadd.xlane.f32.xlu1 %v7312_v27 }
 0x5d4   :  { %v7314_v26 = vpop.eup %7313 }
 0x5d5   :  { %6037 = vadd.xlane.f32.xlu1 %v7314_v26 }
 0x65a   :  { %v6036_v28 = vpop.xlane.xlu1 %6035 }
 0x65b   :  { %7315 = vlog2.f32 %v6036_v28 }
 0x65e   :  { %v6038_v44 = vpop.xlane.xlu1 %6037 }
 0x65f   :  { %7317 = vlog2.f32 %v6038_v44 }
 0x668   :  { %v7316_v32 = vpop.eup %7315 }
 0x669   :  { %v6040_v43 = vmul.f32 0.6931472, %v7316_v32 }
 0x66b   :  { %v6043_v29 = vsub.f32 %v6029_v24, %v6040_v43 }
 0x66c   :  { %v7318_v62 = vpop.eup %7317 }
 0x66d   :  { %v6042_v2 = vmul.f32 0.6931472, %v7318_v62  ;;  %6045 = vst [vmem:[#allocation13] sm:$0xff] %v6043_v29 }
 0x66f   :  { %v6044_v8 = vsub.f32 %v6030_v37, %v6042_v2 }
 0x671   :  { %6046 = vst [vmem:[#allocation13 + $0x8] sm:$0xff] %v6044_v8 }
 0x672   :  { %7450 = shalt.err (!%p7447_p6)
}
 0x673   :  { %6058 = dma.vmem_to_hbm [thread:$0]  %s6053_s5, 256, %s7722_s6, [#allocation4], %s7480_s23, %s7480_s23, %s7481_s24  }
 0x674   :  { %7467 = dma.done.wait [#allocation4], 256  }
 0x675   :  { %7468 = vsyncadd [#allocation4], 4294967040 }
 0x676   :  { %6062 = vsyncpa [#allocation3], 1 }
 0x677   :  { %6063 = vsyncpa [#allocation6], 1 }
 0x678   :  { %6064 = vsyncpa [#allocation9], 1 }
 0x679   :  { %6065 = vsyncpa [#allocation12], 1 }
 0x67a   :  { %6066 = vsyncpa [#allocation4], 1 }

</bundles_post_ra>
